<compile_context>
chip_gen: v6e
topology: v6e:2x2x1
jax: 0.10.0
libtpu: 0.0.40
codegen_flags: <defaults>
</compile_context>

<pallas_src>
import math
import numpy as np
import jax
import jax.numpy as jnp
from jax.experimental import pallas as pl
from jax.experimental.pallas import tpu as pltpu


# ----------------------------- Pallas kernel ------------------------------- #

def _make_kernel(s, Ks, Trows, Wq, Cin, Cout, off_col, neg_slope, per_tap):
    """One grid step = (sample n, sub-pixel row phase ry, row tile rt).

    Computes the s column phases (rx) for this ry and writes each into its lane
    slice of the NHWC-layout output block (interleave done by the output DMA).
    """
    M = Trows * Wq                                   # matmul M dim per phase

    def kernel(offr_ref, x_ref, w_ref, b_ref, o_ref, *scratch):
        # offr_ref: SMEM (s,) int32   per-ry row offsets into the padded input
        # x_ref:    (1, Hpad, Wpad, Cin) bf16  whole un-dilated sample (VMEM-resident)
        # w_ref:    (1, 1, s, Ks*Ks*Cin, Cout) bf16  flipped taps for this ry
        # b_ref:    (1, Cout) f32
        # o_ref:    (1, Trows, 1, Wq, s*Cout) f32  == NHWC rows (ry::s) of this tile
        ry = pl.program_id(1)
        rt = pl.program_id(2)
        row_base = rt * Trows
        if Trows % 8 == 0:
            row_base = pl.multiple_of(row_base, 8)
        r0 = row_base + offr_ref[ry]                 # dynamic start on the (major) row dim

        # hoist the bias broadcast out of the rx loop (broadcast_in_dim is not CSE'd)
        bias = jnp.broadcast_to(b_ref[...], (M, Cout))

        for rx in range(s):                          # static unroll over column phases
            c0 = off_col[rx]                         # python int
            if per_tap:
                # realistic Cin: Ks*Ks accumulating matmuls of depth Cin into a
                # persistent f32 VMEM accumulator (no im2col materialization)
                acc_ref = scratch[0]                 # (M, Cout) f32
                for t in range(Ks * Ks):
                    my, mx = t // Ks, t % Ks
                    slab = x_ref[0, pl.ds(r0 + my, Trows),
                                 pl.ds(c0 + mx, Wq), :].reshape(M, Cin)
                    wt = w_ref[0, 0, rx, pl.ds(t * Cin, Cin), :]       # (Cin, Cout)
                    part = jnp.dot(slab, wt, preferred_element_type=jnp.float32)
                    if t == 0:
                        acc_ref[...] = part
                    else:
                        acc_ref[...] += part
                acc = acc_ref[...]
            else:
                # small Cin: in-register im2col, single fused MXU pass of depth Ks*Ks*Cin
                pieces = []
                for my in range(Ks):
                    for mx in range(Ks):
                        slab = x_ref[0, pl.ds(r0 + my, Trows),
                                     pl.ds(c0 + mx, Wq), :]            # (Trows, Wq, Cin) bf16
                        pieces.append(slab.reshape(M, Cin))
                patch = jnp.concatenate(pieces, axis=-1)               # (M, Ks*Ks*Cin) bf16
                acc = jnp.dot(patch, w_ref[0, 0, rx],
                              preferred_element_type=jnp.float32)      # (M, Cout) f32

            res = acc + bias
            if neg_slope is not None:                                  # LeakyReLU
                res = jnp.where(res >= 0.0, res, neg_slope * res)
            # phase rx lands in lane slice [rx*Cout:(rx+1)*Cout] of the s*Cout-wide block
            o_ref[0, :, 0, :, pl.ds(rx * Cout, Cout)] = \
                res.reshape(Trows, Wq, Cout).astype(o_ref.dtype)

    return kernel


# ------------------------- tiling / VMEM budgeting -------------------------- #

def _vmem_budget_bytes():
    cap = 64 * 1024 * 1024                 # conservative default (v7x floor)
    try:
        cap = int(pltpu.get_tpu_info().vmem_capacity_bytes)
    except Exception:
        pass
    return int(min(cap * 3 // 4, 100 * 1024 * 1024))


def _pick_row_tile(Hq, Wq, per_pixel_bytes, fixed_bytes, vmem_limit):
    """Largest row tile whose per-step bytes fit the budget; prefers exact divisors
    of Hq with sublane-aligned M = Trows*Wq; falls back to a ragged (padded) last tile."""
    budget = max(vmem_limit - fixed_bytes, 256 * 1024)
    max_pixels = max(8, budget // max(per_pixel_bytes, 1))
    max_rows = int(max(1, min(Hq, max_pixels // max(Wq, 1))))
    for d in range(max_rows, 0, -1):       # exact divisor + aligned M
        if Hq % d == 0 and (d * Wq) % 8 == 0:
            return d
    for d in range(max_rows, 0, -1):       # exact divisor
        if Hq % d == 0:
            return d
    for d in range(max_rows, 0, -1):       # ragged last tile, aligned M
        if (d * Wq) % 8 == 0:
            return d
    return max_rows


# ------------------------------ pallas_call --------------------------------- #

def _phase_conv_pallas(xpad, w_ph, bias, off_row, off_col, s, Ks, Hq_pad, Wq,
                       Trows, neg_slope, per_tap, vmem_limit):
    N, Hpad, Wpad, Cin = xpad.shape
    Nw, _, _, CK, Cout = w_ph.shape
    n_rt = Hq_pad // Trows
    M = Trows * Wq
    per_sample_w = (Nw == N) and (N > 1)   # style-modulated ("grouped") path

    def x_map(n, ry, rt, offr):            # whole sample, resident across (ry, rt)
        return (n, 0, 0, 0)

    def w_map(n, ry, rt, offr):            # re-fetched only when ry (or n) changes
        return ((n if per_sample_w else 0), ry, 0, 0, 0)

    def b_map(n, ry, rt, offr):
        return (0, 0)

    def o_map(n, ry, rt, offr):
        return (n, rt, ry, 0, 0)

    kernel = _make_kernel(s, Ks, Trows, Wq, Cin, Cout, off_col, neg_slope, per_tap)
    scratch = [pltpu.VMEM((M, Cout), jnp.float32)] if per_tap else []

    return pl.pallas_call(
        kernel,
        out_shape=jax.ShapeDtypeStruct((N, Hq_pad, s, Wq, s * Cout), jnp.float32),
        grid_spec=pltpu.PrefetchScalarGridSpec(
            num_scalar_prefetch=1,
            grid=(N, s, n_rt),
            in_specs=[
                pl.BlockSpec((1, Hpad, Wpad, Cin), x_map),
                pl.BlockSpec((1, 1, s, CK, Cout), w_map),
                pl.BlockSpec((1, Cout), b_map),
            ],
            out_specs=pl.BlockSpec((1, Trows, 1, Wq, s * Cout), o_map),
            scratch_shapes=scratch,
        ),
        compiler_params=pltpu.CompilerParams(
            dimension_semantics=("parallel", "parallel", "parallel"),
            vmem_limit_bytes=int(vmem_limit),
        ),
    )(jnp.asarray(off_row, jnp.int32), xpad, w_ph,
      bias.reshape(1, Cout).astype(jnp.float32))


# ---------------------- parameter init (matches __init__) ------------------ #

def init_conv_transpose2d_elr(key, inch, outch, kernel_size, stride, padding,
                              wsize=0, affinelrmult=1.0, norm=None, ub=None,
                              act=None):
    """act: None or ('leaky_relu', negative_slope)."""
    ks = kernel_size
    if act is not None and act[0] == 'leaky_relu':
        actgain = math.sqrt(2.0 / (1.0 + act[1] ** 2))   # nn.init.calculate_gain
        neg_slope = act[1]
    else:
        actgain = 1.0
        neg_slope = None
    fan_in = inch * (ks ** 2 / stride ** 2)
    initgain = stride if norm == 'demod' else 1.0 / math.sqrt(fan_in)
    weightgain = actgain * initgain

    k_w, k_b, k_aw, k_ab = jax.random.split(key, 4)
    base = jax.random.normal(k_w, (inch, outch, ks // stride, ks // stride), jnp.float32)
    # blockinit: repeat each element into a (stride x stride) block
    weight = jnp.repeat(jnp.repeat(base, stride, axis=2), stride, axis=3)

    if ub is not None:
        # TODO(synk): spatial (ub) bias path not wired into the Pallas kernel.
        raise NotImplementedError("ub (spatial bias) not supported in this script")
    # module inits bias to zeros; use small random values so the bias-add is exercised
    bias = 0.1 * jax.random.normal(k_b, (outch,), jnp.float32)

    params = {'weight': weight, 'bias': bias}
    cfg = dict(inch=inch, outch=outch, kernel_size=ks, stride=stride,
               padding=padding, wsize=wsize, norm=norm,
               weightgain=weightgain, neg_slope=neg_slope)

    if wsize > 0:
        # self.affine = LinearELR(wsize, inch, lrmult=affinelrmult): act=None, norm=None
        params['aff_w'] = jax.random.normal(k_aw, (inch, wsize), jnp.float32) / affinelrmult
        params['aff_b'] = 0.1 * jax.random.normal(k_ab, (inch,), jnp.float32)
        cfg['aff_gain'] = 1.0 * (1.0 / math.sqrt(wsize)) * affinelrmult
    return params, cfg


# ------------------------------ forward pass ------------------------------- #

def conv_transpose2d_elr_forward(params, cfg, x, w=None, tap_mode="auto"):
    inch, outch = cfg['inch'], cfg['outch']
    K, s, p = cfg['kernel_size'], cfg['stride'], cfg['padding']
    N, _, H, W = x.shape

    weight = params['weight']                                    # (inch, outch, K, K)
    if cfg['wsize'] > 0 and w is not None:
        # LinearELR forward: bias + gain * (w @ W.T)
        affine = params['aff_b'][None, :] + cfg['aff_gain'] * (w @ params['aff_w'].T)
        wt = weight[None] * (affine[:, :, None, None, None] * 0.1 + 1.0)  # (N, Cin, Cout, K, K)
    else:
        wt = weight[None]                                                 # (1, Cin, Cout, K, K)
    if cfg['norm'] == 'demod':
        nrm = jnp.sqrt(jnp.sum(wt * wt, axis=(1, 3, 4), keepdims=True))
        wt = wt / jnp.maximum(nrm, 1e-12)
    wt = wt * cfg['weightgain']
    Nw = wt.shape[0]

    assert K % s == 0, "kernel_size must be divisible by stride (blockinit implies this)"
    Ks = K // s
    q = K - 1 - p
    assert q >= 0, "padding > kernel_size - 1 not supported"
    Hout = (H - 1) * s - 2 * p + K
    Wout = (W - 1) * s - 2 * p + K
    # TODO(synk): configs with (K - 2*padding) % stride != 0 have unequal per-phase
    # output extents and are not handled by the uniform-phase kernel.
    assert Hout % s == 0 and Wout % s == 0
    Hq, Wq = Hout // s, Wout // s

    # weight prep: spatial flip (transposed conv -> correlation), split into the s^2
    # sub-pixel phases, flatten (my, mx, Cin) into the contraction axis.
    wf = jnp.transpose(wt[:, :, :, ::-1, ::-1], (0, 3, 4, 1, 2))    # (Nw, K, K, Cin, Cout)
    rows = []
    for ry in range(s):
        ay = (q - ry) % s
        cols = []
        for rx in range(s):
            ax = (q - rx) % s
            sub = wf[:, ay::s, ax::s, :, :]                          # (Nw, Ks, Ks, Cin, Cout)
            cols.append(sub.reshape(Nw, Ks * Ks * inch, outch))
        rows.append(jnp.stack(cols, axis=1))                         # (Nw, s, CK, Cout)
    w_ph = jnp.stack(rows, axis=1).astype(jnp.bfloat16)              # (Nw, s_ry, s_rx, CK, Cout)

    # per-phase row/col offsets into the padded (UN-dilated) input
    b_off = [-((q - r) // s) for r in range(s)]          # python floor division
    pad_lo = max(0, max(-b for b in b_off))
    off = [pad_lo + b for b in b_off]                    # >= 0 by construction

    # contraction strategy: fused im2col only for small Cin; per-tap otherwise
    per_tap = (inch >= 128) if tap_mode == "auto" else (tap_mode == "tap")

    # row tiling driven by the chip's VMEM budget
    vmem_limit = _vmem_budget_bytes()
    per_pixel = 2 * s * outch * 4 + outch * 4 + \
        (inch * 2 if per_tap else Ks * Ks * inch * 2)
    fixed = 2 * (H + Ks + s) * (W + Ks + s) * inch * 2 + \
        2 * s * (Ks * Ks * inch) * outch * 2 + 64 * 1024
    Trows = _pick_row_tile(Hq, Wq, per_pixel, fixed, vmem_limit)
    n_rt = -(-Hq // Trows)
    Hq_pad = n_rt * Trows                                # ragged last tile reads zero-padding

    pad_hi_r = max(0, max(b_off) + Hq_pad + Ks - 1 - H)
    pad_hi_c = max(0, max(b_off) + Wq + Ks - 1 - W)

    # bf16 staging of the un-dilated input (small halo pad only, no stride^2 inflation)
    x_nhwc = jnp.transpose(x, (0, 2, 3, 1)).astype(jnp.bfloat16)
    xpad = jnp.pad(x_nhwc, ((0, 0), (pad_lo, pad_hi_r), (pad_lo, pad_hi_c), (0, 0)))

    out5 = _phase_conv_pallas(xpad, w_ph, params['bias'], off, off, s, Ks,
                              Hq_pad, Wq, Trows, cfg['neg_slope'], per_tap, vmem_limit)
    # (N, Hq_pad, s, Wq, s*Cout) is memory-identical to NHWC (N, Hout, Wout, Cout):
    # the sub-pixel interleave was already done by the output DMA; only a plain
    # NHWC->NCHW transpose remains for the module's output format.
    out = out5[:, :Hq].reshape(N, Hout, Wout, outch)
    return jnp.transpose(out, (0, 3, 1, 2))


# --------------------------- numpy reference -------------------------------- #

def _ref_conv_transpose2d(x, W, stride, padding):
    # x: (N, Cin, H, Wd) ; W: (Cin, Cout, K, K) ; F.conv_transpose2d semantics
    N, Cin, H, Wd = x.shape
    _, Cout, K, _ = W.shape
    Hout = (H - 1) * stride - 2 * padding + K
    Wout = (Wd - 1) * stride - 2 * padding + K
    full = np.zeros((N, Cout, (H - 1) * stride + K, (Wd - 1) * stride + K), np.float64)
    for ky in range(K):
        for kx in range(K):
            contrib = np.einsum('nchw,co->nohw', x, W[:, :, ky, kx])
            full[:, :, ky:ky + (H - 1) * stride + 1:stride,
                 kx:kx + (Wd - 1) * stride + 1:stride] += contrib
    return full[:, :, padding:padding + Hout, padding:padding + Wout]


def ref_forward(params, cfg, x, w=None):
    x = np.asarray(x, np.float64)
    weight = np.asarray(params['weight'], np.float64)
    if cfg['wsize'] > 0 and w is not None:
        w = np.asarray(w, np.float64)
        affine = np.asarray(params['aff_b'], np.float64)[None, :] + \
            cfg['aff_gain'] * (w @ np.asarray(params['aff_w'], np.float64).T)
        wt = weight[None] * (affine[:, :, None, None, None] * 0.1 + 1.0)
    else:
        wt = weight[None]
    if cfg['norm'] == 'demod':
        nrm = np.sqrt((wt * wt).sum(axis=(1, 3, 4), keepdims=True))
        wt = wt / np.maximum(nrm, 1e-12)
    wt = wt * cfg['weightgain']
    N = x.shape[0]
    outs = []
    for n in range(N):
        Wn = wt[n] if wt.shape[0] == N else wt[0]
        outs.append(_ref_conv_transpose2d(x[n:n + 1], Wn, cfg['stride'], cfg['padding']))
    out = np.concatenate(outs, 0)
    out = out + np.asarray(params['bias'], np.float64)[None, :, None, None]
    if cfg['neg_slope'] is not None:
        out = np.where(out >= 0, out, cfg['neg_slope'] * out)
    return out


# --------------------------------- main ------------------------------------ #

if __name__ == "__main__":
    key = jax.random.PRNGKey(0)
    k_p1, k_p2, k_x, k_w = jax.random.split(key, 4)

    N, H, W = 2, 16, 16
    inch, outch, K, stride, padding = 4, 8, 4, 2, 1
    x = jax.random.normal(k_x, (N, inch, H, W), jnp.float32)

    # Config 1: plain transposed conv (wsize=0, norm=None) + LeakyReLU(0.2), fused path
    p1, c1 = init_conv_transpose2d_elr(k_p1, inch, outch, K, stride, padding,
                                       wsize=0, norm=None, act=('leaky_relu', 0.2))
    out1 = jax.block_until_ready(conv_transpose2d_elr_forward(p1, c1, x))
    ref1 = ref_forward(p1, c1, np.asarray(x))
    np.testing.assert_allclose(np.asarray(out1), ref1, rtol=2e-2, atol=2e-2)

    # Config 1 again, forcing the per-tap accumulating-matmul path (large-Cin codepath)
    out1t = jax.block_until_ready(conv_transpose2d_elr_forward(p1, c1, x, tap_mode="tap"))
    np.testing.assert_allclose(np.asarray(out1t), ref1, rtol=2e-2, atol=2e-2)

    # Config 2: style-modulated path (wsize>0, norm='demod') -> per-sample (grouped) conv
    wsize = 8
    wvec = jax.random.normal(k_w, (N, wsize), jnp.float32)
    p2, c2 = init_conv_transpose2d_elr(k_p2, inch, outch, K, stride, padding,
                                       wsize=wsize, norm='demod', act=None)
    out2 = jax.block_until_ready(conv_transpose2d_elr_forward(p2, c2, x, wvec))
    np.testing.assert_allclose(np.asarray(out2),
                               ref_forward(p2, c2, np.asarray(x), np.asarray(wvec)),
                               rtol=2e-2, atol=2e-2)

    print("KERNEL_OK")
</pallas_src>

<mosaic_0001>
module attributes {stable_mosaic.version = 11 : i64} {
  func.func @kernel(%arg0: i32, %arg1: i32, %arg2: i32, %arg3: memref<2xi32, #tpu.memory_space<smem>>, %arg4: memref<1x18x18x4xbf16, #tpu.memory_space<vmem>>, %arg5: memref<1x1x2x16x8xbf16, #tpu.memory_space<vmem>>, %arg6: memref<1x8xf32, #tpu.memory_space<vmem>>, %arg7: memref<1x16x1x16x16xf32, #tpu.memory_space<vmem>>) attributes {dimension_semantics = [#tpu.dimension_semantics<parallel>, #tpu.dimension_semantics<parallel>, #tpu.dimension_semantics<parallel>], iteration_bounds = array<i64: 2, 2, 1>, scalar_prefetch = 1 : i64, scratch_operands = 0 : i64, tpu.core_type = #tpu.core_type<tc>, window_params = [{transform_indices = @transform_0, window_bounds = array<i64: 1, 18, 18, 4>}, {transform_indices = @transform_1, window_bounds = array<i64: 1, 1, 2, 16, 8>}, {pipeline_mode = #tpu.pipeline_mode<synchronous>, transform_indices = @transform_2, window_bounds = array<i64: 1, 8>}, {transform_indices = @transform_3, window_bounds = array<i64: 1, 16, 1, 16, 16>}]} {
    %c16_i32 = arith.constant 16 : i32
    %0 = arith.muli %arg2, %c16_i32 : i32
    %1 = tpu.assume_multiple %0, 8 : i32
    %2 = arith.index_cast %arg1 : i32 to index
    %3 = memref.load %arg3[%2] : memref<2xi32, #tpu.memory_space<smem>>
    %4 = arith.addi %1, %3 : i32
    %c0 = arith.constant 0 : index
    %c0_0 = arith.constant 0 : index
    %5 = vector.load %arg6[%c0, %c0_0] : memref<1x8xf32, #tpu.memory_space<vmem>>, vector<1x8xf32>
    %6 = vector.shape_cast %5 : vector<1x8xf32> to vector<1x8xf32>
    %7 = vector.broadcast %6 : vector<1x8xf32> to vector<256x8xf32>
    %c0_i32 = arith.constant 0 : i32
    %8 = arith.addi %4, %c0_i32 : i32
    %c0_1 = arith.constant 0 : index
    %9 = arith.index_cast %8 : i32 to index
    %c0_2 = arith.constant 0 : index
    %c0_3 = arith.constant 0 : index
    %10 = vector.load %arg4[%c0_1, %9, %c0_2, %c0_3] : memref<1x18x18x4xbf16, #tpu.memory_space<vmem>>, vector<1x16x16x4xbf16>
    %11 = vector.shape_cast %10 : vector<1x16x16x4xbf16> to vector<16x16x4xbf16>
    %12 = vector.shape_cast %11 : vector<16x16x4xbf16> to vector<256x4xbf16>
    %c0_i32_4 = arith.constant 0 : i32
    %13 = arith.addi %4, %c0_i32_4 : i32
    %c0_5 = arith.constant 0 : index
    %14 = arith.index_cast %13 : i32 to index
    %c1 = arith.constant 1 : index
    %c0_6 = arith.constant 0 : index
    %15 = vector.load %arg4[%c0_5, %14, %c1, %c0_6] : memref<1x18x18x4xbf16, #tpu.memory_space<vmem>>, vector<1x16x16x4xbf16>
    %16 = vector.shape_cast %15 : vector<1x16x16x4xbf16> to vector<16x16x4xbf16>
    %17 = vector.shape_cast %16 : vector<16x16x4xbf16> to vector<256x4xbf16>
    %c1_i32 = arith.constant 1 : i32
    %18 = arith.addi %4, %c1_i32 : i32
    %c0_7 = arith.constant 0 : index
    %19 = arith.index_cast %18 : i32 to index
    %c0_8 = arith.constant 0 : index
    %c0_9 = arith.constant 0 : index
    %20 = vector.load %arg4[%c0_7, %19, %c0_8, %c0_9] : memref<1x18x18x4xbf16, #tpu.memory_space<vmem>>, vector<1x16x16x4xbf16>
    %21 = vector.shape_cast %20 : vector<1x16x16x4xbf16> to vector<16x16x4xbf16>
    %22 = vector.shape_cast %21 : vector<16x16x4xbf16> to vector<256x4xbf16>
    %c1_i32_10 = arith.constant 1 : i32
    %23 = arith.addi %4, %c1_i32_10 : i32
    %c0_11 = arith.constant 0 : index
    %24 = arith.index_cast %23 : i32 to index
    %c1_12 = arith.constant 1 : index
    %c0_13 = arith.constant 0 : index
    %25 = vector.load %arg4[%c0_11, %24, %c1_12, %c0_13] : memref<1x18x18x4xbf16, #tpu.memory_space<vmem>>, vector<1x16x16x4xbf16>
    %26 = vector.shape_cast %25 : vector<1x16x16x4xbf16> to vector<16x16x4xbf16>
    %27 = vector.shape_cast %26 : vector<16x16x4xbf16> to vector<256x4xbf16>
    %28 = tpu.concatenate %12, %17, %22, %27 in 1 : vector<256x4xbf16>, vector<256x4xbf16>, vector<256x4xbf16>, vector<256x4xbf16> -> vector<256x16xbf16>
    %c0_14 = arith.constant 0 : index
    %c0_15 = arith.constant 0 : index
    %c0_16 = arith.constant 0 : index
    %c0_17 = arith.constant 0 : index
    %c0_18 = arith.constant 0 : index
    %29 = vector.load %arg5[%c0_14, %c0_15, %c0_16, %c0_17, %c0_18] : memref<1x1x2x16x8xbf16, #tpu.memory_space<vmem>>, vector<1x1x1x16x8xbf16>
    %30 = vector.shape_cast %29 : vector<1x1x1x16x8xbf16> to vector<16x8xbf16>
    %cst = arith.constant dense<0.000000e+00> : vector<256x8xf32>
    %31 = tpu.matmul %28, %30, %cst {dimension_numbers = #tpu.dot_dimension_numbers<[1], [0], [0], [1], [0, 0, 1, 1], [], []>} : vector<256x16xbf16>, vector<16x8xbf16>, vector<256x8xf32> -> vector<256x8xf32>
    %32 = arith.addf %31, %7 : vector<256x8xf32>
    %cst_19 = arith.constant 0.000000e+00 : f32
    %33 = vector.broadcast %cst_19 : f32 to vector<256x8xf32>
    %34 = arith.cmpf oge, %32, %33 : vector<256x8xf32>
    %cst_20 = arith.constant 2.000000e-01 : f32
    %35 = vector.broadcast %cst_20 : f32 to vector<256x8xf32>
    %36 = arith.mulf %35, %32 : vector<256x8xf32>
    %37 = arith.select %34, %32, %36 : vector<256x8xi1>, vector<256x8xf32>
    %38 = vector.shape_cast %37 : vector<256x8xf32> to vector<16x16x8xf32>
    %c0_21 = arith.constant 0 : index
    %c0_22 = arith.constant 0 : index
    %c0_23 = arith.constant 0 : index
    %c0_24 = arith.constant 0 : index
    %c0_25 = arith.constant 0 : index
    %39 = vector.load %arg7[%c0_21, %c0_22, %c0_23, %c0_24, %c0_25] : memref<1x16x1x16x16xf32, #tpu.memory_space<vmem>>, vector<1x16x1x16x8xf32>
    %40 = vector.shape_cast %39 : vector<1x16x1x16x8xf32> to vector<16x16x8xf32>
    %41 = vector.shape_cast %38 : vector<16x16x8xf32> to vector<1x16x1x16x8xf32>
    tpu.vector_store %arg7[%c0_21, %c0_22, %c0_23, %c0_24, %c0_25], %41 {strides = array<i32>} : memref<1x16x1x16x16xf32, #tpu.memory_space<vmem>>, vector<1x16x1x16x8xf32>,
    %c0_i32_26 = arith.constant 0 : i32
    %42 = arith.addi %4, %c0_i32_26 : i32
    %c0_27 = arith.constant 0 : index
    %43 = arith.index_cast %42 : i32 to index
    %c1_28 = arith.constant 1 : index
    %c0_29 = arith.constant 0 : index
    %44 = vector.load %arg4[%c0_27, %43, %c1_28, %c0_29] : memref<1x18x18x4xbf16, #tpu.memory_space<vmem>>, vector<1x16x16x4xbf16>
    %45 = vector.shape_cast %44 : vector<1x16x16x4xbf16> to vector<16x16x4xbf16>
    %46 = vector.shape_cast %45 : vector<16x16x4xbf16> to vector<256x4xbf16>
    %c0_i32_30 = arith.constant 0 : i32
    %47 = arith.addi %4, %c0_i32_30 : i32
    %c0_31 = arith.constant 0 : index
    %48 = arith.index_cast %47 : i32 to index
    %c2 = arith.constant 2 : index
    %c0_32 = arith.constant 0 : index
    %49 = vector.load %arg4[%c0_31, %48, %c2, %c0_32] : memref<1x18x18x4xbf16, #tpu.memory_space<vmem>>, vector<1x16x16x4xbf16>
    %50 = vector.shape_cast %49 : vector<1x16x16x4xbf16> to vector<16x16x4xbf16>
    %51 = vector.shape_cast %50 : vector<16x16x4xbf16> to vector<256x4xbf16>
    %c1_i32_33 = arith.constant 1 : i32
    %52 = arith.addi %4, %c1_i32_33 : i32
    %c0_34 = arith.constant 0 : index
    %53 = arith.index_cast %52 : i32 to index
    %c1_35 = arith.constant 1 : index
    %c0_36 = arith.constant 0 : index
    %54 = vector.load %arg4[%c0_34, %53, %c1_35, %c0_36] : memref<1x18x18x4xbf16, #tpu.memory_space<vmem>>, vector<1x16x16x4xbf16>
    %55 = vector.shape_cast %54 : vector<1x16x16x4xbf16> to vector<16x16x4xbf16>
    %56 = vector.shape_cast %55 : vector<16x16x4xbf16> to vector<256x4xbf16>
    %c1_i32_37 = arith.constant 1 : i32
    %57 = arith.addi %4, %c1_i32_37 : i32
    %c0_38 = arith.constant 0 : index
    %58 = arith.index_cast %57 : i32 to index
    %c2_39 = arith.constant 2 : index
    %c0_40 = arith.constant 0 : index
    %59 = vector.load %arg4[%c0_38, %58, %c2_39, %c0_40] : memref<1x18x18x4xbf16, #tpu.memory_space<vmem>>, vector<1x16x16x4xbf16>
    %60 = vector.shape_cast %59 : vector<1x16x16x4xbf16> to vector<16x16x4xbf16>
    %61 = vector.shape_cast %60 : vector<16x16x4xbf16> to vector<256x4xbf16>
    %62 = tpu.concatenate %46, %51, %56, %61 in 1 : vector<256x4xbf16>, vector<256x4xbf16>, vector<256x4xbf16>, vector<256x4xbf16> -> vector<256x16xbf16>
    %c0_41 = arith.constant 0 : index
    %c0_42 = arith.constant 0 : index
    %c1_43 = arith.constant 1 : index
    %c0_44 = arith.constant 0 : index
    %c0_45 = arith.constant 0 : index
    %63 = vector.load %arg5[%c0_41, %c0_42, %c1_43, %c0_44, %c0_45] : memref<1x1x2x16x8xbf16, #tpu.memory_space<vmem>>, vector<1x1x1x16x8xbf16>
    %64 = vector.shape_cast %63 : vector<1x1x1x16x8xbf16> to vector<16x8xbf16>
    %cst_46 = arith.constant dense<0.000000e+00> : vector<256x8xf32>
    %65 = tpu.matmul %62, %64, %cst_46 {dimension_numbers = #tpu.dot_dimension_numbers<[1], [0], [0], [1], [0, 0, 1, 1], [], []>} : vector<256x16xbf16>, vector<16x8xbf16>, vector<256x8xf32> -> vector<256x8xf32>
    %66 = arith.addf %65, %7 : vector<256x8xf32>
    %cst_47 = arith.constant 0.000000e+00 : f32
    %67 = vector.broadcast %cst_47 : f32 to vector<256x8xf32>
    %68 = arith.cmpf oge, %66, %67 : vector<256x8xf32>
    %cst_48 = arith.constant 2.000000e-01 : f32
    %69 = vector.broadcast %cst_48 : f32 to vector<256x8xf32>
    %70 = arith.mulf %69, %66 : vector<256x8xf32>
    %71 = arith.select %68, %66, %70 : vector<256x8xi1>, vector<256x8xf32>
    %72 = vector.shape_cast %71 : vector<256x8xf32> to vector<16x16x8xf32>
    %c0_49 = arith.constant 0 : index
    %c0_50 = arith.constant 0 : index
    %c0_51 = arith.constant 0 : index
    %c0_52 = arith.constant 0 : index
    %c8 = arith.constant 8 : index
    %73 = vector.load %arg7[%c0_49, %c0_50, %c0_51, %c0_52, %c8] : memref<1x16x1x16x16xf32, #tpu.memory_space<vmem>>, vector<1x16x1x16x8xf32>
    %74 = vector.shape_cast %73 : vector<1x16x1x16x8xf32> to vector<16x16x8xf32>
    %75 = vector.shape_cast %72 : vector<16x16x8xf32> to vector<1x16x1x16x8xf32>
    tpu.vector_store %arg7[%c0_49, %c0_50, %c0_51, %c0_52, %c8], %75 {strides = array<i32>} : memref<1x16x1x16x16xf32, #tpu.memory_space<vmem>>, vector<1x16x1x16x8xf32>,
    return
  }
  func.func @transform_0(%arg0: i32, %arg1: i32, %arg2: i32, %arg3: memref<2xi32, #tpu.memory_space<smem>>) -> (i32, i32, i32, i32) {
    %c0_i32 = arith.constant 0 : i32
    %c0_i32_0 = arith.constant 0 : i32
    %c0_i32_1 = arith.constant 0 : i32
    %c0_i32_2 = arith.constant 0 : i32
    return %arg0, %c0_i32, %c0_i32_0, %c0_i32_1 : i32, i32, i32, i32
  }
  func.func @transform_1(%arg0: i32, %arg1: i32, %arg2: i32, %arg3: memref<2xi32, #tpu.memory_space<smem>>) -> (i32, i32, i32, i32, i32) {
    %c0_i32 = arith.constant 0 : i32
    %c0_i32_0 = arith.constant 0 : i32
    %c0_i32_1 = arith.constant 0 : i32
    %c0_i32_2 = arith.constant 0 : i32
    %c0_i32_3 = arith.constant 0 : i32
    return %c0_i32, %arg1, %c0_i32_0, %c0_i32_1, %c0_i32_2 : i32, i32, i32, i32, i32
  }
  func.func @transform_2(%arg0: i32, %arg1: i32, %arg2: i32, %arg3: memref<2xi32, #tpu.memory_space<smem>>) -> (i32, i32) {
    %c0_i32 = arith.constant 0 : i32
    %c0_i32_0 = arith.constant 0 : i32
    %c0_i32_1 = arith.constant 0 : i32
    return %c0_i32, %c0_i32_0 : i32, i32
  }
  func.func @transform_3(%arg0: i32, %arg1: i32, %arg2: i32, %arg3: memref<2xi32, #tpu.memory_space<smem>>) -> (i32, i32, i32, i32, i32) {
    %c0_i32 = arith.constant 0 : i32
    %c0_i32_0 = arith.constant 0 : i32
    %c0_i32_1 = arith.constant 0 : i32
    return %arg0, %arg2, %arg1, %c0_i32, %c0_i32_0 : i32, i32, i32, i32, i32
  }
}

</mosaic_0001>

<bundles_post_ra>
// kernel: tpu_custom_call.1
= control target key start
LH: loop header
LB: loop body
LE: loop exit
PB: predicated region body
PF: predicated region fallthrough
CT: control target
= control target key end

     0   :  { %s6628_s0 = inlined_call_operand.vmem [shape: s32[2], index: 0, kind: input, shape index: {}]   ;;  %s6629_s1 = inlined_call_operand.vmem [shape: bf16[2,18,18,4], index: 1, kind: input, shape index: {}]   ;;  %s6630_s2 = inlined_call_operand.vmem [shape: bf16[1,2,2,16,8], index: 2, kind: input, shape index: {}]   ;;  %s6631_s3 = inlined_call_operand.vmem [shape: f32[1,8], index: 3, kind: input, shape index: {}]   ;;  %s6632_s4 = inlined_call_operand.hbm [shape: f32[2,16,2,16,16], index: 4, kind: output, shape index: {}]  }
   0x1   :  { %s9_s17 = sshll.u32 %s6628_s0, 4  ;;  %s10_s17 = int_to_ptr.vmem [resolvable:$true] %s9_s17 }
   0x2   :  { %s4712_s18 = scalar_lea.vmem %s10_s17, 16  ;;  %p4717_p1 = scmp.lt.s32.totalorder %s10_s17, %s10_s17 }
   0x3   :  { %p4713_p0 = scmp.ne.s32.totalorder %s10_s17, %s4712_s18  ;;  %p4718_p2 = scmp.lt.s32.totalorder %s4712_s18, %s4712_s18 }
   0x5   :  { %p4719_p3 = por %p4718_p2, %p4717_p1 }
   0x7   :  { %p4720_p4 = pnand %p4719_p3, %p4713_p0 }
   0x9   :  { %4723 = shalt.err (!%p4720_p4)  }
   0xa   :  { %s4794_s19 = smov [#allocation3]  }
   0xb   :  { %12 = dma.vmem_to_smem %s10_s17, 16, %s4794_s19, [#allocation2] }
   0xc   :  { %4756 = dma.done.wait [#allocation2], 16 }
   0xd   :  { %4757 = vsyncadd [#allocation2], 4294967280 }
   0xe   :  { %14 = sfence }
   0xf   :  { %15 = vsyncpa [#allocation5], 0 }
  0x10   :  { %17 = vsyncpa [#allocation5 + $0x1], 0  ;;  %s4833_s20 = smov 0   ;;  %s4835_s21 = smov 0  }
  0x11   :  { %s4837_s0 = smov 0   ;;  %s4839_s22 = smov 0  }
  0x12   :  { %s4841_s23 = smov 0   ;;  %s4843_s24 = smov 0  }
  0x13   :  { %s4845_s25 = smov 0   ;;  %s4847_s26 = smov 0  }
  0x14 LB: > { %s4124_s27 = sadd.s32 4294967295, %s4792_s26   ;;  %s4125_s28 = sadd.s32 4294967294, %s4792_s26   ;;  %s4792_s26 = sphi %s4847_s26, %s23_s26   ;;  %s4788_s25 = sphi %s4845_s25, %s6687_s25   ;;  %s4784_s24 = sphi %s4843_s24, %s6686_s24   ;;  %s4780_s23 = sphi %s4841_s23, %s6685_s23   ;;  %s4776_s22 = sphi %s4839_s22, %s6684_s22   ;;  %s4772_s0 = sphi %s4837_s0, %s6683_s0   ;;  %s4768_s21 = sphi %s4835_s21, %s6682_s21   ;;  %s4764_s20 = sphi %s4833_s20, %s6681_s20  }
  0x15   : > { %s38_s29 = sadd.s32 1, %s4784_s24  ;;  %s42_s30 = sadd.s32 1, %s4788_s25 }
  0x16   : > { %p40_p5 = scmp.ge.s32.totalorder %s38_s29, 2  ;;  %p136_p6 = scmp.ne.s32.totalorder %s4772_s0, %s4768_s21 }
  0x17   : > { %p137_p7 = scmp.eq.s32.totalorder %s4124_s27, 3  ;;  %p142_p10 = scmp.ne.s32.totalorder %s4768_s21, %s4764_s20 }
  0x18   : > { %s6689_s29 = smov (%p40_p5, %s38_s29), 0  ;;  %s6691_s30 = smov (!%p40_p5, %s42_s30), %s4788_s25 }
  0x19   : > { %s122_s5 = ssub.s32 %s4784_s24, %s6689_s29  ;;  %p4884_p8 = por %p137_p7, %p136_p6 }
  0x1a   : > { %p44_p9 = scmp.ge.s32.totalorder %s6691_s30, 2  ;;  %p143_p11 = scmp.eq.s32.totalorder %s4125_s28, 3 }
  0x1b   : > { %p4128_p12 = scmp.ge.s32.totalorder %s4792_s26, 1  ;;  %p180_p0 = scmp.lt.s32.totalorder %s4792_s26, 5 }
  0x1c   : > { %s6693_s30 = smov (%p44_p9, %s6691_s30), 0  ;;  %p4893_p13 = por %p143_p11, %p142_p10 }
  0x1d   : > { %s119_s8 = ssub.s32 %s4788_s25, %s6693_s30  ;;  %s126_s9 = sadd.s32 1, %s4772_s0 }
  0x1e   : > { %s123_s10 = sor.u32 %s122_s5, %s119_s8  ;;  %p181_p1 = pnand %p4128_p12, %p180_p0 }
  0x1f   : > { %p124_p2 = scmp.eq.s32.totalorder %s123_s10, 0 }
  0x20   : > { %184 = sbr.rel (%p181_p1) target bundleno = 729 (0x2d9), region = 32 }
  0x21   : > { %s4902_s11 = scalar_select %p124_p2, %s4772_s0, %s126_s9  }
  0x25   : > { %p209_p3 = scmp.lt.s32.totalorder %s4780_s23, 1  ;;  %s222_s12 = sld [smem:[#allocation3 + %s4776_s22]]  ;;  %vm2398_vm0 = vcmask 1042432   ;;  %vm2399_vm1 = vcmask 1046532   ;;  %vm282_vm3 = vsmask.f32 3328 }
  0x26   : > { %vm4912_vm2 = vmor %vm2398_vm0, %vm2399_vm1  ;;  %s4795_s27 = smov 12   ;;  %vm283_vm4 = vsmask.f32 7440  ;;  %s4796_s28 = smov 4   ;;  %vm1457_vm6 = vcmask 31744   ;;  %vm1506_vm7 = vcmask 64512  }
  0x27   : > { %s210_s13 = scalar_select %p209_p3, %s4780_s23, 1  ;;  %vm5017_vm5 = vmor %vm282_vm3, %vm283_vm4  ;;  %vm1539_vm8 = vcmask 97280   ;;  %vm1580_vm9 = vcmask 130048  }
  0x28   : > { %s4797_s5 = smov 8   ;;  %p214_p4 = scmp.lt.s32.totalorder %s4776_s22, 1 }
  0x29   : > { %s4553_s14 = smul.u32 216, %s210_s13  ;;  %s206_s16 = sand.u32 1, %s4768_s21  }
  0x2a   : > { %s215_s8 = scalar_select %p214_p4, %s4776_s22, 1 }
  0x2b   : > { %s213_s17 = scalar_lea.vmem %s6629_s1, %s4553_s14  ;;  %s4450_s18 = smul.u32 12, %s222_s12 }
  0x2c   : > { %s4449_s9 = sshll.u32 %s215_s8, 4 }
  0x2d   : > { %s4910_s19 = scalar_lea.vmem %s213_s17, %s4450_s18  ;;  %s5174_s13 = scalar_lea.vmem %s6630_s2, %s4449_s9 }
  0x2e   : > { %v4917_v1 = vld [vmem:[%s4910_s19 + $0x1c] sm:$0xf]  ;;  %v4920_v2 = vld [vmem:[%s4910_s19 + $0x20] sm:$0x1]  ;;  %v4329_v3 = vld [vmem:[%s4910_s19 + $0x18] sm:$0xe] }
  0x2f   : > { %v4345_v4 = vrot.slane %v4329_v3, 9  ;;  %v3018_v5 = vrot.slane %v4917_v1, 5  ;;  %v3021_v6 = vrot.slane %v4920_v2, 5  ;;  %v4926_v7 = vld [vmem:[%s4910_s19 + $0x4] sm:$0xf]  ;;  %v2605_v8 = vshll.u32 %v4920_v2, 16 }
  0x30   : > { %v1904_v9 = vld [vmem:[%s4910_s19 + $0x8] sm:$0x1]  ;;  %v2334_v10 = vld [vmem:[%s4910_s19] sm:$0xe]  ;;  %v2403_v11 = vrot.slane %v4926_v7, 5  ;;  %v2599_v17 = vshrl.u32 %v4917_v1, 16 }
  0x31   : > { %v3019_v12 = vsel %vm4912_vm2, %v4345_v4, %v3018_v5  ;;  %v3020_v13 = vrot.slane %v3018_v5, 4  ;;  %v1970_v14 = vshll.u32 %v1904_v9, 16  ;;  %v4264_v15 = vrot.slane %v2334_v10, 9  ;;  %v4935_v16 = vld [vmem:[%s4910_s19 + $0x28] sm:$0xf]  ;;  %s4129_s17 = sshll.u32 %s206_s16, 8 }
  0x32   : > { %v2405_v18 = vrot.slane %v2403_v11, 4  ;;  %v2406_v19 = vrot.slane %v1904_v9, 5  ;;  %v1964_v20 = vshrl.u32 %v4926_v7, 16  ;;  %v4940_v21 = vld [vmem:[%s4910_s19 + $0x2c] sm:$0x1]  ;;  %v2424_v36 = vrot.slane %v4935_v16, 5 }
  0x33   : > { %v3022_v22 = vsel %vm4912_vm2, %v3020_v13, %v3021_v6  ;;  %v4944_v23 = vrot.slane %v1970_v14, 5  ;;  %v2404_v24 = vsel %vm4912_vm2, %v4264_v15, %v2403_v11  ;;  %v2337_v26 = vld [vmem:[%s4910_s19 + $0x24] sm:$0xe]  ;;  %v4951_v27 = vld [vmem:[%s4910_s19 + $0x10] sm:$0xf]  ;;  %v2427_v37 = vrot.slane %v4940_v21, 5 }
  0x34   : > { %v4409_v28 = vcombine.low %v3019_v12, %v3022_v22  ;;  %v2407_v29 = vsel %vm4912_vm2, %v2405_v18, %v2406_v19  ;;  %v4267_v31 = vrot.slane %v2337_v26, 9  ;;  %v4957_v32 = vld [vmem:[%s4910_s19 + $0x14] sm:$0x1]  ;;  %v2335_v33 = vld [vmem:[%s4910_s19 + $0xc] sm:$0xe]  ;;  %v4960_v35 = vrot.slane %v1964_v20, 4 }
  0x35   : > { %v4376_v34 = vcombine.low %v2404_v24, %v2407_v29  ;;  %v4965_v38 = vld [vmem:[%s4910_s19 + $0x34] sm:$0xf]  ;;  %v4265_v41 = vrot.slane %v2335_v33, 9  ;;  %v2410_v42 = vrot.slane %v4951_v27, 5  ;;  %v4972_v43 = vld [vmem:[%s4910_s19 + $0x38] sm:$0x1] }
  0x36   : > { %3379 = vrot.lane.b32.xlu1 %v4409_v28, %s4795_s27  ;;  %v2425_v44 = vsel %vm4912_vm2, %v4267_v31, %v2424_v36  ;;  %v2426_v45 = vrot.slane %v2424_v36, 4  ;;  %v2413_v46 = vrot.slane %v4957_v32, 5  ;;  %v4331_v47 = vld [vmem:[%s4910_s19 + $0x30] sm:$0xe]  ;;  %v3032_v48 = vrot.slane %v4965_v38, 5  ;;  %s6407_s18 = scalar_lea.vmem [#allocation4], %s4129_s17 }
  0x37   : > { %3217 = vrot.lane.b32.xlu0 %v4376_v34, %s4796_s28  ;;  %v2411_v49 = vsel %vm4912_vm2, %v4265_v41, %v2410_v42  ;;  %v2412_v50 = vrot.slane %v2410_v42, 4  ;;  %v4347_v51 = vrot.slane %v4331_v47, 9  ;;  %v3035_v52 = vrot.slane %v4972_v43, 5  ;;  %v4281_v53 = vld [vmem:[%s4910_s19 + $0x10] sm:$0xf] }
  0x38   : > { %v2428_v54 = vsel %vm4912_vm2, %v2426_v45, %v2427_v37  ;;  %v3034_v55 = vrot.slane %v3032_v48, 4  ;;  %v4282_v56 = vld [vmem:[%s4910_s19 + $0x14] sm:$0x1]  ;;  %v4328_v57 = vld [vmem:[%s4910_s19 + $0xc] sm:$0xe]  ;;  %v3011_v58 = vrot.slane %v4281_v53, 5 }
  0x39   : > { %v4379_v59 = vcombine.low %v2425_v44, %v2428_v54  ;;  %v2414_v60 = vsel %vm4912_vm2, %v2412_v50, %v2413_v46  ;;  %v3033_v61 = vsel %vm4912_vm2, %v4347_v51, %v3032_v48  ;;  %v4344_v62 = vrot.slane %v4328_v57, 9  ;;  %v4280_v63 = vld [vmem:[%s4910_s19 + $0xc] sm:$0xf]  ;;  %v4999_v13 = vld [vmem:[%s4910_s19 + $0x1c] sm:$0xf] }
  0x3a   : > { %v4377_v3 = vcombine.low %v2411_v49, %v2414_v60  ;;  %v3036_v4 = vsel %vm4912_vm2, %v3034_v55, %v3035_v52  ;;  %v3013_v5 = vrot.slane %v3011_v58, 4  ;;  %v3014_v6 = vrot.slane %v4282_v56, 5  ;;  %v5002_v14 = vld [vmem:[%s4910_s19 + $0x20] sm:$0x1]  ;;  %v2336_v22 = vld [vmem:[%s4910_s19 + $0x18] sm:$0xe] }
  0x3b   : > { %3223 = vrot.lane.b32.xlu1 %v4379_v59, %s4796_s28  ;;  %v4411_v9 = vcombine.low %v3033_v61, %v3036_v4  ;;  %v3012_v10 = vsel %vm4912_vm2, %v4344_v62, %v3011_v58  ;;  %v2562_v11 = vshrl.u32 %v4280_v63, 16  ;;  %v2565_v12 = vshll.u32 %v4280_v63, 16  ;;  %v4283_v31 = vld [vmem:[%s4910_s19 + $0x18] sm:$0xf]  ;;  %v5023_v51 = vld [vmem:[%s4910_s19 + $0x28] sm:$0xf] }
  0x3c   : > { %3219 = vrot.lane.b32.xlu0 %v4377_v3, %s4796_s28  ;;  %v3015_v15 = vsel %vm4912_vm2, %v3013_v5, %v3014_v6  ;;  %v2571_v18 = vshll.u32 %v4281_v53, 16  ;;  %v2575_v19 = vshrl.u32 %v4281_v53, 16  ;;  %v2581_v20 = vshll.u32 %v4282_v56, 16  ;;  %v4330_v52 = vld [vmem:[%s4910_s19 + $0x24] sm:$0xe] }
  0x3d   : > { %v4408_v26 = vcombine.low %v3012_v10, %v3015_v15  ;;  %v2564_v28 = vrot.slane %v2562_v11, 4  ;;  %v2567_v29 = vrot.slane %v2565_v12, 5  ;;  %v4266_v42 = vrot.slane %v2336_v22, 9  ;;  %v4288_v57 = vld [vmem:[%s4910_s19 + $0x2c] sm:$0x1] }
  0x3e   : > { %v2573_v33 = vrot.slane %v2571_v18, 5  ;;  %v2577_v34 = vrot.slane %v2575_v19, 4  ;;  %v2583_v36 = vrot.slane %v2581_v20, 5  ;;  %v2417_v44 = vrot.slane %v4999_v13, 5  ;;  %v4289_v62 = vld [vmem:[%s4910_s19 + $0x30] sm:$0xf] }
  0x3f   : > { %3383 = vrot.lane.b32.xlu1 %v4411_v9, %s4795_s27  ;;  %v2568_v41 = vor.u32 %v2567_v29, %v2564_v28  ;;  %v2420_v45 = vrot.slane %v5002_v14, 5  ;;  %v2586_v48 = vshrl.u32 %v4283_v31, 16  ;;  %v2589_v49 = vshll.u32 %v4283_v31, 16  ;;  %v4286_v29 = vld [vmem:[%s4910_s19 + $0x24] sm:$0xf] }
  0x40   : > { %3377 = vrot.lane.b32.xlu0 %v4408_v26, %s4795_s27  ;;  %v2578_v47 = vor.u32 %v2577_v34, %v2573_v33  ;;  %v2595_v50 = vshll.u32 %v4917_v1, 16  ;;  %v2418_v54 = vsel %vm4912_vm2, %v4266_v42, %v2417_v44  ;;  %v2419_v55 = vrot.slane %v2417_v44, 4  ;;  %v4340_v24 = vld [vmem:[%s4910_s19 + $0x9c] sm:$0xe]  ;;  %v4135_v30 = vld [vmem:[%s4910_s19 + $0xc] sm:$0xf] }
  0x41   : > { %v2569_v53 = vrot.slane %v2568_v41, 4  ;;  %v2601_v56 = vrot.slane %v2599_v17, 4  ;;  %v2588_v59 = vrot.slane %v2586_v48, 4  ;;  %v2591_v60 = vrot.slane %v2589_v49, 5  ;;  %v4697_v46 = vld [vmem:[%s4910_s19 + $0x24] sm:$0xf] }
  0x42   : > { %v2579_v58 = vrot.slane %v2578_v47, 4  ;;  %v2597_v61 = vrot.slane %v2595_v50, 5  ;;  %v2421_v3 = vsel %vm4912_vm2, %v2419_v55, %v2420_v45  ;;  %v2607_v4 = vrot.slane %v2605_v8, 5  ;;  %v5059_v55 = vld [vmem:[%s4910_s19 + $0x40] sm:$0xf] }
  0x43   : > { %v2574_v63 = vsel %vm5017_vm5, %v2569_v53, %v2573_v33  ;;  %v4346_v5 = vrot.slane %v4330_v52, 9  ;;  %v4378_v17 = vcombine.low %v2418_v54, %v2421_v3  ;;  %v2592_v6 = vor.u32 %v2591_v60, %v2588_v59  ;;  %v2339_v60 = vld [vmem:[%s4910_s19 + $0x3c] sm:$0xe] }
  0x44   : > { %v2584_v1 = vsel %vm5017_vm5, %v2579_v58, %v2583_v36  ;;  %v2602_v9 = vor.u32 %v2601_v56, %v2597_v61  ;;  %v3025_v11 = vrot.slane %v5023_v51, 5  ;;  %v3028_v12 = vrot.slane %v4288_v57, 5 }
  0x45   : > { %v4392_v10 = vcombine.low %v2574_v63, %v2584_v1  ;;  %v2634_v15 = vshrl.u32 %v4289_v62, 16  ;;  %3221 = vrot.lane.b32.xlu0 %v4378_v17, %s4796_s28  ;;  %v2593_v18 = vrot.slane %v2592_v6, 4  ;;  %v2637_v20 = vshll.u32 %v4289_v62, 16  ;;  %v5071_v6 = vld [vmem:[%s4910_s19 + $0x34] sm:$0xf] }
  0x46   : > { %v2603_v19 = vrot.slane %v2602_v9, 4  ;;  %v2643_v2 = vshll.u32 %v4965_v38, 16  ;;  %v3026_v8 = vsel %vm4912_vm2, %v4346_v5, %v3025_v11  ;;  %v3027_v22 = vrot.slane %v3025_v11, 4 }
  0x47   : > { %3297 = vrot.lane.b32.xlu1 %v4392_v10, %s4797_s5  ;;  %v2636_v26 = vrot.slane %v2634_v15, 4  ;;  %v2647_v28 = vshrl.u32 %v4965_v38, 16  ;;  %v2598_v31 = vsel %vm5017_vm5, %v2593_v18, %v2597_v61  ;;  %v2639_v34 = vrot.slane %v2637_v20, 5  ;;  %v2338_v15 = vld [vmem:[%s4910_s19 + $0x30] sm:$0xe] }
  0x48   : > { %v2608_v33 = vsel %vm5017_vm5, %v2603_v19, %v2607_v4  ;;  %v2645_v36 = vrot.slane %v2643_v2, 5  ;;  %v3029_v42 = vsel %vm4912_vm2, %v3027_v22, %v3028_v12  ;;  %v2653_v45 = vshll.u32 %v4972_v43, 16  ;;  %v5065_v4 = vld [vmem:[%s4910_s19 + $0x44] sm:$0x1]  ;;  %v5077_v12 = vld [vmem:[%s4910_s19 + $0x38] sm:$0x1] }
  0x49   : > { %v4393_v41 = vcombine.low %v2598_v31, %v2608_v33  ;;  %v2649_v44 = vrot.slane %v2647_v28, 4  ;;  %v4410_v47 = vcombine.low %v3026_v8, %v3029_v42  ;;  %v2640_v38 = vor.u32 %v2639_v34, %v2636_v26  ;;  %v4295_v8 = vld [vmem:[%s4910_s19 + $0x48] sm:$0xf] }
  0x4a   : > { %v2610_v48 = vshrl.u32 %v4286_v29, 16  ;;  %v2613_v49 = vshll.u32 %v4286_v29, 16  ;;  %v2655_v52 = vrot.slane %v2653_v45, 5  ;;  %v2619_v53 = vshll.u32 %v5023_v51, 16  ;;  %v4297_v45 = vld [vmem:[%s4910_s19 + $0x50] sm:$0x1] }
  0x4b   : > { %3299 = vrot.lane.b32.xlu1 %v4393_v41, %s4797_s5  ;;  %v2650_v50 = vor.u32 %v2649_v44, %v2645_v36  ;;  %v2623_v54 = vshrl.u32 %v5023_v51, 16  ;;  %3381 = vrot.lane.b32.xlu0 %v4410_v47, %s4795_s27  ;;  %v2641_v43 = vrot.slane %v2640_v38, 4  ;;  %v2629_v59 = vshll.u32 %v4288_v57, 16  ;;  %v4296_v41 = vld [vmem:[%s4910_s19 + $0x4c] sm:$0xf] }
  0x4c   : > { %v2612_v56 = vrot.slane %v2610_v48, 4  ;;  %v2615_v58 = vrot.slane %v2613_v49, 5  ;;  %v2621_v63 = vrot.slane %v2619_v53, 5  ;;  %v4269_v10 = vrot.slane %v2339_v60, 9  ;;  %v4292_v48 = vld [vmem:[%s4910_s19 + $0x3c] sm:$0xf] }
  0x4d   : > { %v2651_v62 = vrot.slane %v2650_v50, 4  ;;  %v2625_v3 = vrot.slane %v2623_v54, 4  ;;  %v2646_v51 = vsel %vm5017_vm5, %v2641_v43, %v2645_v36  ;;  %v2631_v1 = vrot.slane %v2629_v59, 5  ;;  %v4293_v59 = vld [vmem:[%s4910_s19 + $0x40] sm:$0xf] }
  0x4e   : > { %v2616_v5 = vor.u32 %v2615_v58, %v2612_v56  ;;  %v2438_v11 = vrot.slane %v5059_v55, 5  ;;  %v2441_v2 = vrot.slane %v5065_v4, 5  ;;  %v4268_v33 = vrot.slane %v2338_v15, 9 }
  0x4f   : > { %v2656_v57 = vsel %vm5017_vm5, %v2651_v62, %v2655_v52  ;;  %v2626_v9 = vor.u32 %v2625_v3, %v2621_v63  ;;  %v2431_v34 = vrot.slane %v5071_v6, 5  ;;  %v2434_v36 = vrot.slane %v5077_v12, 5 }
  0x50   : > { %v4395_v18 = vcombine.low %v2646_v51, %v2656_v57  ;;  %v2617_v19 = vrot.slane %v2616_v5, 4  ;;  %v2439_v26 = vsel %vm4912_vm2, %v4269_v10, %v2438_v11  ;;  %v2440_v28 = vrot.slane %v2438_v11, 4  ;;  %v4333_v10 = vld [vmem:[%s4910_s19 + $0x48] sm:$0xe] }
  0x51   : > { %v2627_v22 = vrot.slane %v2626_v9, 4  ;;  %v2682_v47 = vshrl.u32 %v4295_v8, 16  ;;  %v2685_v38 = vshll.u32 %v4295_v8, 16  ;;  %v2432_v52 = vsel %vm4912_vm2, %v4268_v33, %v2431_v34 }
  0x52   : > { %3303 = vrot.lane.b32.xlu1 %v4395_v18, %s4797_s5  ;;  %v2622_v31 = vsel %vm5017_vm5, %v2617_v19, %v2621_v63  ;;  %v2442_v44 = vsel %vm4912_vm2, %v2440_v28, %v2441_v2  ;;  %v2433_v53 = vrot.slane %v2431_v34, 4  ;;  %v2691_v56 = vshll.u32 %v4296_v41, 16  ;;  %v4294_v63 = vld [vmem:[%s4910_s19 + $0x44] sm:$0x1] }
  0x53   : > { %v2632_v42 = vsel %vm5017_vm5, %v2627_v22, %v2631_v1  ;;  %v4381_v50 = vcombine.low %v2439_v26, %v2442_v44  ;;  %v2684_v54 = vrot.slane %v2682_v47, 4  ;;  %v2687_v43 = vrot.slane %v2685_v38, 5 }
  0x54   : > { %v4394_v49 = vcombine.low %v2622_v31, %v2632_v42  ;;  %v2695_v58 = vshrl.u32 %v4296_v41, 16  ;;  %v2435_v60 = vsel %vm4912_vm2, %v2433_v53, %v2434_v36  ;;  %v2701_v62 = vshll.u32 %v4297_v45, 16  ;;  %v4332_v36 = vld [vmem:[%s4910_s19 + $0x3c] sm:$0xe] }
  0x55   : > { %v2658_v3 = vshrl.u32 %v4292_v48, 16  ;;  %v2661_v51 = vshll.u32 %v4292_v48, 16  ;;  %v4380_v5 = vcombine.low %v2432_v52, %v2435_v60  ;;  %v2688_v1 = vor.u32 %v2687_v43, %v2684_v54 }
  0x56   : > { %3301 = vrot.lane.b32.xlu0 %v4394_v49, %s4797_s5  ;;  %3227 = vrot.lane.b32.xlu1 %v4381_v50, %s4796_s28  ;;  %v2693_v57 = vrot.slane %v2691_v56, 5  ;;  %v2697_v9 = vrot.slane %v2695_v58, 4  ;;  %v2703_v11 = vrot.slane %v2701_v62, 5  ;;  %v2667_v19 = vshll.u32 %v4293_v59, 16  ;;  %v5116_v56 = vld [vmem:[%s4910_s19 + $0x58] sm:$0xf] }
  0x57   : > { %v2660_v15 = vrot.slane %v2658_v3, 4  ;;  %v2663_v18 = vrot.slane %v2661_v51, 5  ;;  %v2689_v2 = vrot.slane %v2688_v1, 4  ;;  %v2671_v22 = vshrl.u32 %v4293_v59, 16  ;;  %v2341_v58 = vld [vmem:[%s4910_s19 + $0x54] sm:$0xe] }
  0x58   : > { %v2698_v8 = vor.u32 %v2697_v9, %v2693_v57  ;;  %v2677_v26 = vshll.u32 %v4294_v63, 16  ;;  %v2669_v31 = vrot.slane %v2667_v19, 5  ;;  %v4349_v33 = vrot.slane %v4333_v10, 9  ;;  %v5129_v9 = vld [vmem:[%s4910_s19 + $0x4c] sm:$0xf] }
  0x59   : > { %v2664_v28 = vor.u32 %v2663_v18, %v2660_v15  ;;  %v3046_v34 = vrot.slane %v4296_v41, 5  ;;  %v2694_v42 = vsel %vm5017_vm5, %v2689_v2, %v2693_v57  ;;  %v2673_v47 = vrot.slane %v2671_v22, 4  ;;  %v5132_v10 = vld [vmem:[%s4910_s19 + $0x50] sm:$0x1]  ;;  %v2340_v19 = vld [vmem:[%s4910_s19 + $0x48] sm:$0xe] }
  0x5a   : > { %3225 = vrot.lane.b32.xlu0 %v4380_v5, %s4796_s28  ;;  %v2699_v44 = vrot.slane %v2698_v8, 4  ;;  %v2679_v38 = vrot.slane %v2677_v26, 5  ;;  %v3049_v52 = vrot.slane %v4297_v45, 5  ;;  %v4348_v54 = vrot.slane %v4332_v36, 9  ;;  %v5123_v45 = vld [vmem:[%s4910_s19 + $0x5c] sm:$0x1] }
  0x5b   : > { %v2665_v48 = vrot.slane %v2664_v28, 4  ;;  %v3047_v49 = vsel %vm4912_vm2, %v4349_v33, %v3046_v34  ;;  %v3048_v50 = vrot.slane %v3046_v34, 4  ;;  %v2674_v41 = vor.u32 %v2673_v47, %v2669_v31  ;;  %v4301_v28 = vld [vmem:[%s4910_s19 + $0x60] sm:$0xf]  ;;  %v4336_v22 = vld [vmem:[%s4910_s19 + $0x6c] sm:$0xe] }
  0x5c   : > { %v2704_v53 = vsel %vm5017_vm5, %v2699_v44, %v2703_v11  ;;  %v3039_v43 = vrot.slane %v4293_v59, 5  ;;  %v3042_v51 = vrot.slane %v4294_v63, 5  ;;  %v4271_v15 = vrot.slane %v2341_v58, 9 }
  0x5d   : > { %v4397_v62 = vcombine.low %v2694_v42, %v2704_v53  ;;  %v3050_v3 = vsel %vm4912_vm2, %v3048_v50, %v3049_v52  ;;  %v2670_v5 = vsel %vm5017_vm5, %v2665_v48, %v2669_v31  ;;  %v2675_v1 = vrot.slane %v2674_v41, 4  ;;  %v5148_v31 = vld [vmem:[%s4910_s19 + $0x64] sm:$0xf] }
  0x5e   : > { %v4413_v59 = vcombine.low %v3047_v49, %v3050_v3  ;;  %v3041_v57 = vrot.slane %v3039_v43, 4  ;;  %v3040_v63 = vsel %vm4912_vm2, %v4348_v54, %v3039_v43  ;;  %v2452_v18 = vrot.slane %v5116_v56, 5  ;;  %v5159_v49 = vld [vmem:[%s4910_s19 + $0x68] sm:$0x1]  ;;  %v4298_v54 = vld [vmem:[%s4910_s19 + $0x54] sm:$0xf] }
  0x5f   : > { %3307 = vrot.lane.b32.xlu1 %v4397_v62, %s4797_s5  ;;  %v2680_v2 = vsel %vm5017_vm5, %v2675_v1, %v2679_v38  ;;  %v2455_v26 = vrot.slane %v5123_v45, 5  ;;  %v4270_v47 = vrot.slane %v2340_v19, 9  ;;  %v2445_v38 = vrot.slane %v5129_v9, 5 }
  0x60   : > { %v3043_v8 = vsel %vm4912_vm2, %v3041_v57, %v3042_v51  ;;  %v4396_v33 = vcombine.low %v2670_v5, %v2680_v2  ;;  %v2453_v34 = vsel %vm4912_vm2, %v4271_v15, %v2452_v18  ;;  %v2454_v36 = vrot.slane %v2452_v18, 4  ;;  %v4299_v51 = vld [vmem:[%s4910_s19 + $0x58] sm:$0xf] }
  0x61   : > { %v4412_v44 = vcombine.low %v3040_v63, %v3043_v8  ;;  %v2448_v48 = vrot.slane %v5132_v10, 5  ;;  %v2730_v52 = vshrl.u32 %v4301_v28, 16  ;;  %v2733_v53 = vshll.u32 %v4301_v28, 16  ;;  %v5178_v63 = vld [vmem:[%s4910_s19 + $0x5c] sm:$0x1] }
  0x62   : > { %3305 = vrot.lane.b32.xlu0 %v4396_v33, %s4797_s5  ;;  %v2456_v50 = vsel %vm4912_vm2, %v2454_v36, %v2455_v26  ;;  %v2739_v41 = vshll.u32 %v5148_v31, 16  ;;  %v2446_v58 = vsel %vm4912_vm2, %v4270_v47, %v2445_v38  ;;  %v2447_v62 = vrot.slane %v2445_v38, 4  ;;  %v4335_v8 = vld [vmem:[%s4910_s19 + $0x60] sm:$0xe]  ;;  %v4644_v26 = vld [vmem:[%s5174_s13 + $0x8] sm:$0xff]  }
  0x63   : > { %3387 = vrot.lane.b32.xlu1 %v4413_v59, %s4795_s27  ;;  %v4383_v43 = vcombine.low %v2453_v34, %v2456_v50  ;;  %v2743_v3 = vshrl.u32 %v5148_v31, 16  ;;  %v2732_v5 = vrot.slane %v2730_v52, 4  ;;  %v2735_v1 = vrot.slane %v2733_v53, 5  ;;  %v4334_v53 = vld [vmem:[%s4910_s19 + $0x54] sm:$0xe]  ;;  %4519 = vmatprep.subr.bf16.mxu1 %v4644_v26 }
  0x64   : > { %v2741_v59 = vrot.slane %v2739_v41, 5  ;;  %v2749_v57 = vshll.u32 %v5159_v49, 16  ;;  %v2449_v15 = vsel %vm4912_vm2, %v2447_v62, %v2448_v48  ;;  %v2706_v19 = vshrl.u32 %v4298_v54, 16  ;;  %4520 = vmatpush3.bf16.msra.mxu1 %v4644_v26  ;;  %v5198_v26 = vld [vmem:[%s4910_s19 + $0x70] sm:$0xf] }
  0x65   : > { %v2745_v18 = vrot.slane %v2743_v3, 4  ;;  %v2709_v2 = vshll.u32 %v4298_v54, 16  ;;  %v4382_v28 = vcombine.low %v2446_v58, %v2449_v15  ;;  %v2736_v33 = vor.u32 %v2735_v1, %v2732_v5 }
  0x66   : > { %3385 = vrot.lane.b32.xlu0 %v4412_v44, %s4795_s27  ;;  %v2751_v34 = vrot.slane %v2749_v57, 5  ;;  %v2715_v36 = vshll.u32 %v4299_v51, 16  ;;  %v2708_v38 = vrot.slane %v2706_v19, 4  ;;  %v2719_v52 = vshrl.u32 %v4299_v51, 16 }
  0x67   : > { %3231 = vrot.lane.b32.xlu1 %v4383_v43, %s4796_s28  ;;  %v2746_v47 = vor.u32 %v2745_v18, %v2741_v59  ;;  %v2711_v50 = vrot.slane %v2709_v2, 5  ;;  %v2737_v48 = vrot.slane %v2736_v33, 4  ;;  %v2725_v54 = vshll.u32 %v5178_v63, 16 }
  0x68   : > { %v2717_v41 = vrot.slane %v2715_v36, 5  ;;  %v4351_v62 = vrot.slane %v4335_v8, 9  ;;  %v2721_v58 = vrot.slane %v2719_v52, 4  ;;  %v3060_v3 = vrot.slane %v5148_v31, 5  ;;  %v2343_v31 = vld [vmem:[%s4910_s19 + $0x6c] sm:$0xe] }
  0x69   : > { %v2747_v44 = vrot.slane %v2746_v47, 4  ;;  %v2712_v43 = vor.u32 %v2711_v50, %v2708_v38  ;;  %v2742_v5 = vsel %vm5017_vm5, %v2737_v48, %v2741_v59  ;;  %v2727_v1 = vrot.slane %v2725_v54, 5  ;;  %v5215_v48 = vld [vmem:[%s4910_s19 + $0x64] sm:$0xf]  ;;  %v2342_v54 = vld [vmem:[%s4910_s19 + $0x60] sm:$0xe] }
  0x6a   : > { %3229 = vrot.lane.b32.xlu0 %v4382_v28, %s4796_s28  ;;  %v3063_v57 = vrot.slane %v5159_v49, 5  ;;  %v4350_v15 = vrot.slane %v4334_v53, 9  ;;  %v2722_v2 = vor.u32 %v2721_v58, %v2717_v41  ;;  %v3061_v8 = vsel %vm4912_vm2, %v4351_v62, %v3060_v3  ;;  %v5203_v49 = vld [vmem:[%s4910_s19 + $0x74] sm:$0x1]  ;;  %v5223_v58 = vld [vmem:[%s4910_s19 + $0x68] sm:$0x1] }
  0x6b   : > { %v2752_v18 = vsel %vm5017_vm5, %v2747_v44, %v2751_v34  ;;  %v2713_v19 = vrot.slane %v2712_v43, 4  ;;  %v3062_v33 = vrot.slane %v3060_v3, 4  ;;  %v3053_v59 = vrot.slane %v4299_v51, 5  ;;  %v4307_v3 = vld [vmem:[%s4910_s19 + $0x78] sm:$0xf] }
  0x6c   : > { %v4399_v28 = vcombine.low %v2742_v5, %v2752_v18  ;;  %v3056_v36 = vrot.slane %v5178_v63, 5  ;;  %v2723_v38 = vrot.slane %v2722_v2, 4  ;;  %v4273_v53 = vrot.slane %v2343_v31, 9  ;;  %v5232_v2 = vld [vmem:[%s4910_s19 + $0x80] sm:$0x1] }
  0x6d   : > { %v2718_v47 = vsel %vm5017_vm5, %v2713_v19, %v2717_v41  ;;  %v3064_v52 = vsel %vm4912_vm2, %v3062_v33, %v3063_v57  ;;  %v3054_v51 = vsel %vm4912_vm2, %v4350_v15, %v3053_v59  ;;  %v3055_v63 = vrot.slane %v3053_v59, 4  ;;  %v4308_v19 = vld [vmem:[%s4910_s19 + $0x7c] sm:$0xf]  ;;  %v4306_v50 = vld [vmem:[%s4910_s19 + $0x74] sm:$0x1] }
  0x6e   : > { %3311 = vrot.lane.b32.xlu1 %v4399_v28, %s4797_s5  ;;  %v2728_v41 = vsel %vm5017_vm5, %v2723_v38, %v2727_v1  ;;  %v4415_v62 = vcombine.low %v3061_v8, %v3064_v52  ;;  %v2466_v44 = vrot.slane %v5198_v26, 5  ;;  %v2469_v43 = vrot.slane %v5203_v49, 5  ;;  %v4304_v38 = vld [vmem:[%s4910_s19 + $0x6c] sm:$0xf]  ;;  %v4337_v34 = vld [vmem:[%s4910_s19 + $0x78] sm:$0xe] }
  0x6f   : > { %v4398_v5 = vcombine.low %v2718_v47, %v2728_v41  ;;  %v3057_v57 = vsel %vm4912_vm2, %v3055_v63, %v3056_v36  ;;  %v4272_v28 = vrot.slane %v2342_v54, 9  ;;  %v2459_v33 = vrot.slane %v5215_v48, 5  ;;  %v4305_v54 = vld [vmem:[%s4910_s19 + $0x70] sm:$0xf] }
  0x70   : > { %v4414_v1 = vcombine.low %v3054_v51, %v3057_v57  ;;  %v2467_v8 = vsel %vm4912_vm2, %v4273_v53, %v2466_v44  ;;  %v2468_v31 = vrot.slane %v2466_v44, 4  ;;  %v2462_v59 = vrot.slane %v5223_v58, 5 }
  0x71   : > { %3309 = vrot.lane.b32.xlu0 %v4398_v5, %s4797_s5  ;;  %v2778_v36 = vshrl.u32 %v4307_v3, 16  ;;  %v2781_v47 = vshll.u32 %v4307_v3, 16  ;;  %v2787_v51 = vshll.u32 %v4308_v19, 16  ;;  %v2791_v63 = vshrl.u32 %v4308_v19, 16 }
  0x72   : > { %3391 = vrot.lane.b32.xlu1 %v4415_v62, %s4795_s27  ;;  %v2470_v52 = vsel %vm4912_vm2, %v2468_v31, %v2469_v43  ;;  %v2797_v53 = vshll.u32 %v5232_v2, 16  ;;  %v2460_v62 = vsel %vm4912_vm2, %v4272_v28, %v2459_v33  ;;  %v2461_v44 = vrot.slane %v2459_v33, 4 }
  0x73   : > { %v4385_v41 = vcombine.low %v2467_v8, %v2470_v52  ;;  %v2780_v5 = vrot.slane %v2778_v36, 4  ;;  %v2783_v57 = vrot.slane %v2781_v47, 5  ;;  %v2789_v18 = vrot.slane %v2787_v51, 5 }
  0x74   : > { %v2793_v15 = vrot.slane %v2791_v63, 4  ;;  %v2799_v3 = vrot.slane %v2797_v53, 5  ;;  %v2463_v43 = vsel %vm4912_vm2, %v2461_v44, %v2462_v59  ;;  %v2754_v31 = vshrl.u32 %v4304_v38, 16 }
  0x75   : > { %3389 = vrot.lane.b32.xlu0 %v4414_v1, %s4795_s27  ;;  %v2757_v8 = vshll.u32 %v4304_v38, 16  ;;  %v2763_v52 = vshll.u32 %v4305_v54, 16  ;;  %v4384_v28 = vcombine.low %v2460_v62, %v2463_v43  ;;  %v2784_v33 = vor.u32 %v2783_v57, %v2780_v5 }
  0x76   : > { %3235 = vrot.lane.b32.xlu1 %v4385_v41, %s4796_s28  ;;  %v2794_v36 = vor.u32 %v2793_v15, %v2789_v18  ;;  %v2767_v47 = vshrl.u32 %v4305_v54, 16  ;;  %v2756_v51 = vrot.slane %v2754_v31, 4  ;;  %v2773_v42 = vshll.u32 %v4306_v50, 16  ;;  %v2345_v31 = vld [vmem:[%s4910_s19 + $0x84] sm:$0xe] }
  0x77   : > { %v2759_v63 = vrot.slane %v2757_v8, 5  ;;  %v2765_v53 = vrot.slane %v2763_v52, 5  ;;  %v2785_v1 = vrot.slane %v2784_v33, 4  ;;  %v4353_v60 = vrot.slane %v4337_v34, 9  ;;  %v5264_v52 = vld [vmem:[%s4910_s19 + $0x88] sm:$0xf] }
  0x78   : > { %v2795_v11 = vrot.slane %v2794_v36, 4  ;;  %v2769_v41 = vrot.slane %v2767_v47, 4  ;;  %v2775_v38 = vrot.slane %v2773_v42, 5  ;;  %v3074_v44 = vrot.slane %v4308_v19, 5  ;;  %v5277_v47 = vld [vmem:[%s4910_s19 + $0x7c] sm:$0xf] }
  0x79   : > { %3233 = vrot.lane.b32.xlu0 %v4384_v28, %s4796_s28  ;;  %v2760_v59 = vor.u32 %v2759_v63, %v2756_v51  ;;  %v3077_v15 = vrot.slane %v5232_v2, 5  ;;  %v2790_v62 = vsel %vm5017_vm5, %v2785_v1, %v2789_v18  ;;  %v4352_v43 = vrot.slane %v4336_v22, 9  ;;  %v2344_v51 = vld [vmem:[%s4910_s19 + $0x78] sm:$0xe] }
  0x7a   : > { %v2800_v5 = vsel %vm5017_vm5, %v2795_v11, %v2799_v3  ;;  %v2770_v57 = vor.u32 %v2769_v41, %v2765_v53  ;;  %v3075_v42 = vsel %vm4912_vm2, %v4353_v60, %v3074_v44  ;;  %v3076_v19 = vrot.slane %v3074_v44, 4  ;;  %v5268_v3 = vld [vmem:[%s4910_s19 + $0x8c] sm:$0x1]  ;;  %v4313_v41 = vld [vmem:[%s4910_s19 + $0x90] sm:$0xf] }
  0x7b   : > { %v4401_v8 = vcombine.low %v2790_v62, %v2800_v5  ;;  %v2761_v34 = vrot.slane %v2760_v59, 4  ;;  %v3067_v28 = vrot.slane %v4305_v54, 5  ;;  %v3070_v11 = vrot.slane %v4306_v50, 5  ;;  %v4314_v5 = vld [vmem:[%s4910_s19 + $0x94] sm:$0xf] }
  0x7c   : > { %v2771_v18 = vrot.slane %v2770_v57, 4  ;;  %v3078_v60 = vsel %vm4912_vm2, %v3076_v19, %v3077_v15  ;;  %v4275_v36 = vrot.slane %v2345_v31, 9  ;;  %v2480_v15 = vrot.slane %v5264_v52, 5  ;;  %v4312_v44 = vld [vmem:[%s4910_s19 + $0x8c] sm:$0x1] }
  0x7d   : > { %3315 = vrot.lane.b32.xlu1 %v4401_v8, %s4797_s5  ;;  %v2766_v22 = vsel %vm5017_vm5, %v2761_v34, %v2765_v53  ;;  %v4417_v54 = vcombine.low %v3075_v42, %v3078_v60  ;;  %v3068_v63 = vsel %vm4912_vm2, %v4352_v43, %v3067_v28  ;;  %v3069_v1 = vrot.slane %v3067_v28, 4  ;;  %v5285_v53 = vld [vmem:[%s4910_s19 + $0x80] sm:$0x1]  ;;  %v5297_v8 = vld [vmem:[%s4910_s19 + $0x98] sm:$0x1] }
  0x7e   : > { %v2776_v50 = vsel %vm5017_vm5, %v2771_v18, %v2775_v38  ;;  %v2483_v62 = vrot.slane %v5268_v3, 5  ;;  %v4274_v31 = vrot.slane %v2344_v51, 9  ;;  %v2473_v43 = vrot.slane %v5277_v47, 5  ;;  %v4310_v51 = vld [vmem:[%s4910_s19 + $0x84] sm:$0xf] }
  0x7f   : > { %v4400_v59 = vcombine.low %v2766_v22, %v2776_v50  ;;  %v3071_v38 = vsel %vm4912_vm2, %v3069_v1, %v3070_v11  ;;  %v2481_v42 = vsel %vm4912_vm2, %v4275_v36, %v2480_v15  ;;  %v2482_v19 = vrot.slane %v2480_v15, 4  ;;  %v4311_v36 = vld [vmem:[%s4910_s19 + $0x88] sm:$0xf] }
  0x80   : > { %v4416_v34 = vcombine.low %v3068_v63, %v3071_v38  ;;  %v2476_v18 = vrot.slane %v5285_v53, 5  ;;  %v2474_v28 = vsel %vm4912_vm2, %v4274_v31, %v2473_v43  ;;  %v2475_v11 = vrot.slane %v2473_v43, 4  ;;  %v4339_v31 = vld [vmem:[%s4910_s19 + $0x90] sm:$0xe] }
  0x81   : > { %3313 = vrot.lane.b32.xlu0 %v4400_v59, %s4797_s5  ;;  %3395 = vrot.lane.b32.xlu1 %v4417_v54, %s4795_s27  ;;  %v2826_v22 = vshrl.u32 %v4313_v41, 16  ;;  %v2829_v60 = vshll.u32 %v4313_v41, 16  ;;  %v2484_v50 = vsel %vm4912_vm2, %v2482_v19, %v2483_v62  ;;  %v2835_v54 = vshll.u32 %v4314_v5, 16 }
  0x82   : > { %v2839_v63 = vshrl.u32 %v4314_v5, 16  ;;  %v2845_v1 = vshll.u32 %v5297_v8, 16  ;;  %v4387_v59 = vcombine.low %v2481_v42, %v2484_v50  ;;  %v2477_v15 = vsel %vm4912_vm2, %v2475_v11, %v2476_v18 }
  0x83   : > { %v2828_v38 = vrot.slane %v2826_v22, 4  ;;  %v2831_v57 = vrot.slane %v2829_v60, 5  ;;  %v4386_v41 = vcombine.low %v2474_v28, %v2477_v15  ;;  %v2837_v43 = vrot.slane %v2835_v54, 5  ;;  %v4338_v22 = vld [vmem:[%s4910_s19 + $0x84] sm:$0xe] }
  0x84   : > { %v2841_v33 = vrot.slane %v2839_v63, 4  ;;  %v2847_v62 = vrot.slane %v2845_v1, 5  ;;  %v2802_v2 = vshrl.u32 %v4310_v51, 16  ;;  %v2805_v29 = vshll.u32 %v4310_v51, 16 }
  0x85   : > { %3393 = vrot.lane.b32.xlu0 %v4416_v34, %s4795_s27  ;;  %3239 = vrot.lane.b32.xlu1 %v4387_v59, %s4796_s28  ;;  %v2832_v19 = vor.u32 %v2831_v57, %v2828_v38  ;;  %v2811_v42 = vshll.u32 %v4311_v36, 16  ;;  %v2815_v20 = vshrl.u32 %v4311_v36, 16  ;;  %v2821_v18 = vshll.u32 %v4312_v44, 16 }
  0x86   : > { %v2842_v50 = vor.u32 %v2841_v33, %v2837_v43  ;;  %v4355_v11 = vrot.slane %v4339_v31, 9  ;;  %v2804_v17 = vrot.slane %v2802_v2, 4  ;;  %v2807_v61 = vrot.slane %v2805_v29, 5  ;;  %v5330_v31 = vld [vmem:[%s4910_s19 + $0xa4] sm:$0x1] }
  0x87   : > { %v2833_v60 = vrot.slane %v2832_v19, 4  ;;  %v2813_v34 = vrot.slane %v2811_v42, 5  ;;  %v2817_v54 = vrot.slane %v2815_v20, 4  ;;  %v2823_v63 = vrot.slane %v2821_v18, 5  ;;  %v5327_v20 = vld [vmem:[%s4910_s19 + $0xa0] sm:$0xf] }
  0x88   : > { %v2843_v28 = vrot.slane %v2842_v50, 4  ;;  %v3088_v57 = vrot.slane %v4314_v5, 5  ;;  %v2808_v51 = vor.u32 %v2807_v61, %v2804_v17  ;;  %v3091_v1 = vrot.slane %v5297_v8, 5  ;;  %v5338_v50 = vld [vmem:[%s4910_s19 + $0x94] sm:$0xf] }
  0x89   : > { %3237 = vrot.lane.b32.xlu0 %v4386_v41, %s4796_s28  ;;  %v2838_v33 = vsel %vm5017_vm5, %v2833_v60, %v2837_v43  ;;  %v4354_v59 = vrot.slane %v4338_v22, 9  ;;  %v2818_v2 = vor.u32 %v2817_v54, %v2813_v34  ;;  %v3081_v17 = vrot.slane %v4311_v36, 5  ;;  %v2347_v41 = vld [vmem:[%s4910_s19 + $0x9c] sm:$0xe]  ;;  %v5346_v22 = vld [vmem:[%s4910_s19 + $0x98] sm:$0x1] }
  0x8a   : > { %v2848_v29 = vsel %vm5017_vm5, %v2843_v28, %v2847_v62  ;;  %v3089_v15 = vsel %vm4912_vm2, %v4355_v11, %v3088_v57  ;;  %v3090_v38 = vrot.slane %v3088_v57, 4  ;;  %v2809_v61 = vrot.slane %v2808_v51, 4  ;;  %6643 = vst [vmem:[#allocation10_spill] sm:$0xff] %v5346_v22  ;;  %v2346_v60 = vld [vmem:[%s4910_s19 + $0x90] sm:$0xe] }
  0x8b   : > { %v4403_v5 = vcombine.low %v2838_v33, %v2848_v29  ;;  %v3084_v8 = vrot.slane %v4312_v44, 5  ;;  %v2819_v62 = vrot.slane %v2818_v2, 4  ;;  %v3082_v36 = vsel %vm4912_vm2, %v4354_v59, %v3081_v17  ;;  %v4319_v51 = vld [vmem:[%s4910_s19 + $0xa8] sm:$0xf]  ;;  %v4320_v2 = vld [vmem:[%s4910_s19 + $0xac] sm:$0xf] }
  0x8c   : > { %v3092_v19 = vsel %vm4912_vm2, %v3090_v38, %v3091_v1  ;;  %v2814_v18 = vsel %vm5017_vm5, %v2809_v61, %v2813_v34  ;;  %v3083_v11 = vrot.slane %v3081_v17, 4  ;;  %v4277_v54 = vrot.slane %v2347_v41, 9  ;;  %v4318_v42 = vld [vmem:[%s4910_s19 + $0xa4] sm:$0x1]  ;;  %v4341_v43 = vld [vmem:[%s4910_s19 + $0xa8] sm:$0xe] }
  0x8d   : > { %3319 = vrot.lane.b32.xlu1 %v4403_v5, %s4797_s5  ;;  %v4419_v44 = vcombine.low %v3089_v15, %v3092_v19  ;;  %v2824_v28 = vsel %vm5017_vm5, %v2819_v62, %v2823_v63  ;;  %v2494_v57 = vrot.slane %v5327_v20, 5  ;;  %v2497_v33 = vrot.slane %v5330_v31, 5  ;;  %v5360_v15 = vld [vmem:[%s4910_s19 + $0xb0] sm:$0x1]  ;;  %v4316_v19 = vld [vmem:[%s4910_s19 + $0x9c] sm:$0xf] }
  0x8e   : > { %v4402_v1 = vcombine.low %v2814_v18, %v2824_v28  ;;  %v3085_v34 = vsel %vm4912_vm2, %v3083_v11, %v3084_v8  ;;  %v4276_v61 = vrot.slane %v2346_v60, 9  ;;  %v2487_v17 = vrot.slane %v5338_v50, 5  ;;  %v4317_v60 = vld [vmem:[%s4910_s19 + $0xa0] sm:$0xf] }
  0x8f   : > { %v4418_v63 = vcombine.low %v3082_v36, %v3085_v34  ;;  %v2495_v38 = vsel %vm4912_vm2, %v4277_v54, %v2494_v57  ;;  %v2496_v5 = vrot.slane %v2494_v57, 4  ;;  %v2490_v8 = vrot.slane %v5346_v22, 5 }
  0x90   : > { %3317 = vrot.lane.b32.xlu0 %v4402_v1, %s4797_s5  ;;  %v2874_v41 = vshrl.u32 %v4319_v51, 16  ;;  %v2877_v62 = vshll.u32 %v4319_v51, 16  ;;  %v2883_v36 = vshll.u32 %v4320_v2, 16  ;;  %v2887_v11 = vshrl.u32 %v4320_v2, 16 }
  0x91   : > { %3399 = vrot.lane.b32.xlu1 %v4419_v44, %s4795_s27  ;;  %v2498_v18 = vsel %vm4912_vm2, %v2496_v5, %v2497_v33  ;;  %v2893_v28 = vshll.u32 %v5360_v15, 16  ;;  %v2488_v44 = vsel %vm4912_vm2, %v4276_v61, %v2487_v17  ;;  %v2489_v57 = vrot.slane %v2487_v17, 4 }
  0x92   : > { %v4389_v54 = vcombine.low %v2495_v38, %v2498_v18  ;;  %v2876_v1 = vrot.slane %v2874_v41, 4  ;;  %v2879_v34 = vrot.slane %v2877_v62, 5  ;;  %v2885_v29 = vrot.slane %v2883_v36, 5 }
  0x93   : > { %v2889_v59 = vrot.slane %v2887_v11, 4  ;;  %v2895_v51 = vrot.slane %v2893_v28, 5  ;;  %v2491_v33 = vsel %vm4912_vm2, %v2489_v57, %v2490_v8  ;;  %v2850_v5 = vshrl.u32 %v4316_v19, 16 }
  0x94   : > { %3397 = vrot.lane.b32.xlu0 %v4418_v63, %s4795_s27  ;;  %v2853_v38 = vshll.u32 %v4316_v19, 16  ;;  %v2859_v18 = vshll.u32 %v4317_v60, 16  ;;  %v4388_v61 = vcombine.low %v2488_v44, %v2491_v33  ;;  %v2880_v17 = vor.u32 %v2879_v34, %v2876_v1 }
  0x95   : > { %3243 = vrot.lane.b32.xlu1 %v4389_v54, %s4796_s28  ;;  %v2890_v41 = vor.u32 %v2889_v59, %v2885_v29  ;;  %v2863_v62 = vshrl.u32 %v4317_v60, 16  ;;  %v2852_v36 = vrot.slane %v2850_v5, 4  ;;  %v2869_v37 = vshll.u32 %v4318_v42, 16  ;;  %v2348_v5 = vld [vmem:[%s4910_s19 + $0xa8] sm:$0xe] }
  0x96   : > { %v2855_v11 = vrot.slane %v2853_v38, 5  ;;  %v2861_v28 = vrot.slane %v2859_v18, 5  ;;  %v2881_v63 = vrot.slane %v2880_v17, 4  ;;  %v4357_v39 = vrot.slane %v4341_v43, 9 }
  0x97   : > { %v2891_v40 = vrot.slane %v2890_v41, 4  ;;  %v2865_v54 = vrot.slane %v2863_v62, 4  ;;  %v2871_v19 = vrot.slane %v2869_v37, 5  ;;  %v3102_v44 = vrot.slane %v4320_v2, 5  ;;  %v5392_v2 = vld [vmem:[%s4910_s19 + $0xac] sm:$0xf] }
  0x98   : > { %3241 = vrot.lane.b32.xlu0 %v4388_v61, %s4796_s28  ;;  %v2856_v8 = vor.u32 %v2855_v11, %v2852_v36  ;;  %v3105_v59 = vrot.slane %v5360_v15, 5  ;;  %v2886_v57 = vsel %vm5017_vm5, %v2881_v63, %v2885_v29  ;;  %v4356_v33 = vrot.slane %v4340_v24, 9  ;;  %6644 = vst [vmem:[#allocation11_spill] sm:$0xff] %v5392_v2  ;;  %v5395_v15 = vld [vmem:[%s4910_s19 + $0xb0] sm:$0x1] }
  0x99   : > { %v2896_v1 = vsel %vm5017_vm5, %v2891_v40, %v2895_v51  ;;  %v2866_v34 = vor.u32 %v2865_v54, %v2861_v28  ;;  %v3103_v18 = vsel %vm4912_vm2, %v4357_v39, %v3102_v44  ;;  %v3104_v37 = vrot.slane %v3102_v44, 4  ;;  %6645 = vst [vmem:[#allocation12_spill] sm:$0xff] %v5395_v15  ;;  %v234_v51 = vld [vmem:[%s4910_s19] sm:$0xf]  ;;  %v235_v36 = vld [vmem:[%s4910_s19 + $0x4] sm:$0xf] }
  0x9a   : > { %v4405_v38 = vcombine.low %v2886_v57, %v2896_v1  ;;  %v2857_v43 = vrot.slane %v2856_v8, 4  ;;  %v3095_v17 = vrot.slane %v4317_v60, 5  ;;  %v3098_v40 = vrot.slane %v4318_v42, 5  ;;  %v266_v44 = vld [vmem:[%s4910_s19 + $0x8] sm:$0x1] }
  0x9b   : > { %v2867_v29 = vrot.slane %v2866_v34, 4  ;;  %v3106_v39 = vsel %vm4912_vm2, %v3104_v37, %v3105_v59  ;;  %v4278_v62 = vrot.slane %v2348_v5, 9  ;;  %v2504_v8 = vrot.slane %v5395_v15, 5  ;;  %v2349_v5 = vld [vmem:[%s4910_s19 + $0xb4] sm:$0xe] }
  0x9c   : > { %3323 = vrot.lane.b32.xlu1 %v4405_v38, %s4797_s5  ;;  %v2862_v24 = vsel %vm5017_vm5, %v2857_v43, %v2861_v28  ;;  %v4421_v60 = vcombine.low %v3103_v18, %v3106_v39  ;;  %v3096_v42 = vsel %vm4912_vm2, %v4356_v33, %v3095_v17  ;;  %v3097_v63 = vrot.slane %v3095_v17, 4  ;;  %v5421_v37 = vld [vmem:[%s4910_s19 + $0xb8] sm:$0xf]  ;;  %v4322_v39 = vld [vmem:[%s4910_s19 + $0xb4] sm:$0xf] }
  0x9d   : > { %v2872_v11 = vsel %vm5017_vm5, %v2867_v29, %v2871_v19  ;;  %v2501_v28 = vrot.slane %v5392_v2, 5  ;;  %v286_v59 = vshrl.u32 %v234_v51, 16  ;;  %v289_v1 = vshll.u32 %v234_v51, 16  ;;  %6646 = vst [vmem:[#allocation13_spill] sm:$0xff] %v5421_v37  ;;  %v5424_v29 = vld [vmem:[%s4910_s19 + $0xbc] sm:$0x1] }
  0x9e   : > { %v4404_v54 = vcombine.low %v2862_v24, %v2872_v11  ;;  %v3099_v57 = vsel %vm4912_vm2, %v3097_v63, %v3098_v40  ;;  %v295_v19 = vshll.u32 %v235_v36, 16  ;;  %v299_v34 = vshrl.u32 %v235_v36, 16 }
  0x9f   : > { %v4420_v33 = vcombine.low %v3096_v42, %v3099_v57  ;;  %v2502_v38 = vsel %vm4912_vm2, %v4278_v62, %v2501_v28  ;;  %v2503_v43 = vrot.slane %v2501_v28, 4  ;;  %v288_v18 = vrot.slane %v286_v59, 4  ;;  %v5432_v42 = vld [vmem:[%s4910_s19 + $0xb8] sm:$0xf]  ;;  %v5435_v57 = vld [vmem:[%s4910_s19 + $0xbc] sm:$0x1] }
  0xa0   : > { %3321 = vrot.lane.b32.xlu0 %v4404_v54, %s4797_s5  ;;  %3403 = vrot.lane.b32.xlu1 %v4421_v60, %s4795_s27  ;;  %v291_v17 = vrot.slane %v289_v1, 5  ;;  %v297_v40 = vrot.slane %v295_v19, 5  ;;  %v301_v51 = vrot.slane %v299_v34, 4  ;;  %v305_v24 = vshll.u32 %v266_v44, 16  ;;  %v236_v34 = vld [vmem:[%s4910_s19 + $0xc] sm:$0xf] }
  0xa1   : > { %v2505_v11 = vsel %vm4912_vm2, %v2503_v43, %v2504_v8  ;;  %v4279_v60 = vrot.slane %v2349_v5, 9  ;;  %v2508_v44 = vrot.slane %v5421_v37, 5  ;;  %v2511_v1 = vrot.slane %v5424_v29, 5 }
  0xa2   : > { %v4390_v63 = vcombine.low %v2502_v38, %v2505_v11  ;;  %v292_v54 = vor.u32 %v291_v17, %v288_v18  ;;  %v302_v28 = vor.u32 %v301_v51, %v297_v40  ;;  %v307_v59 = vrot.slane %v305_v24, 5 }
  0xa3   : > { %v2898_v19 = vshrl.u32 %v4322_v39, 16  ;;  %v2901_v8 = vshll.u32 %v4322_v39, 16  ;;  %v2907_v62 = vshll.u32 %v5432_v42, 16  ;;  %v2911_v38 = vshrl.u32 %v5432_v42, 16 }
  0xa4   : > { %3401 = vrot.lane.b32.xlu0 %v4420_v33, %s4795_s27  ;;  %v293_v43 = vrot.slane %v292_v54, 4  ;;  %v303_v5 = vrot.slane %v302_v28, 4  ;;  %v2509_v18 = vsel %vm4912_vm2, %v4279_v60, %v2508_v44  ;;  %v2510_v17 = vrot.slane %v2508_v44, 4  ;;  %v237_v28 = vld [vmem:[%s4910_s19 + $0x10] sm:$0xf] }
  0xa5   : > { %v2900_v33 = vrot.slane %v2898_v19, 4  ;;  %v2903_v51 = vrot.slane %v2901_v8, 5  ;;  %v2909_v11 = vrot.slane %v2907_v62, 5  ;;  %v2913_v54 = vrot.slane %v2911_v38, 4  ;;  %v267_v19 = vld [vmem:[%s4910_s19 + $0x14] sm:$0x1] }
  0xa6   : > { %v298_v24 = vsel %vm5017_vm5, %v293_v43, %v297_v40  ;;  %v308_v39 = vsel %vm5017_vm5, %v303_v5, %v307_v59  ;;  %v2512_v41 = vsel %vm4912_vm2, %v2510_v17, %v2511_v1  ;;  %v2917_v44 = vshll.u32 %v5435_v57, 16 }
  0xa7   : > { %v4199_v36 = vcombine.low %v298_v24, %v308_v39  ;;  %v2904_v60 = vor.u32 %v2903_v51, %v2900_v33  ;;  %v4391_v8 = vcombine.low %v2509_v18, %v2512_v41  ;;  %v2914_v61 = vor.u32 %v2913_v54, %v2909_v11  ;;  %v4136_v33 = vld [vmem:[%s4910_s19 + $0x10] sm:$0xf] }
  0xa8   : > { %3245 = vrot.lane.b32.xlu0 %v4390_v63, %s4796_s28  ;;  %v310_v40 = vshrl.u32 %v236_v34, 16  ;;  %v313_v43 = vshll.u32 %v236_v34, 16  ;;  %v2919_v59 = vrot.slane %v2917_v44, 5  ;;  %v319_v5 = vshll.u32 %v237_v28, 16 }
  0xa9   : > { %1233 = vrot.lane.b32.xlu1 %v4199_v36, %s4796_s28  ;;  %v2905_v62 = vrot.slane %v2904_v60, 4  ;;  %v323_v63 = vshrl.u32 %v237_v28, 16  ;;  %v2915_v38 = vrot.slane %v2914_v61, 4  ;;  %v329_v17 = vshll.u32 %v267_v19, 16  ;;  %v4325_v28 = vld [vmem:[%s4910_s19 + $0xc0] sm:$0xf] }
  0xaa   : > { %v312_v24 = vrot.slane %v310_v40, 4  ;;  %v315_v1 = vrot.slane %v313_v43, 5  ;;  %v321_v34 = vrot.slane %v319_v5, 5  ;;  %v722_v36 = vshrl.u32 %v4135_v30, 16  ;;  %v5467_v40 = vld [vmem:[%s4910_s19 + $0xc4] sm:$0xf] }
  0xab   : > { %v2910_v41 = vsel %vm5017_vm5, %v2905_v62, %v2909_v11  ;;  %v325_v18 = vrot.slane %v323_v63, 4  ;;  %v2920_v51 = vsel %vm5017_vm5, %v2915_v38, %v2919_v59  ;;  %v331_v54 = vrot.slane %v329_v17, 5  ;;  %v5470_v63 = vld [vmem:[%s4910_s19 + $0xc8] sm:$0x1]  ;;  %v4342_v17 = vld [vmem:[%s4910_s19 + $0xb4] sm:$0xe] }
  0xac   : > { %3247 = vrot.lane.b32.xlu0 %v4391_v8, %s4796_s28  ;;  %v316_v39 = vor.u32 %v315_v1, %v312_v24  ;;  %v725_v61 = vshll.u32 %v4135_v30, 16  ;;  %v4406_v60 = vcombine.low %v2910_v41, %v2920_v51  ;;  %v5464_v19 = vrot.slane %v722_v36, 4 }
  0xad   : > { %v326_v44 = vor.u32 %v325_v18, %v321_v34  ;;  %v731_v8 = vshll.u32 %v4136_v33, 16  ;;  %v735_v62 = vshrl.u32 %v4136_v33, 16  ;;  %v4215_v5 = vcombine.low %v4135_v30, %v4136_v33  ;;  %v5481_v30 = vld [vmem:[%s4910_s19 + $0x18] sm:$0xf] }
  0xae   : > { %v317_v11 = vrot.slane %v316_v39, 4  ;;  %v727_v43 = vrot.slane %v725_v61, 5  ;;  %3325 = vrot.lane.b32.xlu1 %v4406_v60, %s4797_s5  ;;  %v2922_v24 = vshrl.u32 %v4325_v28, 16  ;;  %v2925_v1 = vshll.u32 %v4325_v28, 16 }
  0xaf   : > { %v327_v59 = vrot.slane %v326_v44, 4  ;;  %v5473_v38 = vrot.slane %v731_v8, 5  ;;  %v737_v18 = vrot.slane %v735_v62, 4  ;;  %v2931_v36 = vshll.u32 %v5467_v40, 16  ;;  %v5487_v44 = vld [vmem:[%s4910_s19 + $0x1c] sm:$0xf] }
  0xb0   : > { %v322_v41 = vsel %vm5017_vm5, %v317_v11, %v321_v34  ;;  %v2935_v51 = vshrl.u32 %v5467_v40, 16  ;;  %v2924_v39 = vrot.slane %v2922_v24, 4  ;;  %v2927_v61 = vrot.slane %v2925_v1, 5 }
  0xb1   : > { %v332_v33 = vsel %vm5017_vm5, %v327_v59, %v331_v54  ;;  %v2941_v60 = vshll.u32 %v5470_v63, 16  ;;  %v2933_v8 = vrot.slane %v2931_v36, 5  ;;  %v4358_v34 = vrot.slane %v4342_v17, 9 }
  0xb2   : > { %v4200_v28 = vcombine.low %v322_v41, %v332_v33  ;;  %v2937_v25 = vrot.slane %v2935_v51, 4  ;;  %1345 = vrot.lane.b32.xlu1 %v4215_v5, %s4797_s5  ;;  %v2928_v11 = vor.u32 %v2927_v61, %v2924_v39  ;;  %v3109_v37 = vrot.slane %v5432_v42, 5  ;;  %v4167_v42 = vld [vmem:[%s4910_s19 + $0x14] sm:$0x1] }
  0xb3   : > { %v2943_v62 = vrot.slane %v2941_v60, 5  ;;  %v3112_v54 = vrot.slane %v5435_v57, 5  ;;  %v746_v24 = vshrl.u32 %v5481_v30, 16  ;;  %v749_v1 = vshll.u32 %v5481_v30, 16  ;;  %v5501_v60 = vpop.permute.xlu1 %3379 }
  0xb4   : > { %1235 = vrot.lane.b32.xlu0 %v4200_v28, %s4796_s28  ;;  %v2938_v59 = vor.u32 %v2937_v25, %v2933_v8  ;;  %v755_v41 = vshll.u32 %v5487_v44, 16  ;;  %v2929_v36 = vrot.slane %v2928_v11, 4  ;;  %v3110_v5 = vsel %vm4912_vm2, %v4358_v34, %v3109_v37  ;;  %v4343_v25 = vld [vmem:[%s4910_s19 + $0xc0] sm:$0xe] }
  0xb5   : > { %v3111_v17 = vrot.slane %v3109_v37, 4  ;;  %v759_v51 = vshrl.u32 %v5487_v44, 16  ;;  %v748_v39 = vrot.slane %v746_v24, 4  ;;  %v751_v57 = vrot.slane %v749_v1, 5 }
  0xb6   : > { %v2939_v33 = vrot.slane %v2938_v59, 4  ;;  %v757_v61 = vrot.slane %v755_v41, 5  ;;  %v2934_v28 = vsel %vm5017_vm5, %v2929_v36, %v2933_v8  ;;  %v4216_v37 = vcombine.low %v5481_v30, %v5487_v44  ;;  %v4168_v36 = vld [vmem:[%s4910_s19 + $0x20] sm:$0x1] }
  0xb7   : > { %v3113_v11 = vsel %vm4912_vm2, %v3111_v17, %v3112_v54  ;;  %v761_v15 = vrot.slane %v759_v51, 4  ;;  %v728_v24 = vor.u32 %v727_v43, %v5464_v19  ;;  %v738_v1 = vor.u32 %v737_v18, %v5473_v38  ;;  %v1902_v51 = vld [vmem:[%s4910_s19] sm:$0xf] }
  0xb8   : > { %v2944_v34 = vsel %vm5017_vm5, %v2939_v33, %v2943_v62  ;;  %v4422_v59 = vcombine.low %v3110_v5, %v3113_v11  ;;  %v741_v2 = vshll.u32 %v4167_v42, 16  ;;  %v4359_v22 = vrot.slane %v4343_v25, 9  ;;  %v1911_v25 = vld [vmem:[%s4910_s19 + $0x24] sm:$0xf] }
  0xb9   : > { %v4407_v41 = vcombine.low %v2934_v28, %v2944_v34  ;;  %v3116_v8 = vrot.slane %v5467_v40, 5  ;;  %v729_v54 = vrot.slane %v728_v24, 4  ;;  %v739_v17 = vrot.slane %v738_v1, 4 }
  0xba   : > { %3405 = vrot.lane.b32.xlu1 %v4422_v59, %s4795_s27  ;;  %v3119_v30 = vrot.slane %v5470_v63, 5  ;;  %v752_v44 = vor.u32 %v751_v57, %v748_v39  ;;  %v743_v19 = vrot.slane %v741_v2, 5  ;;  %v762_v62 = vor.u32 %v761_v15, %v757_v61  ;;  %v5525_v63 = vpop.permute.xlu0 %3217  ;;  %v5527_v39 = vpop.permute.xlu1 %3223 }
  0xbb   : > { %3327 = vrot.lane.b32.xlu0 %v4407_v41, %s4797_s5  ;;  %v3117_v43 = vsel %vm4912_vm2, %v4359_v22, %v3116_v8  ;;  %v3118_v18 = vrot.slane %v3116_v8, 4  ;;  %v2330_v40 = vshll.u32 %v5424_v29, 16  ;;  %v734_v5 = vsel %vm5017_vm5, %v729_v54, %v5473_v38 }
  0xbc   : > { %v753_v42 = vrot.slane %v752_v44, 4  ;;  %v765_v33 = vshll.u32 %v4168_v36, 16  ;;  %v744_v2 = vsel %vm5017_vm5, %v739_v17, %v743_v19  ;;  %v763_v15 = vrot.slane %v762_v62, 4  ;;  %v1905_v36 = vld [vmem:[%s4910_s19 + $0xc] sm:$0xf] }
  0xbd   : > { %v3120_v22 = vsel %vm4912_vm2, %v3118_v18, %v3119_v30  ;;  %v1951_v57 = vshrl.u32 %v1902_v51, 16  ;;  %v4231_v28 = vcombine.low %v734_v5, %v744_v2  ;;  %v1954_v24 = vshll.u32 %v1902_v51, 16  ;;  %v4676_v30 = vld [vmem:[%s4910_s19 + $0x28] sm:$0xf] }
  0xbe   : > { %v4423_v11 = vcombine.low %v3117_v43, %v3120_v22  ;;  %v758_v38 = vsel %vm5017_vm5, %v753_v42, %v757_v61  ;;  %v767_v34 = vrot.slane %v765_v33, 5  ;;  %v6647_v1 = vshll.u32 %v4926_v7, 16  ;;  %v3220_v42 = vpop.permute.xlu0 %3219  ;;  %v5549_v33 = vpop.permute.xlu1 %3383 }
  0xbf   : > { %1347 = vrot.lane.b32.xlu0 %v4216_v37, %s4797_s5  ;;  %v1953_v59 = vrot.slane %v1951_v57, 4  ;;  %v6648_v0 = vshll.u32 %v4940_v21, 16  ;;  %1425 = vrot.lane.b32.xlu1 %v4231_v28, %s4795_s27  ;;  %v2023_v17 = vshrl.u32 %v1911_v25, 16  ;;  %v2026_v61 = vshll.u32 %v1911_v25, 16  ;;  %v4677_v57 = vld [vmem:[%s4910_s19 + $0x10] sm:$0xf] }
  0xc0   : > { %v1962_v41 = vrot.slane %v6647_v1, 5  ;;  %v768_v54 = vsel %vm5017_vm5, %v763_v15, %v767_v34  ;;  %v2032_v37 = vshll.u32 %v4676_v30, 16  ;;  %v1956_v19 = vrot.slane %v1954_v24, 5  ;;  %v1908_v24 = vld [vmem:[%s4910_s19 + $0x18] sm:$0xf] }
  0xc1   : > { %v2044_v8 = vrot.slane %v6648_v0, 5  ;;  %v4232_v44 = vcombine.low %v758_v38, %v768_v54  ;;  %v6649_v7 = vshrl.u32 %v4935_v16, 16  ;;  %v2025_v21 = vrot.slane %v2023_v17, 4 }
  0xc2   : > { %v1967_v51 = vor.u32 %v4960_v35, %v1962_v41  ;;  %v2028_v18 = vrot.slane %v2026_v61, 5  ;;  %v2034_v62 = vrot.slane %v2032_v37, 5  ;;  %v1975_v5 = vshrl.u32 %v1905_v36, 16 }
  0xc3   : > { %v2038_v43 = vrot.slane %v6649_v7, 4  ;;  %3407 = vrot.lane.b32.xlu0 %v4423_v11, %s4795_s27  ;;  %v1957_v2 = vor.u32 %v1956_v19, %v1953_v59  ;;  %v1978_v15 = vshll.u32 %v1905_v36, 16  ;;  %v1984_v25 = vshll.u32 %v4677_v57, 16  ;;  %1427 = vrot.lane.b32.xlu1 %v4232_v44, %s4795_s27  ;;  %v5568_v7 = vpop.permute.xlu0 %3377  ;;  %v4678_v57 = vld [vmem:[%s4910_s19 + $0x1c] sm:$0xf] }
  0xc4   : > { %v1968_v22 = vrot.slane %v1967_v51, 4  ;;  %v2029_v35 = vor.u32 %v2028_v18, %v2025_v21  ;;  %v1977_v28 = vrot.slane %v1975_v5, 4  ;;  %v6650_v38 = vshrl.u32 %v4951_v27, 16 }
  0xc5   : > { %v2039_v16 = vor.u32 %v2038_v43, %v2034_v62  ;;  %v1958_v1 = vrot.slane %v1957_v2, 4  ;;  %v1980_v11 = vrot.slane %v1978_v15, 5  ;;  %v1986_v59 = vrot.slane %v1984_v25, 5  ;;  %v238_v2 = vld [vmem:[%s4910_s19 + $0x18] sm:$0xf] }
  0xc6   : > { %v1990_v34 = vrot.slane %v6650_v38, 4  ;;  %v1973_v0 = vsel %vm5017_vm5, %v1968_v22, %v4944_v23  ;;  %v2030_v54 = vrot.slane %v2029_v35, 4  ;;  %v6651_v17 = vshll.u32 %v4957_v32, 16  ;;  %v3298_v32 = vpop.permute.xlu1 %3297  ;;  %v239_v35 = vld [vmem:[%s4910_s19 + $0x1c] sm:$0xf] }
  0xc7   : > { %v2040_v36 = vrot.slane %v2039_v16, 4  ;;  %v1963_v30 = vsel %vm5017_vm5, %v1958_v1, %v1962_v41  ;;  %v1981_v27 = vor.u32 %v1980_v11, %v1977_v28  ;;  %v1999_v44 = vshrl.u32 %v1908_v24, 16 }
  0xc8   : > { %v1996_v61 = vrot.slane %v6651_v17, 5  ;;  %v1991_v37 = vor.u32 %v1990_v34, %v1986_v59  ;;  %v4360_v19 = vcombine.low %v1963_v30, %v1973_v0  ;;  %v2035_v23 = vsel %vm5017_vm5, %v2030_v54, %v2034_v62  ;;  %v268_v34 = vld [vmem:[%s4910_s19 + $0x20] sm:$0x1]  ;;  %v240_v30 = vld [vmem:[%s4910_s19 + $0x24] sm:$0xf] }
  0xc9   : > { %v2045_v51 = vsel %vm5017_vm5, %v2040_v36, %v2044_v8  ;;  %v2002_v43 = vshll.u32 %v1908_v24, 16  ;;  %v1982_v18 = vrot.slane %v1981_v27, 4  ;;  %v2001_v5 = vrot.slane %v1999_v44, 4 }
  0xca   : > { %v4363_v21 = vcombine.low %v2035_v23, %v2045_v51  ;;  %v1992_v41 = vrot.slane %v1991_v37, 4  ;;  %v3411_v22 = vsel %vm1457_vm6, %v4360_v19, %v5525_v63  ;;  %v2008_v25 = vshll.u32 %v4678_v57, 16  ;;  %v3222_v37 = vpop.permute.xlu0 %3221  ;;  %v241_v19 = vld [vmem:[%s4910_s19 + $0x28] sm:$0xf] }
  0xcb   : > { %v2004_v15 = vrot.slane %v2002_v43, 5  ;;  %v6652_v62 = vshrl.u32 %v4999_v13, 16  ;;  %v1987_v28 = vsel %vm5017_vm5, %v1982_v18, %v1986_v59  ;;  %v3458_v63 = vsel %vm1506_vm7, %v3411_v22, %v3298_v32 }
  0xcc   : > { %v5579_v16 = vsel %vm1457_vm6, %v4363_v21, %v5527_v39  ;;  %v1997_v38 = vsel %vm5017_vm5, %v1992_v41, %v1996_v61  ;;  %v2010_v13 = vrot.slane %v2008_v25, 5  ;;  %v6653_v0 = vshll.u32 %v5002_v14, 16  ;;  %v269_v21 = vld [vmem:[%s4910_s19 + $0x2c] sm:$0x1] }
  0xcd   : > { %v2014_v8 = vrot.slane %v6652_v62, 4  ;;  %v4361_v24 = vcombine.low %v1987_v28, %v1997_v38  ;;  %v2005_v1 = vor.u32 %v2004_v15, %v2001_v5  ;;  %v334_v54 = vshrl.u32 %v238_v2, 16 }
  0xce   : > { %v2020_v11 = vrot.slane %v6653_v0, 5  ;;  %v337_v39 = vshll.u32 %v238_v2, 16  ;;  %v343_v36 = vshll.u32 %v239_v35, 16  ;;  %v347_v17 = vshrl.u32 %v239_v35, 16 }
  0xcf   : > { %v3414_v59 = vsel %vm1457_vm6, %v4361_v24, %v3220_v42  ;;  %v2006_v27 = vrot.slane %v2005_v1, 4  ;;  %v2015_v61 = vor.u32 %v2014_v8, %v2010_v13  ;;  %v353_v44 = vshll.u32 %v268_v34, 16  ;;  %v3300_v24 = vpop.permute.xlu1 %3299 }
  0xd0   : > { %v336_v23 = vrot.slane %v334_v54, 4  ;;  %v339_v51 = vrot.slane %v337_v39, 5  ;;  %v345_v32 = vrot.slane %v343_v36, 5  ;;  %v349_v43 = vrot.slane %v347_v17, 4  ;;  %v3382_v54 = vpop.permute.xlu0 %3381  ;;  %v4139_v39 = vld [vmem:[%s4910_s19 + $0x24] sm:$0xf] }
  0xd1   : > { %v2011_v14 = vsel %vm5017_vm5, %v2006_v27, %v2010_v13  ;;  %v2016_v18 = vrot.slane %v2015_v61, 4  ;;  %v355_v41 = vrot.slane %v353_v44, 5  ;;  %v358_v5 = vshrl.u32 %v240_v30, 16  ;;  %v4140_v27 = vld [vmem:[%s4910_s19 + $0x28] sm:$0xf] }
  0xd2   : > { %v340_v2 = vor.u32 %v339_v51, %v336_v23  ;;  %v350_v22 = vor.u32 %v349_v43, %v345_v32  ;;  %v361_v15 = vshll.u32 %v240_v30, 16  ;;  %v367_v42 = vshll.u32 %v241_v19, 16  ;;  %v4141_v23 = vld [vmem:[%s4910_s19 + $0x30] sm:$0xf] }
  0xd3   : > { %v2021_v57 = vsel %vm5017_vm5, %v2016_v18, %v2020_v11  ;;  %v360_v25 = vrot.slane %v358_v5, 4  ;;  %v371_v62 = vshrl.u32 %v241_v19, 16  ;;  %v377_v8 = vshll.u32 %v269_v21, 16  ;;  %v4142_v5 = vld [vmem:[%s4910_s19 + $0x34] sm:$0xf] }
  0xd4   : > { %v4362_v35 = vcombine.low %v2011_v14, %v2021_v57  ;;  %v341_v28 = vrot.slane %v340_v2, 4  ;;  %v351_v38 = vrot.slane %v350_v22, 4  ;;  %v363_v34 = vrot.slane %v361_v15, 5  ;;  %v3304_v15 = vpop.permute.xlu1 %3303 }
  0xd5   : > { %v369_v1 = vrot.slane %v367_v42, 5  ;;  %v373_v13 = vrot.slane %v371_v62, 4  ;;  %v379_v0 = vrot.slane %v377_v8, 5  ;;  %v3490_v19 = vsel %vm1539_vm8, %v3458_v63, %v5568_v7  ;;  %v3302_v62 = vpop.permute.xlu0 %3301  ;;  %v4169_v8 = vld [vmem:[%s4910_s19 + $0x2c] sm:$0x1] }
  0xd6   : > { %v3417_v36 = vsel %vm1457_vm6, %v4362_v35, %v3222_v37  ;;  %v346_v11 = vsel %vm5017_vm5, %v341_v28, %v345_v32  ;;  %v356_v17 = vsel %vm5017_vm5, %v351_v38, %v355_v41  ;;  %v364_v30 = vor.u32 %v363_v34, %v360_v25  ;;  %4521 = vmatprep.mubr.msk.bf16.mxu1 %vm1580_vm9, %v3490_v19 }
  0xd7   : > { %v4201_v61 = vcombine.low %v346_v11, %v356_v17  ;;  %v374_v44 = vor.u32 %v373_v13, %v369_v1  ;;  %v3460_v37 = vsel %vm1506_vm7, %v3414_v59, %v3300_v24  ;;  %v770_v43 = vshrl.u32 %v4139_v39, 16  ;;  %v4170_v24 = vld [vmem:[%s4910_s19 + $0x38] sm:$0x1]  ;;  %v1917_v11 = vld [vmem:[%s4910_s19 + $0x3c] sm:$0xf] }
  0xd8   : > { %v365_v51 = vrot.slane %v364_v30, 4  ;;  %v773_v32 = vshll.u32 %v4139_v39, 16  ;;  %v779_v14 = vshll.u32 %v4140_v27, 16  ;;  %v783_v18 = vshrl.u32 %v4140_v27, 16 }
  0xd9   : > { %1237 = vrot.lane.b32.xlu0 %v4201_v61, %s4796_s28  ;;  %v375_v21 = vrot.slane %v374_v44, 4  ;;  %v4217_v41 = vcombine.low %v4139_v39, %v4140_v27  ;;  %v772_v63 = vrot.slane %v770_v43, 4  ;;  %v794_v22 = vshrl.u32 %v4141_v23, 16 }
  0xda   : > { %v370_v7 = vsel %vm5017_vm5, %v365_v51, %v369_v1  ;;  %v775_v2 = vrot.slane %v773_v32, 5  ;;  %v781_v42 = vrot.slane %v779_v14, 5  ;;  %v785_v57 = vrot.slane %v783_v18, 4 }
  0xdb   : > { %v380_v59 = vsel %vm5017_vm5, %v375_v21, %v379_v0  ;;  %v797_v25 = vshll.u32 %v4141_v23, 16  ;;  %v796_v28 = vrot.slane %v794_v22, 4  ;;  %v803_v38 = vshll.u32 %v4142_v5, 16  ;;  %v4679_v22 = vld [vmem:[%s4910_s19 + $0x40] sm:$0xf] }
  0xdc   : > { %v4202_v35 = vcombine.low %v370_v7, %v380_v59  ;;  %v807_v34 = vshrl.u32 %v4142_v5, 16  ;;  %v4218_v13 = vcombine.low %v4141_v23, %v4142_v5  ;;  %v3492_v39 = vsel %vm1539_vm8, %v3460_v37, %v5501_v60 }
  0xdd   : > { %1349 = vrot.lane.b32.xlu0 %v4217_v41, %s4797_s5  ;;  %v799_v1 = vrot.slane %v797_v25, 5  ;;  %v5622_v0 = vsel %vm1506_vm7, %v5579_v16, %v3304_v15  ;;  %v805_v17 = vrot.slane %v803_v38, 5  ;;  %4522 = vmatmul.mubr.msk.bf16.vlgmr.msra.gmra.mxu1 %vm1580_vm9, %v3492_v39  ;;  %v3462_v27 = vsel %vm1506_vm7, %v3417_v36, %v3302_v62  ;;  %v242_v38 = vld [vmem:[%s4910_s19 + $0x30] sm:$0xf]  ;;  %v243_v39 = vld [vmem:[%s4910_s19 + $0x34] sm:$0xf] }
  0xde   : > { %1239 = vrot.lane.b32.xlu1 %v4202_v35, %s4796_s28  ;;  %v809_v30 = vrot.slane %v807_v34, 4  ;;  %v776_v61 = vor.u32 %v775_v2, %v772_v63  ;;  %v786_v44 = vor.u32 %v785_v57, %v781_v42  ;;  %v789_v19 = vshll.u32 %v4169_v8, 16  ;;  %v1914_v63 = vld [vmem:[%s4910_s19 + $0x30] sm:$0xf] }
  0xdf   : > { %v800_v23 = vor.u32 %v799_v1, %v796_v28  ;;  %v813_v51 = vshll.u32 %v4170_v24, 16  ;;  %v3494_v16 = vsel %vm1539_vm8, %v3462_v27, %v3382_v54  ;;  %v2071_v43 = vshrl.u32 %v1917_v11, 16  ;;  %v5645_v28 = vpop.permute.xlu0 %3225 }
  0xe0   : > { %v777_v60 = vrot.slane %v776_v61, 4  ;;  %v810_v37 = vor.u32 %v809_v30, %v805_v17  ;;  %v787_v32 = vrot.slane %v786_v44, 4  ;;  %v791_v21 = vrot.slane %v789_v19, 5  ;;  %4525 = vmatprep.mubr.msk.bf16.mxu1 %vm1580_vm9, %v3494_v16  ;;  %v270_v16 = vld [vmem:[%s4910_s19 + $0x38] sm:$0x1] }
  0xe1   : > { %v801_v14 = vrot.slane %v800_v23, 4  ;;  %v815_v18 = vrot.slane %v813_v51, 5  ;;  %v2073_v5 = vrot.slane %v2071_v43, 4  ;;  %v2074_v7 = vshll.u32 %v1917_v11, 16  ;;  %v4680_v11 = vld [vmem:[%s4910_s19 + $0x34] sm:$0xf] }
  0xe2   : > { %1351 = vrot.lane.b32.xlu1 %v4218_v13, %s4797_s5  ;;  %v782_v36 = vsel %vm5017_vm5, %v777_v60, %v781_v42  ;;  %v811_v41 = vrot.slane %v810_v37, 4  ;;  %v792_v54 = vsel %vm5017_vm5, %v787_v32, %v791_v21  ;;  %v2080_v15 = vshll.u32 %v4679_v22, 16 }
  0xe3   : > { %v806_v2 = vsel %vm5017_vm5, %v801_v14, %v805_v17  ;;  %v6654_v59 = vshrl.u32 %v5059_v55, 16  ;;  %v4233_v25 = vcombine.low %v782_v36, %v792_v54  ;;  %v2076_v62 = vrot.slane %v2074_v7, 5  ;;  %v3228_v14 = vpop.permute.xlu1 %3227  ;;  %v3306_v54 = vpop.permute.xlu0 %3305 }
  0xe4   : > { %v816_v42 = vsel %vm5017_vm5, %v811_v41, %v815_v18  ;;  %v6655_v8 = vshll.u32 %v5065_v4, 16  ;;  %v2082_v24 = vrot.slane %v2080_v15, 5  ;;  %v2047_v1 = vshrl.u32 %v1914_v63, 16 }
  0xe5   : > { %v2086_v57 = vrot.slane %v6654_v59, 4  ;;  %v4234_v34 = vcombine.low %v806_v2, %v816_v42  ;;  %v2050_v13 = vshll.u32 %v1914_v63, 16  ;;  %1429 = vrot.lane.b32.xlu0 %v4233_v25, %s4795_s27  ;;  %v2077_v55 = vor.u32 %v2076_v62, %v2073_v5  ;;  %v245_v62 = vld [vmem:[%s4910_s19 + $0x40] sm:$0xf] }
  0xe6   : > { %v2092_v35 = vrot.slane %v6655_v8, 5  ;;  %v2056_v17 = vshll.u32 %v4680_v11, 16  ;;  %v6656_v30 = vshrl.u32 %v5071_v6, 16  ;;  %v6657_v4 = vshll.u32 %v5077_v12, 16  ;;  %v244_v12 = vld [vmem:[%s4910_s19 + $0x3c] sm:$0xf] }
  0xe7   : > { %1431 = vrot.lane.b32.xlu1 %v4234_v34, %s4795_s27  ;;  %v2087_v44 = vor.u32 %v2086_v57, %v2082_v24  ;;  %v2049_v19 = vrot.slane %v2047_v1, 4  ;;  %v2052_v23 = vrot.slane %v2050_v13, 5  ;;  %v382_v51 = vshrl.u32 %v242_v38, 16  ;;  %v271_v1 = vld [vmem:[%s4910_s19 + $0x44] sm:$0x1] }
  0xe8   : > { %v2062_v27 = vrot.slane %v6656_v30, 4  ;;  %v2068_v61 = vrot.slane %v6657_v4, 5  ;;  %v2078_v60 = vrot.slane %v2077_v55, 4  ;;  %v2058_v37 = vrot.slane %v2056_v17, 5 }
  0xe9   : > { %v385_v43 = vshll.u32 %v242_v38, 16  ;;  %v391_v32 = vshll.u32 %v243_v39, 16  ;;  %v2088_v21 = vrot.slane %v2087_v44, 4  ;;  %v2053_v18 = vor.u32 %v2052_v23, %v2049_v19  ;;  %v3308_v44 = vpop.permute.xlu1 %3307 }
  0xea   : > { %v384_v6 = vrot.slane %v382_v51, 4  ;;  %v395_v36 = vshrl.u32 %v243_v39, 16  ;;  %v2083_v41 = vsel %vm5017_vm5, %v2078_v60, %v2082_v24  ;;  %v2063_v5 = vor.u32 %v2062_v27, %v2058_v37 }
  0xeb   : > { %v387_v7 = vrot.slane %v385_v43, 5  ;;  %v393_v63 = vrot.slane %v391_v32, 5  ;;  %v2093_v2 = vsel %vm5017_vm5, %v2088_v21, %v2092_v35  ;;  %v2054_v22 = vrot.slane %v2053_v18, 4 }
  0xec   : > { %v397_v15 = vrot.slane %v395_v36, 4  ;;  %v401_v59 = vshll.u32 %v270_v16, 16  ;;  %v4365_v57 = vcombine.low %v2083_v41, %v2093_v2  ;;  %v2064_v25 = vrot.slane %v2063_v5, 4 }
  0xed   : > { %v388_v42 = vor.u32 %v387_v7, %v384_v6  ;;  %v406_v8 = vshrl.u32 %v244_v12, 16  ;;  %v2059_v38 = vsel %vm5017_vm5, %v2054_v22, %v2058_v37  ;;  %v409_v13 = vshll.u32 %v244_v12, 16  ;;  %v4143_v37 = vld [vmem:[%s4910_s19 + $0x3c] sm:$0xf] }
  0xee   : > { %v398_v34 = vor.u32 %v397_v15, %v393_v63  ;;  %v403_v24 = vrot.slane %v401_v59, 5  ;;  %v3426_v39 = vsel %vm1457_vm6, %v4365_v57, %v3228_v14  ;;  %v2069_v35 = vsel %vm5017_vm5, %v2064_v25, %v2068_v61  ;;  %v3386_v61 = vpop.permute.xlu0 %3385  ;;  %v4144_v14 = vld [vmem:[%s4910_s19 + $0x40] sm:$0xf]  ;;  %v4146_v15 = vld [vmem:[%s4910_s19 + $0x4c] sm:$0xf] }
  0xef   : > { %v389_v55 = vrot.slane %v388_v42, 4  ;;  %v408_v11 = vrot.slane %v406_v8, 4  ;;  %v4364_v17 = vcombine.low %v2059_v38, %v2069_v35  ;;  %v411_v27 = vrot.slane %v409_v13, 5 }
  0xf0   : > { %v399_v30 = vrot.slane %v398_v34, 4  ;;  %v415_v4 = vshll.u32 %v245_v62, 16  ;;  %v419_v23 = vshrl.u32 %v245_v62, 16  ;;  %v425_v51 = vshll.u32 %v271_v1, 16  ;;  %v3388_v62 = vpop.permute.xlu1 %3387 }
  0xf1   : > { %v394_v19 = vsel %vm5017_vm5, %v389_v55, %v393_v63  ;;  %v3496_v60 = vsel %vm1539_vm8, %v5622_v0, %v5549_v33  ;;  %v3423_v16 = vsel %vm1457_vm6, %v4364_v17, %v5645_v28  ;;  %v412_v32 = vor.u32 %v411_v27, %v408_v11  ;;  %v5683_v33 = vld [vmem:[%s4910_s19 + $0x48] sm:$0xf]  ;;  %v4172_v11 = vld [vmem:[%s4910_s19 + $0x50] sm:$0x1] }
  0xf2   : > { %v404_v43 = vsel %vm5017_vm5, %v399_v30, %v403_v24  ;;  %v417_v21 = vrot.slane %v415_v4, 5  ;;  %4526 = vmatmul.mubr.msk.bf16.gmra.mxu1 %vm1580_vm9, %v3496_v60  ;;  %v421_v6 = vrot.slane %v419_v23, 4  ;;  %v427_v36 = vrot.slane %v425_v51, 5  ;;  %v4171_v24 = vld [vmem:[%s4910_s19 + $0x44] sm:$0x1]  ;;  %v5693_v1 = vpop.permute.xlu0 %3229 }
  0xf3   : > { %v4203_v18 = vcombine.low %v394_v19, %v404_v43  ;;  %v3468_v12 = vsel %vm1506_vm7, %v3426_v39, %v3308_v44  ;;  %v413_v0 = vrot.slane %v412_v32, 4  ;;  %v3466_v41 = vsel %vm1506_vm7, %v3423_v16, %v3306_v54  ;;  %v1923_v44 = vld [vmem:[%s4910_s19 + $0x54] sm:$0xf] }
  0xf4   : > { %v818_v28 = vshrl.u32 %v4143_v37, 16  ;;  %v821_v5 = vshll.u32 %v4143_v37, 16  ;;  %v422_v7 = vor.u32 %v421_v6, %v417_v21  ;;  %v827_v63 = vshll.u32 %v4144_v14, 16 }
  0xf5   : > { %1241 = vrot.lane.b32.xlu0 %v4203_v18, %s4796_s28  ;;  %v831_v2 = vshrl.u32 %v4144_v14, 16  ;;  %v4219_v22 = vcombine.low %v4143_v37, %v4144_v14  ;;  %v418_v59 = vsel %vm5017_vm5, %v413_v0, %v417_v21  ;;  %v842_v42 = vshrl.u32 %v5683_v33, 16 }
  0xf6   : > { %v820_v57 = vrot.slane %v818_v28, 4  ;;  %v823_v25 = vrot.slane %v821_v5, 5  ;;  %v423_v54 = vrot.slane %v422_v7, 4  ;;  %v829_v8 = vrot.slane %v827_v63, 5  ;;  %v5706_v0 = vpop.permute.xlu0 %3309  ;;  %v5710_v63 = vpop.permute.xlu1 %3231 }
  0xf7   : > { %v833_v38 = vrot.slane %v831_v2, 4  ;;  %v845_v34 = vshll.u32 %v5683_v33, 16  ;;  %v844_v13 = vrot.slane %v842_v42, 4  ;;  %v851_v39 = vshll.u32 %v4146_v15, 16  ;;  %v1920_v2 = vld [vmem:[%s4910_s19 + $0x48] sm:$0xf] }
  0xf8   : > { %v855_v35 = vshrl.u32 %v4146_v15, 16  ;;  %v4220_v55 = vcombine.low %v5683_v33, %v4146_v15  ;;  %v428_v17 = vsel %vm5017_vm5, %v423_v54, %v427_v36  ;;  %v3500_v27 = vsel %vm1539_vm8, %v3468_v12, %v3388_v62 }
  0xf9   : > { %1353 = vrot.lane.b32.xlu0 %v4219_v22, %s4797_s5  ;;  %v847_v30 = vrot.slane %v845_v34, 5  ;;  %v3498_v4 = vsel %vm1539_vm8, %v3466_v41, %v3386_v61  ;;  %v4204_v19 = vcombine.low %v418_v59, %v428_v17  ;;  %v853_v23 = vrot.slane %v851_v39, 5  ;;  %v4681_v59 = vld [vmem:[%s4910_s19 + $0x58] sm:$0xf]  ;;  %v247_v17 = vld [vmem:[%s4910_s19 + $0x4c] sm:$0xf] }
  0xfa   : > { %v857_v51 = vrot.slane %v855_v35, 4  ;;  %v824_v60 = vor.u32 %v823_v25, %v820_v57  ;;  %4529 = vmatprep.mubr.msk.bf16.mxu1 %vm1580_vm9, %v3498_v4  ;;  %v834_v37 = vor.u32 %v833_v38, %v829_v8  ;;  %v837_v16 = vshll.u32 %v4171_v24, 16  ;;  %v246_v24 = vld [vmem:[%s4910_s19 + $0x48] sm:$0xf] }
  0xfb   : > { %v848_v43 = vor.u32 %v847_v30, %v844_v13  ;;  %v861_v32 = vshll.u32 %v4172_v11, 16  ;;  %4530 = vmatmul.mubr.msk.bf16.gmra.mxu1 %vm1580_vm9, %v3500_v27  ;;  %1243 = vrot.lane.b32.xlu1 %v4204_v19, %s4796_s28  ;;  %v2119_v61 = vshrl.u32 %v1923_v44, 16  ;;  %v2122_v18 = vshll.u32 %v1923_v44, 16 }
  0xfc   : > { %v825_v21 = vrot.slane %v824_v60, 4  ;;  %v858_v14 = vor.u32 %v857_v51, %v853_v23  ;;  %v835_v6 = vrot.slane %v834_v37, 4  ;;  %v839_v36 = vrot.slane %v837_v16, 5  ;;  %v272_v60 = vld [vmem:[%s4910_s19 + $0x50] sm:$0x1]  ;;  %v5734_v16 = vpop.permute.xlu0 %3389 }
  0xfd   : > { %v849_v12 = vrot.slane %v848_v43, 4  ;;  %v863_v33 = vrot.slane %v861_v32, 5  ;;  %v2121_v5 = vrot.slane %v2119_v61, 4  ;;  %v2124_v7 = vrot.slane %v2122_v18, 5 }
  0xfe   : > { %v830_v41 = vsel %vm5017_vm5, %v825_v21, %v829_v8  ;;  %v859_v28 = vrot.slane %v858_v14, 4  ;;  %v840_v22 = vsel %vm5017_vm5, %v835_v6, %v839_v36  ;;  %v2128_v57 = vshll.u32 %v4681_v59, 16  ;;  %v248_v14 = vld [vmem:[%s4910_s19 + $0x54] sm:$0xf]  ;;  %v4661_v59 = vld [vmem:[%s5174_s13] sm:$0xff]  }
  0xff   : > { %v854_v15 = vsel %vm5017_vm5, %v849_v12, %v853_v23  ;;  %v6658_v25 = vshrl.u32 %v5116_v56, 16  ;;  %1355 = vrot.lane.b32.xlu1 %v4220_v55, %s4797_s5  ;;  %v4235_v62 = vcombine.low %v830_v41, %v840_v22  ;;  %v2125_v8 = vor.u32 %v2124_v7, %v2121_v5  ;;  %v4682_v55 = vld [vmem:[%s4910_s19 + $0x4c] sm:$0xf]  ;;  %v249_v22 = vld [vmem:[%s4910_s19 + $0x58] sm:$0xf]  ;;  %4485 = vmatprep.subr.bf16.mxu0 %v4661_v59 }
 0x100   : > { %v864_v54 = vsel %vm5017_vm5, %v859_v28, %v863_v33  ;;  %v6659_v38 = vshll.u32 %v5123_v45, 16  ;;  %v2130_v39 = vrot.slane %v2128_v57, 5  ;;  %v2095_v35 = vshrl.u32 %v1920_v2, 16  ;;  %4486 = vmatpush3.bf16.msra.mxu0 %v4661_v59 }
 0x101   : > { %v2134_v42 = vrot.slane %v6658_v25, 4  ;;  %v4236_v13 = vcombine.low %v854_v15, %v864_v54  ;;  %v2098_v11 = vshll.u32 %v1920_v2, 16  ;;  %1433 = vrot.lane.b32.xlu0 %v4235_v62, %s4795_s27  ;;  %v2126_v56 = vrot.slane %v2125_v8, 4 }
 0x102   : > { %v2140_v34 = vrot.slane %v6659_v38, 5  ;;  %v2104_v30 = vshll.u32 %v4682_v55, 16  ;;  %v6660_v27 = vshrl.u32 %v5129_v9, 16  ;;  %v6661_v44 = vshll.u32 %v5132_v10, 16  ;;  %v3312_v10 = vpop.permute.xlu1 %3311  ;;  %v273_v38 = vld [vmem:[%s4910_s19 + $0x5c] sm:$0x1] }
 0x103   : > { %v2135_v19 = vor.u32 %v2134_v42, %v2130_v39  ;;  %v2097_v23 = vrot.slane %v2095_v35, 4  ;;  %v2100_v51 = vrot.slane %v2098_v11, 5  ;;  %v430_v37 = vshrl.u32 %v246_v24, 16  ;;  %1435 = vrot.lane.b32.xlu1 %v4236_v13, %s4795_s27 }
 0x104   : > { %v2110_v4 = vrot.slane %v6660_v27, 4  ;;  %v2116_v45 = vrot.slane %v6661_v44, 5  ;;  %v2131_v43 = vsel %vm5017_vm5, %v2126_v56, %v2130_v39  ;;  %v2106_v32 = vrot.slane %v2104_v30, 5  ;;  %v5747_v39 = vpop.permute.xlu0 %3233  ;;  %v4147_v44 = vld [vmem:[%s4910_s19 + $0x54] sm:$0xf] }
 0x105   : > { %v433_v21 = vshll.u32 %v246_v24, 16  ;;  %v439_v9 = vshll.u32 %v247_v17, 16  ;;  %v2136_v61 = vrot.slane %v2135_v19, 4  ;;  %v2101_v18 = vor.u32 %v2100_v51, %v2097_v23 }
 0x106   : > { %v432_v6 = vrot.slane %v430_v37, 4  ;;  %v443_v36 = vshrl.u32 %v247_v17, 16  ;;  %v2111_v12 = vor.u32 %v2110_v4, %v2106_v32  ;;  %v449_v28 = vshll.u32 %v272_v60, 16  ;;  %v3392_v56 = vpop.permute.xlu1 %3391  ;;  %v4148_v60 = vld [vmem:[%s4910_s19 + $0x58] sm:$0xf] }
 0x107   : > { %v435_v33 = vrot.slane %v433_v21, 5  ;;  %v441_v41 = vrot.slane %v439_v9, 5  ;;  %v2141_v5 = vsel %vm5017_vm5, %v2136_v61, %v2140_v34  ;;  %v2102_v7 = vrot.slane %v2101_v18, 4  ;;  %v5763_v21 = vld [vmem:[%s4910_s19 + $0x60] sm:$0xf] }
 0x108   : > { %v445_v2 = vrot.slane %v443_v36, 4  ;;  %v454_v15 = vshrl.u32 %v248_v14, 16  ;;  %v4367_v57 = vcombine.low %v2131_v43, %v2141_v5  ;;  %v2112_v25 = vrot.slane %v2111_v12, 4 }
 0x109   : > { %v436_v42 = vor.u32 %v435_v33, %v432_v6  ;;  %v451_v62 = vrot.slane %v449_v28, 5  ;;  %v2107_v54 = vsel %vm5017_vm5, %v2102_v7, %v2106_v32  ;;  %v457_v13 = vshll.u32 %v248_v14, 16  ;;  %v4150_v33 = vld [vmem:[%s4910_s19 + $0x64] sm:$0xf] }
 0x10a   : > { %v446_v8 = vor.u32 %v445_v2, %v441_v41  ;;  %v456_v24 = vrot.slane %v454_v15, 4  ;;  %v3432_v34 = vsel %vm1457_vm6, %v4367_v57, %v5710_v63  ;;  %v2117_v35 = vsel %vm5017_vm5, %v2112_v25, %v2116_v45  ;;  %v5772_v2 = vpop.permute.xlu1 %3235 }
 0x10b   : > { %v437_v11 = vrot.slane %v436_v42, 4  ;;  %v463_v17 = vshll.u32 %v249_v22, 16  ;;  %v4366_v55 = vcombine.low %v2107_v54, %v2117_v35  ;;  %v459_v27 = vrot.slane %v457_v13, 5  ;;  %v4173_v54 = vld [vmem:[%s4910_s19 + $0x5c] sm:$0x1] }
 0x10c   : > { %v447_v30 = vrot.slane %v446_v8, 4  ;;  %v467_v4 = vshrl.u32 %v249_v22, 16  ;;  %v473_v51 = vshll.u32 %v273_v38, 16  ;;  %v3472_v63 = vsel %vm1506_vm7, %v3432_v34, %v3312_v10  ;;  %v4174_v34 = vld [vmem:[%s4910_s19 + $0x68] sm:$0x1] }
 0x10d   : > { %v442_v19 = vsel %vm5017_vm5, %v437_v11, %v441_v41  ;;  %v465_v23 = vrot.slane %v463_v17, 5  ;;  %v3429_v45 = vsel %vm1457_vm6, %v4366_v55, %v5693_v1  ;;  %v460_v43 = vor.u32 %v459_v27, %v456_v24  ;;  %v5768_v1 = vpop.permute.xlu0 %3313  ;;  %v1929_v35 = vld [vmem:[%s4910_s19 + $0x6c] sm:$0xf] }
 0x10e   : > { %v452_v37 = vsel %vm5017_vm5, %v447_v30, %v451_v62  ;;  %v469_v32 = vrot.slane %v467_v4, 4  ;;  %v475_v14 = vrot.slane %v473_v51, 5  ;;  %v3470_v61 = vsel %vm1506_vm7, %v3429_v45, %v5706_v0  ;;  %v5792_v45 = vpop.permute.xlu1 %3315 }
 0x10f   : > { %v4205_v9 = vcombine.low %v442_v19, %v452_v37  ;;  %v866_v18 = vshrl.u32 %v4147_v44, 16  ;;  %v461_v6 = vrot.slane %v460_v43, 4  ;;  %v869_v10 = vshll.u32 %v4147_v44, 16 }
 0x110   : > { %v470_v36 = vor.u32 %v469_v32, %v465_v23  ;;  %v875_v12 = vshll.u32 %v4148_v60, 16  ;;  %v879_v28 = vshrl.u32 %v4148_v60, 16  ;;  %v4221_v5 = vcombine.low %v4147_v44, %v4148_v60 }
 0x111   : > { %1245 = vrot.lane.b32.xlu0 %v4205_v9, %s4796_s28  ;;  %v868_v41 = vrot.slane %v866_v18, 4  ;;  %v890_v7 = vshrl.u32 %v5763_v21, 16  ;;  %v466_v0 = vsel %vm5017_vm5, %v461_v6, %v465_v23  ;;  %v871_v15 = vrot.slane %v869_v10, 5  ;;  %v5788_v23 = vpop.permute.xlu0 %3393  ;;  %v1926_v18 = vld [vmem:[%s4910_s19 + $0x60] sm:$0xf] }
 0x112   : > { %v471_v22 = vrot.slane %v470_v36, 4  ;;  %v877_v59 = vrot.slane %v875_v12, 5  ;;  %v881_v57 = vrot.slane %v879_v28, 4  ;;  %v893_v42 = vshll.u32 %v5763_v21, 16  ;;  %v4683_v12 = vld [vmem:[%s4910_s19 + $0x70] sm:$0xf] }
 0x113   : > { %v892_v25 = vrot.slane %v890_v7, 4  ;;  %v899_v62 = vshll.u32 %v4150_v33, 16  ;;  %v903_v38 = vshrl.u32 %v4150_v33, 16  ;;  %v4222_v24 = vcombine.low %v5763_v21, %v4150_v33 }
 0x114   : > { %v476_v8 = vsel %vm5017_vm5, %v471_v22, %v475_v14  ;;  %v3504_v13 = vsel %vm1539_vm8, %v3472_v63, %v3392_v56  ;;  %v895_v17 = vrot.slane %v893_v42, 5  ;;  %v3502_v30 = vsel %vm1539_vm8, %v3470_v61, %v5734_v16  ;;  %v250_v42 = vld [vmem:[%s4910_s19 + $0x60] sm:$0xf] }
 0x115   : > { %v4206_v11 = vcombine.low %v466_v0, %v476_v8  ;;  %1357 = vrot.lane.b32.xlu0 %v4221_v5, %s4797_s5  ;;  %v901_v55 = vrot.slane %v899_v62, 5  ;;  %v905_v27 = vrot.slane %v903_v38, 4  ;;  %v872_v4 = vor.u32 %v871_v15, %v868_v41  ;;  %4533 = vmatprep.mubr.msk.bf16.mxu1 %vm1580_vm9, %v3502_v30  ;;  %v5810_v62 = vpop.permute.xlu0 %3237 }
 0x116   : > { %v882_v44 = vor.u32 %v881_v57, %v877_v59  ;;  %v885_v19 = vshll.u32 %v4173_v54, 16  ;;  %v896_v56 = vor.u32 %v895_v17, %v892_v25  ;;  %v909_v51 = vshll.u32 %v4174_v34, 16  ;;  %4534 = vmatmul.mubr.msk.bf16.gmra.mxu1 %vm1580_vm9, %v3504_v13  ;;  %v251_v13 = vld [vmem:[%s4910_s19 + $0x64] sm:$0xf]  ;;  %v5815_v34 = vpop.permute.xlu1 %3395 }
 0x117   : > { %1247 = vrot.lane.b32.xlu1 %v4206_v11, %s4796_s28  ;;  %v2167_v63 = vshrl.u32 %v1929_v35, 16  ;;  %v2170_v60 = vshll.u32 %v1929_v35, 16  ;;  %v873_v16 = vrot.slane %v872_v4, 4  ;;  %v906_v32 = vor.u32 %v905_v27, %v901_v55  ;;  %v274_v27 = vld [vmem:[%s4910_s19 + $0x68] sm:$0x1] }
 0x118   : > { %v883_v37 = vrot.slane %v882_v44, 4  ;;  %v887_v43 = vrot.slane %v885_v19, 5  ;;  %v897_v21 = vrot.slane %v896_v56, 4  ;;  %v911_v9 = vrot.slane %v909_v51, 5 }
 0x119   : > { %v2169_v14 = vrot.slane %v2167_v63, 4  ;;  %v2172_v61 = vrot.slane %v2170_v60, 5  ;;  %v878_v6 = vsel %vm5017_vm5, %v873_v16, %v877_v59  ;;  %v907_v10 = vrot.slane %v906_v32, 4  ;;  %v252_v32 = vld [vmem:[%s4910_s19 + $0x6c] sm:$0xf] }
 0x11a   : > { %v888_v36 = vsel %vm5017_vm5, %v883_v37, %v887_v43  ;;  %v2176_v33 = vshll.u32 %v4683_v12, 16  ;;  %v902_v28 = vsel %vm5017_vm5, %v897_v21, %v901_v55  ;;  %v6662_v7 = vshrl.u32 %v5198_v26, 16 }
 0x11b   : > { %1359 = vrot.lane.b32.xlu1 %v4222_v24, %s4797_s5  ;;  %v4237_v41 = vcombine.low %v878_v6, %v888_v36  ;;  %v2173_v5 = vor.u32 %v2172_v61, %v2169_v14  ;;  %v912_v22 = vsel %vm5017_vm5, %v907_v10, %v911_v9  ;;  %v6663_v59 = vshll.u32 %v5203_v49, 16  ;;  %v4684_v24 = vld [vmem:[%s4910_s19 + $0x64] sm:$0xf]  ;;  %v5829_v6 = vpop.permute.xlu0 %3317 }
 0x11c   : > { %v2182_v0 = vrot.slane %v6662_v7, 4  ;;  %v2178_v15 = vrot.slane %v2176_v33, 5  ;;  %v2143_v25 = vshrl.u32 %v1926_v18, 16  ;;  %v4238_v54 = vcombine.low %v902_v28, %v912_v22  ;;  %v275_v7 = vld [vmem:[%s4910_s19 + $0x74] sm:$0x1] }
 0x11d   : > { %v2188_v57 = vrot.slane %v6663_v59, 5  ;;  %1437 = vrot.lane.b32.xlu0 %v4237_v41, %s4795_s27  ;;  %v2174_v8 = vrot.slane %v2173_v5, 4  ;;  %v2146_v38 = vshll.u32 %v1926_v18, 16  ;;  %v2152_v26 = vshll.u32 %v4684_v24, 16  ;;  %v253_v18 = vld [vmem:[%s4910_s19 + $0x70] sm:$0xf]  ;;  %v5831_v41 = vpop.permute.xlu1 %3239 }
 0x11e   : > { %v2183_v35 = vor.u32 %v2182_v0, %v2178_v15  ;;  %v2145_v11 = vrot.slane %v2143_v25, 4  ;;  %v6664_v49 = vshrl.u32 %v5215_v48, 16  ;;  %v6665_v55 = vshll.u32 %v5223_v58, 16  ;;  %v4151_v24 = vld [vmem:[%s4910_s19 + $0x6c] sm:$0xf] }
 0x11f   : > { %1439 = vrot.lane.b32.xlu1 %v4238_v54, %s4795_s27  ;;  %v2179_v4 = vsel %vm5017_vm5, %v2174_v8, %v2178_v15  ;;  %v2148_v44 = vrot.slane %v2146_v38, 5  ;;  %v2154_v19 = vrot.slane %v2152_v26, 5  ;;  %v478_v56 = vshrl.u32 %v250_v42, 16 }
 0x120   : > { %v2158_v17 = vrot.slane %v6664_v49, 4  ;;  %v2164_v30 = vrot.slane %v6665_v55, 5  ;;  %v2184_v51 = vrot.slane %v2183_v35, 4  ;;  %v481_v63 = vshll.u32 %v250_v42, 16  ;;  %v4152_v49 = vld [vmem:[%s4910_s19 + $0x70] sm:$0xf] }
 0x121   : > { %v487_v60 = vshll.u32 %v251_v13, 16  ;;  %v491_v16 = vshrl.u32 %v251_v13, 16  ;;  %v2149_v48 = vor.u32 %v2148_v44, %v2145_v11  ;;  %v480_v43 = vrot.slane %v478_v56, 4 }
 0x122   : > { %v2159_v37 = vor.u32 %v2158_v17, %v2154_v19  ;;  %v497_v58 = vshll.u32 %v274_v27, 16  ;;  %v2189_v21 = vsel %vm5017_vm5, %v2184_v51, %v2188_v57  ;;  %v483_v9 = vrot.slane %v481_v63, 5  ;;  %v5850_v27 = vpop.permute.xlu0 %3397  ;;  %v5853_v51 = vld [vmem:[%s4910_s19 + $0x78] sm:$0xf]  ;;  %v5855_v63 = vpop.permute.xlu1 %3319 }
 0x123   : > { %v489_v14 = vrot.slane %v487_v60, 5  ;;  %v493_v61 = vrot.slane %v491_v16, 4  ;;  %v4369_v36 = vcombine.low %v2179_v4, %v2189_v21  ;;  %v2150_v10 = vrot.slane %v2149_v48, 4 }
 0x124   : > { %v2160_v12 = vrot.slane %v2159_v37, 4  ;;  %v499_v33 = vrot.slane %v497_v58, 5  ;;  %v484_v28 = vor.u32 %v483_v9, %v480_v43  ;;  %v502_v0 = vshrl.u32 %v252_v32, 16 }
 0x125   : > { %v494_v5 = vor.u32 %v493_v61, %v489_v14  ;;  %v505_v22 = vshll.u32 %v252_v32, 16  ;;  %v3438_v15 = vsel %vm1457_vm6, %v4369_v36, %v5772_v2  ;;  %v2155_v59 = vsel %vm5017_vm5, %v2150_v10, %v2154_v19  ;;  %v4154_v32 = vld [vmem:[%s4910_s19 + $0x7c] sm:$0xf] }
 0x126   : > { %v2165_v57 = vsel %vm5017_vm5, %v2160_v12, %v2164_v30  ;;  %v511_v25 = vshll.u32 %v253_v18, 16  ;;  %v485_v54 = vrot.slane %v484_v28, 4  ;;  %v504_v38 = vrot.slane %v502_v0, 4  ;;  %v4175_v12 = vld [vmem:[%s4910_s19 + $0x74] sm:$0x1] }
 0x127   : > { %v4368_v42 = vcombine.low %v2155_v59, %v2165_v57  ;;  %v495_v8 = vrot.slane %v494_v5, 4  ;;  %v507_v26 = vrot.slane %v505_v22, 5  ;;  %v515_v35 = vshrl.u32 %v253_v18, 16  ;;  %v4176_v0 = vld [vmem:[%s4910_s19 + $0x80] sm:$0x1]  ;;  %v5868_v22 = vpop.permute.xlu0 %3241 }
 0x128   : > { %v513_v13 = vrot.slane %v511_v25, 5  ;;  %v521_v11 = vshll.u32 %v275_v7, 16  ;;  %v490_v17 = vsel %vm5017_vm5, %v485_v54, %v489_v14  ;;  %v3476_v30 = vsel %vm1506_vm7, %v3438_v15, %v5792_v45  ;;  %v5878_v54 = vpop.permute.xlu1 %3399 }
 0x129   : > { %v3435_v2 = vsel %vm1457_vm6, %v4368_v42, %v5747_v39  ;;  %v500_v55 = vsel %vm5017_vm5, %v495_v8, %v499_v33  ;;  %v508_v44 = vor.u32 %v507_v26, %v504_v38  ;;  %v517_v19 = vrot.slane %v515_v35, 4  ;;  %v1935_v42 = vld [vmem:[%s4910_s19 + $0x84] sm:$0xf] }
 0x12a   : > { %v4207_v4 = vcombine.low %v490_v17, %v500_v55  ;;  %v523_v56 = vrot.slane %v521_v11, 5  ;;  %v3474_v39 = vsel %vm1506_vm7, %v3435_v2, %v5768_v1  ;;  %v914_v60 = vshrl.u32 %v4151_v24, 16 }
 0x12b   : > { %v917_v16 = vshll.u32 %v4151_v24, 16  ;;  %v923_v48 = vshll.u32 %v4152_v49, 16  ;;  %v509_v45 = vrot.slane %v508_v44, 4  ;;  %v518_v37 = vor.u32 %v517_v19, %v513_v13 }
 0x12c   : > { %1249 = vrot.lane.b32.xlu0 %v4207_v4, %s4796_s28  ;;  %v927_v43 = vshrl.u32 %v4152_v49, 16  ;;  %v4223_v58 = vcombine.low %v4151_v24, %v4152_v49  ;;  %v916_v21 = vrot.slane %v914_v60, 4  ;;  %v938_v61 = vshrl.u32 %v5853_v51, 16  ;;  %v1932_v60 = vld [vmem:[%s4910_s19 + $0x78] sm:$0xf] }
 0x12d   : > { %v919_v9 = vrot.slane %v917_v16, 5  ;;  %v925_v14 = vrot.slane %v923_v48, 5  ;;  %v514_v1 = vsel %vm5017_vm5, %v509_v45, %v513_v13  ;;  %v519_v18 = vrot.slane %v518_v37, 4  ;;  %v5886_v16 = vpop.permute.xlu0 %3321  ;;  %v4685_v37 = vld [vmem:[%s4910_s19 + $0x88] sm:$0xf] }
 0x12e   : > { %v929_v36 = vrot.slane %v927_v43, 4  ;;  %v941_v10 = vshll.u32 %v5853_v51, 16  ;;  %v940_v33 = vrot.slane %v938_v61, 4  ;;  %v947_v28 = vshll.u32 %v4154_v32, 16 }
 0x12f   : > { %v951_v5 = vshrl.u32 %v4154_v32, 16  ;;  %v4224_v7 = vcombine.low %v5853_v51, %v4154_v32  ;;  %v524_v15 = vsel %vm5017_vm5, %v519_v18, %v523_v56  ;;  %v3508_v57 = vsel %vm1539_vm8, %v3476_v30, %v5815_v34 }
 0x130   : > { %1361 = vrot.lane.b32.xlu0 %v4223_v58, %s4797_s5  ;;  %v943_v59 = vrot.slane %v941_v10, 5  ;;  %v3506_v25 = vsel %vm1539_vm8, %v3474_v39, %v5788_v23  ;;  %v4208_v8 = vcombine.low %v514_v1, %v524_v15  ;;  %v949_v38 = vrot.slane %v947_v28, 5  ;;  %v5904_v28 = vld [vmem:[%s4910_s19 + $0x7c] sm:$0xf] }
 0x131   : > { %v953_v24 = vrot.slane %v951_v5, 4  ;;  %v920_v26 = vor.u32 %v919_v9, %v916_v21  ;;  %4537 = vmatprep.mubr.msk.bf16.mxu1 %vm1580_vm9, %v3506_v25  ;;  %v930_v13 = vor.u32 %v929_v36, %v925_v14  ;;  %v933_v35 = vshll.u32 %v4175_v12, 16  ;;  %v5895_v21 = vpop.permute.xlu1 %3243  ;;  %v254_v36 = vld [vmem:[%s4910_s19 + $0x78] sm:$0xf] }
 0x132   : > { %v944_v11 = vor.u32 %v943_v59, %v940_v33  ;;  %v957_v49 = vshll.u32 %v4176_v0, 16  ;;  %4538 = vmatmul.mubr.msk.bf16.gmra.mxu1 %vm1580_vm9, %v3508_v57  ;;  %1251 = vrot.lane.b32.xlu1 %v4208_v8, %s4796_s28  ;;  %v2215_v2 = vshrl.u32 %v1935_v42, 16  ;;  %v2218_v17 = vshll.u32 %v1935_v42, 16 }
 0x133   : > { %v921_v34 = vrot.slane %v920_v26, 4  ;;  %v954_v23 = vor.u32 %v953_v24, %v949_v38  ;;  %v931_v55 = vrot.slane %v930_v13, 4  ;;  %v935_v30 = vrot.slane %v933_v35, 5 }
 0x134   : > { %v945_v4 = vrot.slane %v944_v11, 4  ;;  %v959_v44 = vrot.slane %v957_v49, 5  ;;  %v2217_v51 = vrot.slane %v2215_v2, 4  ;;  %v2220_v39 = vrot.slane %v2218_v17, 5  ;;  %v5920_v49 = vpop.permute.xlu0 %3401 }
 0x135   : > { %v926_v19 = vsel %vm5017_vm5, %v921_v34, %v925_v14  ;;  %v955_v56 = vrot.slane %v954_v23, 4  ;;  %v936_v48 = vsel %vm5017_vm5, %v931_v55, %v935_v30  ;;  %v2224_v43 = vshll.u32 %v4685_v37, 16  ;;  %v5923_v17 = vpop.permute.xlu1 %3323 }
 0x136   : > { %v950_v45 = vsel %vm5017_vm5, %v945_v4, %v949_v38  ;;  %v6666_v58 = vshrl.u32 %v5264_v52, 16  ;;  %1363 = vrot.lane.b32.xlu1 %v4224_v7, %s4797_s5  ;;  %v4239_v9 = vcombine.low %v926_v19, %v936_v48  ;;  %v2221_v61 = vor.u32 %v2220_v39, %v2217_v51  ;;  %v4686_v7 = vld [vmem:[%s4910_s19 + $0x7c] sm:$0xf]  ;;  %v276_v38 = vld [vmem:[%s4910_s19 + $0x80] sm:$0x1] }
 0x137   : > { %v960_v14 = vsel %vm5017_vm5, %v955_v56, %v959_v44  ;;  %v6667_v1 = vshll.u32 %v5268_v3, 16  ;;  %v2226_v12 = vrot.slane %v2224_v43, 5  ;;  %v2191_v33 = vshrl.u32 %v1932_v60, 16  ;;  %v5928_v39 = vld [vmem:[%s4910_s19 + $0x88] sm:$0xf] }
 0x138   : > { %v2230_v32 = vrot.slane %v6666_v58, 4  ;;  %v4240_v10 = vcombine.low %v950_v45, %v960_v14  ;;  %v2194_v52 = vshll.u32 %v1932_v60, 16  ;;  %1441 = vrot.lane.b32.xlu0 %v4239_v9, %s4795_s27  ;;  %v2222_v5 = vrot.slane %v2221_v61, 4  ;;  %v277_v9 = vld [vmem:[%s4910_s19 + $0x8c] sm:$0x1] }
 0x139   : > { %v2236_v18 = vrot.slane %v6667_v1, 5  ;;  %v2200_v0 = vshll.u32 %v4686_v7, 16  ;;  %v6668_v15 = vshrl.u32 %v5277_v47, 16  ;;  %v6669_v3 = vshll.u32 %v5285_v53, 16  ;;  %v5918_v47 = vld [vmem:[%s4910_s19 + $0x84] sm:$0xf] }
 0x13a   : > { %v2231_v25 = vor.u32 %v2230_v32, %v2226_v12  ;;  %v2193_v42 = vrot.slane %v2191_v33, 4  ;;  %v2196_v8 = vrot.slane %v2194_v52, 5  ;;  %v526_v24 = vshrl.u32 %v254_v36, 16  ;;  %1443 = vrot.lane.b32.xlu1 %v4240_v10, %s4795_s27 }
 0x13b   : > { %v2206_v59 = vrot.slane %v6668_v15, 4  ;;  %v2212_v57 = vrot.slane %v6669_v3, 5  ;;  %v2227_v26 = vsel %vm5017_vm5, %v2222_v5, %v2226_v12  ;;  %v2202_v13 = vrot.slane %v2200_v0, 5  ;;  %v5940_v12 = vpop.permute.xlu0 %3245  ;;  %v4155_v0 = vld [vmem:[%s4910_s19 + $0x84] sm:$0xf]  ;;  %v5944_v15 = vpop.permute.xlu1 %3403 }
 0x13c   : > { %v529_v35 = vshll.u32 %v254_v36, 16  ;;  %v535_v11 = vshll.u32 %v5904_v28, 16  ;;  %v2232_v53 = vrot.slane %v2231_v25, 4  ;;  %v2197_v34 = vor.u32 %v2196_v8, %v2193_v42  ;;  %v4156_v25 = vld [vmem:[%s4910_s19 + $0x88] sm:$0xf] }
 0x13d   : > { %v528_v23 = vrot.slane %v526_v24, 4  ;;  %v539_v2 = vshrl.u32 %v5904_v28, 16  ;;  %v2207_v55 = vor.u32 %v2206_v59, %v2202_v13  ;;  %v545_v44 = vshll.u32 %v276_v38, 16 }
 0x13e   : > { %v531_v30 = vrot.slane %v529_v35, 5  ;;  %v537_v4 = vrot.slane %v535_v11, 5  ;;  %v2237_v19 = vsel %vm5017_vm5, %v2232_v53, %v2236_v18  ;;  %v2198_v56 = vrot.slane %v2197_v34, 4 }
 0x13f   : > { %v541_v51 = vrot.slane %v539_v2, 4  ;;  %v550_v60 = vshrl.u32 %v5918_v47, 16  ;;  %v4371_v48 = vcombine.low %v2227_v26, %v2237_v19  ;;  %v2208_v45 = vrot.slane %v2207_v55, 4  ;;  %v5956_v26 = vld [vmem:[%s4910_s19 + $0x90] sm:$0xf]  ;;  %v5963_v19 = vpop.permute.xlu0 %3247 }
 0x140   : > { %v532_v37 = vor.u32 %v531_v30, %v528_v23  ;;  %v547_v43 = vrot.slane %v545_v44, 5  ;;  %v2203_v58 = vsel %vm5017_vm5, %v2198_v56, %v2202_v13  ;;  %v553_v61 = vshll.u32 %v5918_v47, 16  ;;  %v4158_v55 = vld [vmem:[%s4910_s19 + $0x94] sm:$0xf] }
 0x141   : > { %v542_v32 = vor.u32 %v541_v51, %v537_v4  ;;  %v552_v14 = vrot.slane %v550_v60, 4  ;;  %v3444_v1 = vsel %vm1457_vm6, %v4371_v48, %v5831_v41  ;;  %v2213_v18 = vsel %vm5017_vm5, %v2208_v45, %v2212_v57  ;;  %v5967_v48 = vpop.permute.xlu1 %1233 }
 0x142   : > { %v533_v36 = vrot.slane %v532_v37, 4  ;;  %v559_v10 = vshll.u32 %v5928_v39, 16  ;;  %v4370_v33 = vcombine.low %v2203_v58, %v2213_v18  ;;  %v555_v5 = vrot.slane %v553_v61, 5  ;;  %v4178_v18 = vld [vmem:[%s4910_s19 + $0x98] sm:$0x1] }
 0x143   : > { %v543_v52 = vrot.slane %v542_v32, 4  ;;  %v563_v7 = vshrl.u32 %v5928_v39, 16  ;;  %v569_v3 = vshll.u32 %v277_v9, 16  ;;  %v3480_v57 = vsel %vm1506_vm7, %v3444_v1, %v5855_v63  ;;  %v4177_v32 = vld [vmem:[%s4910_s19 + $0x8c] sm:$0x1] }
 0x144   : > { %v538_v41 = vsel %vm5017_vm5, %v533_v36, %v537_v4  ;;  %v561_v59 = vrot.slane %v559_v10, 5  ;;  %v3441_v42 = vsel %vm1457_vm6, %v4370_v33, %v5810_v62  ;;  %v556_v38 = vor.u32 %v555_v5, %v552_v14  ;;  %v1941_v36 = vld [vmem:[%s4910_s19 + $0x9c] sm:$0xf] }
 0x145   : > { %v548_v8 = vsel %vm5017_vm5, %v543_v52, %v547_v43  ;;  %v565_v24 = vrot.slane %v563_v7, 4  ;;  %v571_v35 = vrot.slane %v569_v3, 5  ;;  %v3478_v11 = vsel %vm1506_vm7, %v3441_v42, %v5829_v6  ;;  %v5984_v42 = vpop.permute.xlu0 %1235 }
 0x146   : > { %v4209_v13 = vcombine.low %v538_v41, %v548_v8  ;;  %v962_v53 = vshrl.u32 %v4155_v0, 16  ;;  %v557_v34 = vrot.slane %v556_v38, 4  ;;  %v965_v63 = vshll.u32 %v4155_v0, 16 }
 0x147   : > { %v566_v23 = vor.u32 %v565_v24, %v561_v59  ;;  %v971_v2 = vshll.u32 %v4156_v25, 16  ;;  %v975_v30 = vshrl.u32 %v4156_v25, 16  ;;  %v4225_v4 = vcombine.low %v4155_v0, %v4156_v25 }
 0x148   : > { %1253 = vrot.lane.b32.xlu0 %v4209_v13, %s4796_s28  ;;  %v964_v62 = vrot.slane %v962_v53, 4  ;;  %v986_v44 = vshrl.u32 %v5956_v26, 16  ;;  %v562_v6 = vsel %vm5017_vm5, %v557_v34, %v561_v59  ;;  %v967_v51 = vrot.slane %v965_v63, 5  ;;  %v1938_v34 = vld [vmem:[%s4910_s19 + $0x90] sm:$0xf] }
 0x149   : > { %v567_v56 = vrot.slane %v566_v23, 4  ;;  %v973_v60 = vrot.slane %v971_v2, 5  ;;  %v977_v45 = vrot.slane %v975_v30, 4  ;;  %v989_v43 = vshll.u32 %v5956_v26, 16 }
 0x14a   : > { %v988_v37 = vrot.slane %v986_v44, 4  ;;  %v995_v58 = vshll.u32 %v4158_v55, 16  ;;  %v999_v14 = vshrl.u32 %v4158_v55, 16  ;;  %v4226_v61 = vcombine.low %v5956_v26, %v4158_v55  ;;  %v5986_v26 = vpop.permute.xlu1 %3325  ;;  %v4687_v55 = vld [vmem:[%s4910_s19 + $0xa0] sm:$0xf] }
 0x14b   : > { %v572_v9 = vsel %vm5017_vm5, %v567_v56, %v571_v35  ;;  %v3512_v1 = vsel %vm1539_vm8, %v3480_v57, %v5878_v54  ;;  %v991_v33 = vrot.slane %v989_v43, 5  ;;  %v3510_v5 = vsel %vm1539_vm8, %v3478_v11, %v5850_v27 }
 0x14c   : > { %v4210_v10 = vcombine.low %v562_v6, %v572_v9  ;;  %1365 = vrot.lane.b32.xlu0 %v4225_v4, %s4797_s5  ;;  %v997_v52 = vrot.slane %v995_v58, 5  ;;  %v1001_v7 = vrot.slane %v999_v14, 4  ;;  %v968_v0 = vor.u32 %v967_v51, %v964_v62  ;;  %4541 = vmatprep.mubr.msk.bf16.mxu1 %vm1580_vm9, %v3510_v5  ;;  %v6004_v58 = vld [vmem:[%s4910_s19 + $0x90] sm:$0xf] }
 0x14d   : > { %v978_v41 = vor.u32 %v977_v45, %v973_v60  ;;  %v981_v59 = vshll.u32 %v4177_v32, 16  ;;  %v992_v54 = vor.u32 %v991_v33, %v988_v37  ;;  %v1005_v3 = vshll.u32 %v4178_v18, 16  ;;  %4542 = vmatmul.mubr.msk.bf16.gmra.mxu1 %vm1580_vm9, %v3512_v1  ;;  %v6011_v18 = vpop.permute.xlu0 %3327 }
 0x14e   : > { %1255 = vrot.lane.b32.xlu1 %v4210_v10, %s4796_s28  ;;  %v2263_v57 = vshrl.u32 %v1941_v36, 16  ;;  %v2266_v25 = vshll.u32 %v1941_v36, 16  ;;  %v969_v8 = vrot.slane %v968_v0, 4  ;;  %v1002_v24 = vor.u32 %v1001_v7, %v997_v52  ;;  %v278_v0 = vld [vmem:[%s4910_s19 + $0x98] sm:$0x1] }
 0x14f   : > { %v979_v27 = vrot.slane %v978_v41, 4  ;;  %v983_v38 = vrot.slane %v981_v59, 5  ;;  %v993_v13 = vrot.slane %v992_v54, 4  ;;  %v1007_v35 = vrot.slane %v1005_v3, 5  ;;  %v6018_v41 = vpop.permute.xlu1 %1345 }
 0x150   : > { %v2265_v11 = vrot.slane %v2263_v57, 4  ;;  %v2268_v53 = vrot.slane %v2266_v25, 5  ;;  %v974_v23 = vsel %vm5017_vm5, %v969_v8, %v973_v60  ;;  %v1003_v2 = vrot.slane %v1002_v24, 4 }
 0x151   : > { %v984_v63 = vsel %vm5017_vm5, %v979_v27, %v983_v38  ;;  %v2272_v62 = vshll.u32 %v4687_v55, 16  ;;  %v998_v4 = vsel %vm5017_vm5, %v993_v13, %v997_v52  ;;  %v6670_v6 = vshrl.u32 %v5327_v20, 16  ;;  %v6009_v20 = vld [vmem:[%s4910_s19 + $0x94] sm:$0xf]  ;;  %v6673_v52 = vld [vmem:[#allocation10_spill] sm:$0xff] }
 0x152   : > { %1367 = vrot.lane.b32.xlu1 %v4226_v61, %s4797_s5  ;;  %v4241_v30 = vcombine.low %v974_v23, %v984_v63  ;;  %v2269_v44 = vor.u32 %v2268_v53, %v2265_v11  ;;  %v1008_v51 = vsel %vm5017_vm5, %v1003_v2, %v1007_v35  ;;  %v6671_v45 = vshll.u32 %v5330_v31, 16  ;;  %v4688_v61 = vld [vmem:[%s4910_s19 + $0x94] sm:$0xf]  ;;  %v6028_v11 = vld [vmem:[%s4910_s19 + $0x9c] sm:$0xf] }
 0x153   : > { %v2278_v56 = vrot.slane %v6670_v6, 4  ;;  %v2274_v60 = vrot.slane %v2272_v62, 5  ;;  %v2239_v43 = vshrl.u32 %v1938_v34, 16  ;;  %v4242_v32 = vcombine.low %v998_v4, %v1008_v51  ;;  %v6033_v2 = vld [vmem:[%s4910_s19 + $0xa0] sm:$0xf] }
 0x154   : > { %v2284_v37 = vrot.slane %v6671_v45, 5  ;;  %1445 = vrot.lane.b32.xlu0 %v4241_v30, %s4795_s27  ;;  %v2270_v9 = vrot.slane %v2269_v44, 4  ;;  %v2242_v14 = vshll.u32 %v1938_v34, 16  ;;  %v2248_v1 = vshll.u32 %v4688_v61, 16  ;;  %v6035_v44 = vpop.permute.xlu0 %1347  ;;  %v279_v51 = vld [vmem:[%s4910_s19 + $0xa4] sm:$0x1] }
 0x155   : > { %v2279_v36 = vor.u32 %v2278_v56, %v2274_v60  ;;  %v2241_v10 = vrot.slane %v2239_v43, 4  ;;  %v6672_v31 = vshrl.u32 %v5338_v50, 16  ;;  %v6674_v5 = vshll.u32 %v6673_v52, 16 }
 0x156   : > { %1447 = vrot.lane.b32.xlu1 %v4242_v32, %s4795_s27  ;;  %v2275_v59 = vsel %vm5017_vm5, %v2270_v9, %v2274_v60  ;;  %v2244_v54 = vrot.slane %v2242_v14, 5  ;;  %v2250_v3 = vrot.slane %v2248_v1, 5  ;;  %v574_v57 = vshrl.u32 %v6004_v58, 16 }
 0x157   : > { %v2254_v33 = vrot.slane %v6672_v31, 4  ;;  %v2260_v7 = vrot.slane %v6674_v5, 5  ;;  %v2280_v25 = vrot.slane %v2279_v36, 4  ;;  %v577_v50 = vshll.u32 %v6004_v58, 16  ;;  %v4159_v31 = vld [vmem:[%s4910_s19 + $0x9c] sm:$0xf] }
 0x158   : > { %v583_v8 = vshll.u32 %v6009_v20, 16  ;;  %v587_v27 = vshrl.u32 %v6009_v20, 16  ;;  %v2245_v38 = vor.u32 %v2244_v54, %v2241_v10  ;;  %v576_v13 = vrot.slane %v574_v57, 4 }
 0x159   : > { %v2255_v24 = vor.u32 %v2254_v33, %v2250_v3  ;;  %v593_v35 = vshll.u32 %v278_v0, 16  ;;  %v2285_v53 = vsel %vm5017_vm5, %v2280_v25, %v2284_v37  ;;  %v579_v34 = vrot.slane %v577_v50, 5  ;;  %v6040_v37 = vpop.permute.xlu1 %3405 }
 0x15a   : > { %v585_v23 = vrot.slane %v583_v8, 5  ;;  %v589_v63 = vrot.slane %v587_v27, 4  ;;  %v4373_v55 = vcombine.low %v2275_v59, %v2285_v53  ;;  %v2246_v62 = vrot.slane %v2245_v38, 4  ;;  %v6061_v27 = vld [vmem:[%s4910_s19 + $0xa8] sm:$0xf]  ;;  %v6063_v38 = vpop.permute.xlu0 %3407 }
 0x15b   : > { %v2256_v30 = vrot.slane %v2255_v24, 4  ;;  %v595_v4 = vrot.slane %v593_v35, 5  ;;  %v580_v6 = vor.u32 %v579_v34, %v576_v13  ;;  %v598_v60 = vshrl.u32 %v6028_v11, 16 }
 0x15c   : > { %v590_v56 = vor.u32 %v589_v63, %v585_v23  ;;  %v601_v45 = vshll.u32 %v6028_v11, 16  ;;  %v3450_v43 = vsel %vm1457_vm6, %v4373_v55, %v5895_v21  ;;  %v2251_v32 = vsel %vm5017_vm5, %v2246_v62, %v2250_v3  ;;  %v4160_v21 = vld [vmem:[%s4910_s19 + $0xa0] sm:$0xf]  ;;  %v4162_v55 = vld [vmem:[%s4910_s19 + $0xac] sm:$0xf] }
 0x15d   : > { %v2261_v9 = vsel %vm5017_vm5, %v2256_v30, %v2260_v7  ;;  %v607_v14 = vshll.u32 %v6033_v2, 16  ;;  %v581_v1 = vrot.slane %v580_v6, 4  ;;  %v600_v10 = vrot.slane %v598_v60, 4  ;;  %v6067_v53 = vpop.permute.xlu1 %1425 }
 0x15e   : > { %v4372_v61 = vcombine.low %v2251_v32, %v2261_v9  ;;  %v591_v36 = vrot.slane %v590_v56, 4  ;;  %v603_v33 = vrot.slane %v601_v45, 5  ;;  %v611_v5 = vshrl.u32 %v6033_v2, 16  ;;  %v4179_v45 = vld [vmem:[%s4910_s19 + $0xa4] sm:$0x1] }
 0x15f   : > { %v609_v52 = vrot.slane %v607_v14, 5  ;;  %v617_v0 = vshll.u32 %v279_v51, 16  ;;  %v586_v7 = vsel %vm5017_vm5, %v581_v1, %v585_v23  ;;  %v3484_v3 = vsel %vm1506_vm7, %v3450_v43, %v5923_v17  ;;  %v6076_v43 = vpop.permute.xlu0 %1237  ;;  %v4180_v1 = vld [vmem:[%s4910_s19 + $0xb0] sm:$0x1] }
 0x160   : > { %v3447_v59 = vsel %vm1457_vm6, %v4372_v61, %v5868_v22  ;;  %v596_v54 = vsel %vm5017_vm5, %v591_v36, %v595_v4  ;;  %v604_v25 = vor.u32 %v603_v33, %v600_v10  ;;  %v613_v50 = vrot.slane %v611_v5, 4 }
 0x161   : > { %v4211_v57 = vcombine.low %v586_v7, %v596_v54  ;;  %v619_v8 = vrot.slane %v617_v0, 5  ;;  %v3482_v22 = vsel %vm1506_vm7, %v3447_v59, %v5886_v16  ;;  %v1010_v24 = vshrl.u32 %v4159_v31, 16  ;;  %v6089_v7 = vpop.permute.xlu1 %1427 }
 0x162   : > { %v1013_v13 = vshll.u32 %v4159_v31, 16  ;;  %v1019_v35 = vshll.u32 %v4160_v21, 16  ;;  %v605_v17 = vrot.slane %v604_v25, 4  ;;  %v614_v34 = vor.u32 %v613_v50, %v609_v52 }
 0x163   : > { %1257 = vrot.lane.b32.xlu0 %v4211_v57, %s4796_s28  ;;  %v1023_v23 = vshrl.u32 %v4160_v21, 16  ;;  %v4227_v63 = vcombine.low %v4159_v31, %v4160_v21  ;;  %v1012_v62 = vrot.slane %v1010_v24, 4  ;;  %v1034_v6 = vshrl.u32 %v6061_v27, 16 }
 0x164   : > { %v1015_v30 = vrot.slane %v1013_v13, 5  ;;  %v1021_v4 = vrot.slane %v1019_v35, 5  ;;  %v610_v16 = vsel %vm5017_vm5, %v605_v17, %v609_v52  ;;  %v615_v56 = vrot.slane %v614_v34, 4  ;;  %v1944_v52 = vld [vmem:[%s4910_s19 + $0xa8] sm:$0xf]  ;;  %v6093_v35 = vpop.permute.xlu0 %1349 }
 0x165   : > { %v1025_v51 = vrot.slane %v1023_v23, 4  ;;  %v1037_v60 = vshll.u32 %v6061_v27, 16  ;;  %v1036_v32 = vrot.slane %v1034_v6, 4  ;;  %v1043_v9 = vshll.u32 %v4162_v55, 16 }
 0x166   : > { %v1047_v14 = vshrl.u32 %v4162_v55, 16  ;;  %v4228_v61 = vcombine.low %v6061_v27, %v4162_v55  ;;  %v620_v36 = vsel %vm5017_vm5, %v615_v56, %v619_v8  ;;  %v3516_v31 = vsel %vm1539_vm8, %v3484_v3, %v5944_v15  ;;  %v6098_v55 = vld [vmem:[%s4910_s19 + $0xa8] sm:$0xf] }
 0x167   : > { %1369 = vrot.lane.b32.xlu0 %v4227_v63, %s4797_s5  ;;  %v1039_v10 = vrot.slane %v1037_v60, 5  ;;  %v3514_v33 = vsel %vm1539_vm8, %v3482_v22, %v5920_v49  ;;  %v4212_v5 = vcombine.low %v610_v16, %v620_v36  ;;  %v1045_v0 = vrot.slane %v1043_v9, 5  ;;  %v4689_v16 = vld [vmem:[%s4910_s19 + $0xac] sm:$0xf] }
 0x168   : > { %v1049_v21 = vrot.slane %v1047_v14, 4  ;;  %v1016_v59 = vor.u32 %v1015_v30, %v1012_v62  ;;  %4545 = vmatprep.mubr.msk.bf16.mxu1 %vm1580_vm9, %v3514_v33  ;;  %v1026_v54 = vor.u32 %v1025_v51, %v1021_v4  ;;  %v1029_v57 = vshll.u32 %v4179_v45, 16  ;;  %v6100_v62 = vpop.permute.xlu1 %1239  ;;  %v6675_v51 = vld [vmem:[#allocation11_spill] sm:$0xff] }
 0x169   : > { %v1040_v25 = vor.u32 %v1039_v10, %v1036_v32  ;;  %v1053_v50 = vshll.u32 %v4180_v1, 16  ;;  %4546 = vmatmul.mubr.msk.bf16.gmra.mxu1 %vm1580_vm9, %v3516_v31  ;;  %1259 = vrot.lane.b32.xlu1 %v4212_v5, %s4796_s28  ;;  %v2287_v3 = vshrl.u32 %v1944_v52, 16  ;;  %v2290_v8 = vshll.u32 %v1944_v52, 16  ;;  %v6110_v45 = vld [vmem:[%s4910_s19 + $0xac] sm:$0xf]  ;;  %v6677_v1 = vld [vmem:[#allocation12_spill] sm:$0xff] }
 0x16a   : > { %v1017_v15 = vrot.slane %v1016_v59, 4  ;;  %v1050_v49 = vor.u32 %v1049_v21, %v1045_v0  ;;  %v1027_v27 = vrot.slane %v1026_v54, 4  ;;  %v1031_v22 = vrot.slane %v1029_v57, 5  ;;  %v280_v31 = vld [vmem:[%s4910_s19 + $0xb0] sm:$0x1] }
 0x16b   : > { %v1041_v24 = vrot.slane %v1040_v25, 4  ;;  %v1055_v13 = vrot.slane %v1053_v50, 5  ;;  %v2289_v23 = vrot.slane %v2287_v3, 4  ;;  %v2292_v63 = vrot.slane %v2290_v8, 5  ;;  %v4690_v5 = vld [vmem:[%s4910_s19] sm:$0xf] }
 0x16c   : > { %v1022_v17 = vsel %vm5017_vm5, %v1017_v15, %v1021_v4  ;;  %v1051_v34 = vrot.slane %v1050_v49, 4  ;;  %v1032_v30 = vsel %vm5017_vm5, %v1027_v27, %v1031_v22  ;;  %v2296_v56 = vshll.u32 %v4689_v16, 16  ;;  %v6126_v50 = vld [vmem:[%s4910_s19 + $0xb4] sm:$0xf]  ;;  %v6133_v27 = vld [vmem:[%s4910_s19 + $0xb8] sm:$0xf]  ;;  %v6135_v22 = vpop.permute.xlu0 %1429 }
 0x16d   : > { %v1046_v6 = vsel %vm5017_vm5, %v1041_v24, %v1045_v0  ;;  %v6676_v4 = vshrl.u32 %v6675_v51, 16  ;;  %1371 = vrot.lane.b32.xlu1 %v4228_v61, %s4797_s5  ;;  %v4243_v32 = vcombine.low %v1022_v17, %v1032_v30  ;;  %v2293_v14 = vor.u32 %v2292_v63, %v2289_v23  ;;  %v4691_v0 = vld [vmem:[%s4910_s19 + $0x4] sm:$0xf]  ;;  %v281_v23 = vld [vmem:[%s4910_s19 + $0xbc] sm:$0x1]  ;;  %v6141_v63 = vpop.permute.xlu1 %1351 }
 0x16e   : > { %v1056_v9 = vsel %vm5017_vm5, %v1051_v34, %v1055_v13  ;;  %v6678_v36 = vshll.u32 %v6677_v1, 16  ;;  %v2298_v52 = vrot.slane %v2296_v56, 5  ;;  %v4183_v21 = vcombine.low %v4690_v5, %v4691_v0 }
 0x16f   : > { %v2302_v60 = vrot.slane %v6676_v4, 4  ;;  %v4244_v33 = vcombine.low %v1046_v6, %v1056_v9  ;;  %v622_v59 = vshrl.u32 %v6098_v55, 16  ;;  %1449 = vrot.lane.b32.xlu0 %v4243_v32, %s4795_s27  ;;  %v2294_v61 = vrot.slane %v2293_v14, 4  ;;  %v1947_v32 = vld [vmem:[%s4910_s19 + $0xb4] sm:$0xf] }
 0x170   : > { %v2308_v10 = vrot.slane %v6678_v36, 5  ;;  %v625_v54 = vshll.u32 %v6098_v55, 16  ;;  %v631_v57 = vshll.u32 %v6110_v45, 16  ;;  %v635_v25 = vshrl.u32 %v6110_v45, 16 }
 0x171   : > { %v2303_v15 = vor.u32 %v2302_v60, %v2298_v52  ;;  %v6130_v49 = vsel %vm1457_vm6, %v4183_v21, %v5967_v48  ;;  %v624_v3 = vrot.slane %v622_v59, 4  ;;  %v641_v8 = vshll.u32 %v280_v31, 16  ;;  %1451 = vrot.lane.b32.xlu1 %v4244_v33, %s4795_s27 }
 0x172   : > { %v2299_v24 = vsel %vm5017_vm5, %v2294_v61, %v2298_v52  ;;  %v627_v13 = vrot.slane %v625_v54, 5  ;;  %v633_v17 = vrot.slane %v631_v57, 5  ;;  %v637_v34 = vrot.slane %v635_v25, 4  ;;  %v6150_v54 = vpop.permute.xlu0 %1241 }
 0x173   : > { %v2304_v48 = vrot.slane %v2303_v15, 4  ;;  %v643_v30 = vrot.slane %v641_v8, 5  ;;  %v646_v6 = vshrl.u32 %v6126_v50, 16  ;;  %v649_v16 = vshll.u32 %v6126_v50, 16  ;;  %v6159_v8 = vpop.permute.xlu1 %1431 }
 0x174   : > { %v628_v56 = vor.u32 %v627_v13, %v624_v3  ;;  %v638_v51 = vor.u32 %v637_v34, %v633_v17  ;;  %v655_v4 = vshll.u32 %v6133_v27, 16  ;;  %v659_v60 = vshrl.u32 %v6133_v27, 16  ;;  %v4163_v3 = vld [vmem:[%s4910_s19 + $0xb4] sm:$0xf] }
 0x175   : > { %v2309_v9 = vsel %vm5017_vm5, %v2304_v48, %v2308_v10  ;;  %v648_v14 = vrot.slane %v646_v6, 4  ;;  %v651_v1 = vrot.slane %v649_v16, 5  ;;  %v665_v36 = vshll.u32 %v281_v23, 16  ;;  %v4164_v48 = vld [vmem:[%s4910_s19 + $0xb8] sm:$0xf] }
 0x176   : > { %v4374_v31 = vcombine.low %v2299_v24, %v2309_v9  ;;  %v629_v33 = vrot.slane %v628_v56, 4  ;;  %v639_v52 = vrot.slane %v638_v51, 4  ;;  %v657_v5 = vrot.slane %v655_v4, 5  ;;  %v4692_v16 = vld [vmem:[%s4910_s19 + $0xb8] sm:$0xf] }
 0x177   : > { %v652_v0 = vor.u32 %v651_v1, %v648_v14  ;;  %v661_v21 = vrot.slane %v659_v60, 4  ;;  %v667_v59 = vrot.slane %v665_v36, 5  ;;  %v2311_v61 = vshrl.u32 %v1947_v32, 16 }
 0x178   : > { %v3453_v57 = vsel %vm1457_vm6, %v4374_v31, %v5940_v12  ;;  %v634_v10 = vsel %vm5017_vm5, %v629_v33, %v633_v17  ;;  %v644_v25 = vsel %vm5017_vm5, %v639_v52, %v643_v30  ;;  %v2314_v15 = vshll.u32 %v1947_v32, 16  ;;  %v6679_v12 = vld [vmem:[#allocation13_spill] sm:$0xff]  ;;  %v4165_v33 = vld [vmem:[%s4910_s19 + $0xc0] sm:$0xf] }
 0x179   : > { %v4213_v24 = vcombine.low %v634_v10, %v644_v25  ;;  %v653_v13 = vrot.slane %v652_v0, 4  ;;  %v662_v34 = vor.u32 %v661_v21, %v657_v5  ;;  %v2313_v23 = vrot.slane %v2311_v61, 4  ;;  %v4166_v21 = vld [vmem:[%s4910_s19 + $0xc4] sm:$0xf]  ;;  %v6176_v61 = vpop.permute.xlu0 %1353 }
 0x17a   : > { %v2316_v6 = vrot.slane %v2314_v15, 5  ;;  %v2320_v56 = vshll.u32 %v4692_v16, 16  ;;  %v6680_v51 = vshrl.u32 %v6679_v12, 16  ;;  %v2332_v17 = vrot.slane %v2330_v40, 5  ;;  %v4693_v12 = vld [vmem:[%s4910_s19 + $0xc] sm:$0xf] }
 0x17b   : > { %1261 = vrot.lane.b32.xlu0 %v4213_v24, %s4796_s28  ;;  %v658_v30 = vsel %vm5017_vm5, %v653_v13, %v657_v5  ;;  %v663_v60 = vrot.slane %v662_v34, 4  ;;  %v3486_v32 = vsel %vm1506_vm7, %v3453_v57, %v5986_v26  ;;  %v1058_v9 = vshrl.u32 %v4163_v3, 16  ;;  %v6178_v57 = vpop.permute.xlu1 %1243 }
 0x17c   : > { %v2326_v4 = vrot.slane %v6680_v51, 4  ;;  %v2317_v14 = vor.u32 %v2316_v6, %v2313_v23  ;;  %v2322_v1 = vrot.slane %v2320_v56, 5  ;;  %v1061_v36 = vshll.u32 %v4163_v3, 16  ;;  %v4694_v51 = vld [vmem:[%s4910_s19 + $0x10] sm:$0xf] }
 0x17d   : > { %v1067_v31 = vshll.u32 %v4164_v48, 16  ;;  %v668_v29 = vsel %vm5017_vm5, %v663_v60, %v667_v59  ;;  %v1060_v52 = vrot.slane %v1058_v9, 4  ;;  %v1071_v40 = vshrl.u32 %v4164_v48, 16  ;;  %v4182_v60 = vld [vmem:[%s4910_s19 + $0xc8] sm:$0x1] }
 0x17e   : > { %v4229_v0 = vcombine.low %v4163_v3, %v4164_v48  ;;  %v4214_v5 = vcombine.low %v658_v30, %v668_v29  ;;  %v2318_v10 = vrot.slane %v2317_v14, 4  ;;  %v2327_v25 = vor.u32 %v2326_v4, %v2322_v1  ;;  %v4181_v30 = vld [vmem:[%s4910_s19 + $0xbc] sm:$0x1] }
 0x17f   : > { %v1063_v26 = vrot.slane %v1061_v36, 5  ;;  %v1069_v15 = vrot.slane %v1067_v31, 5  ;;  %v1073_v24 = vrot.slane %v1071_v40, 4  ;;  %v1082_v59 = vshrl.u32 %v4165_v33, 16 }
 0x180   : > { %1373 = vrot.lane.b32.xlu0 %v4229_v0, %s4797_s5  ;;  %v1085_v13 = vshll.u32 %v4165_v33, 16  ;;  %1263 = vrot.lane.b32.xlu1 %v4214_v5, %s4796_s28  ;;  %v2323_v3 = vsel %vm5017_vm5, %v2318_v10, %v2322_v1  ;;  %v2328_v34 = vrot.slane %v2327_v25, 4  ;;  %v1091_v23 = vshll.u32 %v4166_v21, 16  ;;  %v1434_v0 = vpop.permute.xlu0 %1433 }
 0x181   : > { %v1095_v48 = vshrl.u32 %v4166_v21, 16  ;;  %v1084_v6 = vrot.slane %v1082_v59, 4  ;;  %v4230_v56 = vcombine.low %v4165_v33, %v4166_v21  ;;  %v4184_v4 = vcombine.low %v4693_v12, %v4694_v51  ;;  %v4698_v51 = vld [vmem:[%s4910_s19 + $0x28] sm:$0xf] }
 0x182   : > { %v1087_v16 = vrot.slane %v1085_v13, 5  ;;  %v2333_v9 = vsel %vm5017_vm5, %v2328_v34, %v2332_v17  ;;  %v1093_v14 = vrot.slane %v1091_v23, 5  ;;  %v1508_v1 = vsel %vm1506_vm7, %v6130_v49, %v6018_v41  ;;  %v6196_v17 = vpop.permute.xlu1 %1355 }
 0x183   : > { %v1097_v36 = vrot.slane %v1095_v48, 4  ;;  %v4375_v31 = vcombine.low %v2323_v3, %v2333_v9  ;;  %v1463_v29 = vsel %vm1457_vm6, %v4184_v4, %v5984_v42  ;;  %v1064_v40 = vor.u32 %v1063_v26, %v1060_v52 }
 0x184   : > { %v1074_v33 = vor.u32 %v1073_v24, %v1069_v15  ;;  %1375 = vrot.lane.b32.xlu1 %v4230_v56, %s4797_s5  ;;  %v1077_v21 = vshll.u32 %v4181_v30, 16  ;;  %v1088_v5 = vor.u32 %v1087_v16, %v1084_v6  ;;  %v1101_v25 = vshll.u32 %v4182_v60, 16  ;;  %v4695_v6 = vld [vmem:[%s4910_s19 + $0x18] sm:$0xf]  ;;  %v4696_v16 = vld [vmem:[%s4910_s19 + $0x1c] sm:$0xf]  ;;  %v1246_v12 = vpop.permute.xlu0 %1245 }
 0x185   : > { %v1098_v10 = vor.u32 %v1097_v36, %v1093_v14  ;;  %v3456_v59 = vsel %vm1457_vm6, %v4375_v31, %v5963_v19  ;;  %v1065_v13 = vrot.slane %v1064_v40, 4  ;;  %v3518_v49 = vsel %vm1539_vm8, %v3486_v32, %v6040_v37  ;;  %v4699_v30 = vld [vmem:[%s4910_s19 + $0x30] sm:$0xf]  ;;  %v4701_v40 = vld [vmem:[%s4910_s19 + $0x3c] sm:$0xf] }
 0x186   : > { %v1075_v41 = vrot.slane %v1074_v33, 4  ;;  %v1079_v42 = vrot.slane %v1077_v21, 5  ;;  %v1089_v52 = vrot.slane %v1088_v5, 4  ;;  %v1103_v24 = vrot.slane %v1101_v25, 5  ;;  %4549 = vmatprep.mubr.msk.bf16.mxu1 %vm1580_vm9, %v3518_v49  ;;  %v1436_v9 = vpop.permute.xlu1 %1435  ;;  %v4702_v33 = vld [vmem:[%s4910_s19 + $0x40] sm:$0xf] }
 0x187   : > { %v1099_v26 = vrot.slane %v1098_v10, 4  ;;  %v1070_v3 = vsel %vm5017_vm5, %v1065_v13, %v1069_v15  ;;  %v3488_v34 = vsel %vm1506_vm7, %v3456_v59, %v6011_v18  ;;  %v1510_v19 = vsel %vm1506_vm7, %v1463_v29, %v6035_v44  ;;  %v4705_v49 = vld [vmem:[%s4910_s19 + $0x54] sm:$0xf] }
 0x188   : > { %v1541_v37 = vsel %vm1539_vm8, %v1508_v1, %v6067_v53  ;;  %v1080_v32 = vsel %vm5017_vm5, %v1075_v41, %v1079_v42  ;;  %v1094_v23 = vsel %vm5017_vm5, %v1089_v52, %v1093_v14  ;;  %v3520_v18 = vsel %vm1539_vm8, %v3488_v34, %v6063_v38  ;;  %v4700_v38 = vld [vmem:[%s4910_s19 + $0x34] sm:$0xf]  ;;  %v4706_v42 = vld [vmem:[%s4910_s19 + $0x58] sm:$0xf] }
 0x189   : > { %v1104_v15 = vsel %vm5017_vm5, %v1099_v26, %v1103_v24  ;;  %4487 = vmatprep.mubr.msk.bf16.mxu0 %vm1580_vm9, %v1541_v37  ;;  %v4245_v44 = vcombine.low %v1070_v3, %v1080_v32  ;;  %v1543_v53 = vsel %vm1539_vm8, %v1510_v19, %v6089_v7  ;;  %4550 = vmatmul.mubr.msk.bf16.gmra.mxu1 %vm1580_vm9, %v3520_v18 }
 0x18a   : > { %v4246_v48 = vcombine.low %v1094_v23, %v1104_v15  ;;  %v4185_v56 = vcombine.low %v4695_v6, %v4696_v16  ;;  %4488 = vmatmul.mubr.msk.bf16.vlgmr.msra.gmra.mxu0 %vm1580_vm9, %v1543_v53  ;;  %v4186_v4 = vcombine.low %v4697_v46, %v4698_v51  ;;  %v4187_v60 = vcombine.low %v4699_v30, %v4700_v38  ;;  %v6282_v15 = vld [vmem:[%s6631_s3] ss:$0 sm:$0xff]  ;;  %v4709_v16 = vld [vmem:[%s4910_s19 + $0x6c] sm:$0xf] }
 0x18b   : > { %1453 = vrot.lane.b32.xlu0 %v4245_v44, %s4795_s27  ;;  %v4188_v21 = vcombine.low %v4701_v40, %v4702_v33  ;;  %v4195_v25 = vcombine.low %v6004_v58, %v6009_v20  ;;  %v4197_v59 = vcombine.low %v6098_v55, %v6110_v45  ;;  %v4198_v41 = vcombine.low %v6126_v50, %v6133_v27  ;;  %v4707_v44 = vld [vmem:[%s4910_s19 + $0x60] sm:$0xf] }
 0x18c   : > { %1455 = vrot.lane.b32.xlu1 %v4246_v48, %s4795_s27  ;;  %v1466_v7 = vsel %vm1457_vm6, %v4185_v56, %v6076_v43  ;;  %v1469_v14 = vsel %vm1457_vm6, %v4186_v4, %v6100_v62  ;;  %v1472_v1 = vsel %vm1457_vm6, %v4187_v60, %v6150_v54  ;;  %v4703_v62 = vld [vmem:[%s4910_s19 + $0x48] sm:$0xf]  ;;  %v4190_v52 = vcombine.low %v4705_v49, %v4706_v42  ;;  %v4708_v48 = vld [vmem:[%s4910_s19 + $0x64] sm:$0xf]  ;;  %v4710_v56 = vld [vmem:[%s4910_s19 + $0x70] sm:$0xf] }
 0x18d   : > { %v1512_v36 = vsel %vm1506_vm7, %v1466_v7, %v6093_v35  ;;  %v1514_v31 = vsel %vm1506_vm7, %v1469_v14, %v6141_v63  ;;  %v1516_v43 = vsel %vm1506_vm7, %v1472_v1, %v6176_v61  ;;  %v4704_v35 = vld [vmem:[%s4910_s19 + $0x4c] sm:$0xf]  ;;  %v1358_v63 = vpop.permute.xlu0 %1357  ;;  %v4196_v61 = vcombine.low %v6028_v11, %v6033_v2 }
 0x18e   : > { %v1545_v29 = vsel %vm1539_vm8, %v1512_v36, %v6135_v22  ;;  %v4189_v5 = vcombine.low %v4703_v62, %v4704_v35  ;;  %v1547_v54 = vsel %vm1539_vm8, %v1514_v31, %v6159_v8  ;;  %v1549_v10 = vsel %vm1539_vm8, %v1516_v43, %v1434_v0  ;;  %v1248_v22 = vpop.permute.xlu1 %1247 }
 0x18f   : > { %4491 = vmatprep.mubr.msk.bf16.mxu0 %vm1580_vm9, %v1545_v29  ;;  %v1475_v13 = vsel %vm1457_vm6, %v4188_v21, %v6178_v57  ;;  %v1481_v19 = vsel %vm1457_vm6, %v4190_v52, %v1248_v22  ;;  %v4191_v53 = vcombine.low %v4707_v44, %v4708_v48 }
 0x190   : > { %v1478_v8 = vsel %vm1457_vm6, %v4189_v5, %v1246_v12  ;;  %v1518_v0 = vsel %vm1506_vm7, %v1475_v13, %v6196_v17  ;;  %v4192_v12 = vcombine.low %v4709_v16, %v4710_v56 }
 0x191   : > { %v1520_v26 = vsel %vm1506_vm7, %v1478_v8, %v1358_v63  ;;  %v1438_v57 = vpop.permute.xlu0 %1437  ;;  %v1551_v3 = vsel %vm1539_vm8, %v1518_v0, %v1436_v9 }
 0x192   : > { %4492 = vmatmul.mubr.msk.bf16.gmra.mxu0 %vm1580_vm9, %v1547_v54  ;;  %v1360_v24 = vpop.permute.xlu1 %1359  ;;  %v1553_v34 = vsel %vm1539_vm8, %v1520_v26, %v1438_v57 }
 0x193   : > { %4495 = vmatprep.mubr.msk.bf16.mxu0 %vm1580_vm9, %v1549_v10  ;;  %v1522_v17 = vsel %vm1506_vm7, %v1481_v19, %v1360_v24 }
 0x196   : > { %v1440_v37 = vpop.permute.xlu1 %1439 }
 0x197   : > { %v1555_v32 = vsel %vm1539_vm8, %v1522_v17, %v1440_v37 }
 0x19a   : > { %4496 = vmatmul.mubr.msk.bf16.gmra.mxu0 %vm1580_vm9, %v1551_v3 }
 0x19b   : > { %4499 = vmatprep.mubr.msk.bf16.mxu0 %vm1580_vm9, %v1553_v34 }
 0x19d   : > { %v4523_v18 = vpop.f32.mrf.mxu1 }
 0x19e   : > { %v1250_v23 = vpop.permute.xlu0 %1249  ;;  %v3605_v6 = vadd.f32 %v4523_v18, %v6282_v15 }
 0x19f   : > { %v3596_v46 = vpop.f32.mrf.mxu1  ;;  %v1484_v9 = vsel %vm1457_vm6, %v4191_v53, %v1250_v23 }
 0x1a0   : > { %v3757_v4 = vmul.f32 0.2, %v3605_v6  ;;  %v3597_v30 = vadd.f32 %v6282_v15, %v3596_v46  ;;  %vm3725_vm10 = vcmp.ge.f32.partialorder %v3605_v6, 0.0 }
 0x1a1   : > { %v4524_v60 = vpop.f32.mrf.mxu1 }
 0x1a2   : > { %4500 = vmatmul.mubr.msk.bf16.gmra.mxu0 %vm1580_vm9, %v1555_v32  ;;  %v1362_v51 = vpop.permute.xlu0 %1361  ;;  %v3608_v7 = vadd.f32 %v4524_v60, %v6282_v15  ;;  %v3755_v36 = vmul.f32 0.2, %v3597_v30  ;;  %v3789_v31 = vsel %vm3725_vm10, %v3605_v6, %v3757_v4  ;;  %vm3723_vm11 = vcmp.ge.f32.partialorder %v3597_v30, 0.0  ;;  %v4711_v32 = vld [vmem:[%s4910_s19 + $0x78] sm:$0xf]  ;;  %s3981_s19 = scalar_lea.sflag [#allocation5], %s206_s16 }
 0x1a3   : > { %v3599_v1 = vpop.f32.mrf.mxu1  ;;  %3855 = vrot.lane.b32.xlu0 %v3789_v31, %s4797_s5  ;;  %v1524_v33 = vsel %vm1506_vm7, %v1484_v9, %v1362_v51  ;;  %v4193_v23 = vcombine.low %v4711_v32, %v5904_v28  ;;  %v4194_v6 = vcombine.low %v5918_v47, %v5928_v39 }
 0x1a4   : > { %v1252_v38 = vpop.permute.xlu1 %1251  ;;  %v3758_v29 = vmul.f32 0.2, %v3608_v7  ;;  %v3600_v40 = vadd.f32 %v6282_v15, %v3599_v1  ;;  %vm3726_vm12 = vcmp.ge.f32.partialorder %v3608_v7, 0.0  ;;  %v3787_v54 = vsel %vm3723_vm11, %v3597_v30, %v3755_v36 }
 0x1a5   : > { %v1487_v14 = vsel %vm1457_vm6, %v4192_v12, %v1252_v38 }
 0x1a6   : > { %v3756_v43 = vmul.f32 0.2, %v3600_v40  ;;  %v3790_v62 = vsel %vm3726_vm12, %v3608_v7, %v3758_v29  ;;  %vm3724_vm13 = vcmp.ge.f32.partialorder %v3600_v40, 0.0 }
 0x1a7   : > { %3857 = vrot.lane.b32.xlu1 %v3790_v62, %s4797_s5  ;;  %3851 = vrot.lane.b32.xlu0 %v3787_v54, %s4797_s5 }
 0x1a8   : > { %v1364_v21 = vpop.permute.xlu1 %1363  ;;  %v3788_v13 = vsel %vm3724_vm13, %v3600_v40, %v3756_v43 }
 0x1a9   : > { %v1526_v35 = vsel %vm1506_vm7, %v1487_v14, %v1364_v21 }
 0x1aa   : > { %v1442_v5 = vpop.permute.xlu0 %1441 }
 0x1ab   : > { %v1557_v63 = vsel %vm1539_vm8, %v1524_v33, %v1442_v5  ;;  %3853 = vrot.lane.b32.xlu1 %v3788_v13, %s4797_s5 }
 0x1ac   : > { %v1444_v10 = vpop.permute.xlu1 %1443  ;;  %4503 = vmatprep.mubr.msk.bf16.mxu0 %vm1580_vm9, %v1557_v63 }
 0x1ad   : > { %v1559_v22 = vsel %vm1539_vm8, %v1526_v35, %v1444_v10 }
 0x1ae   : > { %4504 = vmatmul.mubr.msk.bf16.gmra.mxu0 %vm1580_vm9, %v1559_v22 }
 0x1b2   : > { %v4527_v8 = vpop.f32.mrf.mxu1 }
 0x1b3   : > { %v3621_v0 = vadd.f32 %v4527_v8, %v6282_v15 }
 0x1b4   : > { %v3612_v49 = vpop.f32.mrf.mxu1 }
 0x1b5   : > { %vm3729_vm14 = vcmp.ge.f32.partialorder %v3621_v0, 0.0  ;;  %v3761_v42 = vmul.f32 0.2, %v3621_v0  ;;  %v3613_v52 = vadd.f32 %v6282_v15, %v3612_v49 }
 0x1b6   : > { %v4528_v26 = vpop.f32.mrf.mxu1 }
 0x1b7   : > { %v3759_v24 = vmul.f32 0.2, %v3613_v52  ;;  %v3624_v3 = vadd.f32 %v4528_v26, %v6282_v15  ;;  %v3793_v34 = vsel %vm3729_vm14, %v3621_v0, %v3761_v42  ;;  %vm3727_vm15 = vcmp.ge.f32.partialorder %v3613_v52, 0.0 }
 0x1b8   : > { %v3615_v19 = vpop.f32.mrf.mxu1  ;;  %3863 = vrot.lane.b32.xlu0 %v3793_v34, %s4797_s5 }
 0x1b9   : > { %vm3730_vm0 = vcmp.ge.f32.partialorder %v3624_v3, 0.0  ;;  %v3762_v17 = vmul.f32 0.2, %v3624_v3  ;;  %v3616_v37 = vadd.f32 %v6282_v15, %v3615_v19  ;;  %v3791_v48 = vsel %vm3727_vm15, %v3613_v52, %v3759_v24 }
 0x1ba   : > { %v1254_v57 = vpop.permute.xlu0 %1253 }
 0x1bb   : > { %v3760_v18 = vmul.f32 0.2, %v3616_v37  ;;  %v4531_v44 = vpop.f32.mrf.mxu1  ;;  %v3794_v53 = vsel %vm3730_vm0, %v3624_v3, %v3762_v17  ;;  %vm3728_vm1 = vcmp.ge.f32.partialorder %v3616_v37, 0.0  ;;  %v1490_v51 = vsel %vm1457_vm6, %v4193_v23, %v1254_v57 }
 0x1bc   : > { %v3637_v56 = vadd.f32 %v4531_v44, %v6282_v15  ;;  %3859 = vrot.lane.b32.xlu0 %v3791_v48, %s4797_s5  ;;  %3865 = vrot.lane.b32.xlu1 %v3794_v53, %s4797_s5 }
 0x1bd   : > { %v3628_v46 = vpop.f32.mrf.mxu1  ;;  %v3792_v38 = vsel %vm3728_vm1, %v3616_v37, %v3760_v18 }
 0x1be   : > { %v1366_v16 = vpop.permute.xlu0 %1365  ;;  %vm3733_vm2 = vcmp.ge.f32.partialorder %v3637_v56, 0.0  ;;  %v3765_v28 = vmul.f32 0.2, %v3637_v56  ;;  %v3629_v4 = vadd.f32 %v6282_v15, %v3628_v46 }
 0x1bf   : > { %v4532_v30 = vpop.f32.mrf.mxu1  ;;  %v1528_v7 = vsel %vm1506_vm7, %v1490_v51, %v1366_v16 }
 0x1c0   : > { %v1256_v12 = vpop.permute.xlu1 %1255  ;;  %v3763_v39 = vmul.f32 0.2, %v3629_v4  ;;  %v3640_v60 = vadd.f32 %v4532_v30, %v6282_v15  ;;  %v3797_v9 = vsel %vm3733_vm2, %v3637_v56, %v3765_v28  ;;  %3861 = vrot.lane.b32.xlu1 %v3792_v38, %s4797_s5  ;;  %vm3731_vm3 = vcmp.ge.f32.partialorder %v3629_v4, 0.0 }
 0x1c1   : > { %v1493_v47 = vsel %vm1457_vm6, %v4194_v6, %v1256_v12  ;;  %v3631_v36 = vpop.f32.mrf.mxu1  ;;  %3871 = vrot.lane.b32.xlu0 %v3797_v9, %s4797_s5 }
 0x1c2   : > { %vm3734_vm4 = vcmp.ge.f32.partialorder %v3640_v60, 0.0  ;;  %v3766_v1 = vmul.f32 0.2, %v3640_v60  ;;  %v3632_v31 = vadd.f32 %v6282_v15, %v3631_v36  ;;  %v3795_v21 = vsel %vm3731_vm3, %v3629_v4, %v3763_v39 }
 0x1c4   : > { %v1368_v14 = vpop.permute.xlu1 %1367  ;;  %v3798_v43 = vsel %vm3734_vm4, %v3640_v60, %v3766_v1  ;;  %v3764_v35 = vmul.f32 0.2, %v3632_v31  ;;  %vm3732_vm5 = vcmp.ge.f32.partialorder %v3632_v31, 0.0 }
 0x1c5   : > { %v1530_v29 = vsel %vm1506_vm7, %v1493_v47, %v1368_v14  ;;  %3867 = vrot.lane.b32.xlu0 %v3795_v21, %s4797_s5  ;;  %3873 = vrot.lane.b32.xlu1 %v3798_v43, %s4797_s5 }
 0x1c6   : > { %v1446_v40 = vpop.permute.xlu0 %1445  ;;  %v3796_v54 = vsel %vm3732_vm5, %v3632_v31, %v3764_v35 }
 0x1c7   : > { %v1561_v33 = vsel %vm1539_vm8, %v1528_v7, %v1446_v40 }
 0x1c8   : > { %v1448_v62 = vpop.permute.xlu1 %1447  ;;  %4507 = vmatprep.mubr.msk.bf16.mxu0 %vm1580_vm9, %v1561_v33 }
 0x1c9   : > { %v1563_v5 = vsel %vm1539_vm8, %v1530_v29, %v1448_v62  ;;  %3869 = vrot.lane.b32.xlu1 %v3796_v54, %s4797_s5 }
 0x1ca   : > { %4508 = vmatmul.mubr.msk.bf16.gmra.mxu0 %vm1580_vm9, %v1563_v5 }
 0x1d5   : > { %v1258_v63 = vpop.permute.xlu0 %1257 }
 0x1d6   : > { %v4535_v10 = vpop.f32.mrf.mxu1  ;;  %v1496_v49 = vsel %vm1457_vm6, %v4195_v25, %v1258_v63 }
 0x1d7   : > { %v3653_v13 = vadd.f32 %v4535_v10, %v6282_v15 }
 0x1d8   : > { %v3644_v0 = vpop.f32.mrf.mxu1 }
 0x1d9   : > { %v1370_v22 = vpop.permute.xlu0 %1369  ;;  %vm3737_vm10 = vcmp.ge.f32.partialorder %v3653_v13, 0.0  ;;  %v3769_v42 = vmul.f32 0.2, %v3653_v13  ;;  %v3645_v52 = vadd.f32 %v6282_v15, %v3644_v0 }
 0x1da   : > { %v4536_v26 = vpop.f32.mrf.mxu1  ;;  %v1532_v19 = vsel %vm1506_vm7, %v1496_v49, %v1370_v22 }
 0x1db   : > { %v1260_v8 = vpop.permute.xlu1 %1259  ;;  %v3767_v24 = vmul.f32 0.2, %v3645_v52  ;;  %v3656_v3 = vadd.f32 %v4536_v26, %v6282_v15  ;;  %v3801_v34 = vsel %vm3737_vm10, %v3653_v13, %v3769_v42  ;;  %vm3735_vm11 = vcmp.ge.f32.partialorder %v3645_v52, 0.0 }
 0x1dc   : > { %v1499_v57 = vsel %vm1457_vm6, %v4196_v61, %v1260_v8  ;;  %v3647_v58 = vpop.f32.mrf.mxu1  ;;  %3879 = vrot.lane.b32.xlu0 %v3801_v34, %s4797_s5 }
 0x1dd   : > { %vm3738_vm12 = vcmp.ge.f32.partialorder %v3656_v3, 0.0  ;;  %v3770_v20 = vmul.f32 0.2, %v3656_v3  ;;  %v3648_v25 = vadd.f32 %v6282_v15, %v3647_v58  ;;  %v3799_v61 = vsel %vm3735_vm11, %v3645_v52, %v3767_v24 }
 0x1df   : > { %v1372_v17 = vpop.permute.xlu1 %1371  ;;  %v3802_v32 = vsel %vm3738_vm12, %v3656_v3, %v3770_v20  ;;  %v3768_v18 = vmul.f32 0.2, %v3648_v25  ;;  %vm3736_vm13 = vcmp.ge.f32.partialorder %v3648_v25, 0.0 }
 0x1e0   : > { %v1534_v37 = vsel %vm1506_vm7, %v1499_v57, %v1372_v17  ;;  %3875 = vrot.lane.b32.xlu0 %v3799_v61, %s4797_s5  ;;  %3881 = vrot.lane.b32.xlu1 %v3802_v32, %s4797_s5 }
 0x1e1   : > { %v1450_v11 = vpop.permute.xlu0 %1449  ;;  %v3800_v48 = vsel %vm3736_vm13, %v3648_v25, %v3768_v18 }
 0x1e2   : > { %v1565_v2 = vsel %vm1539_vm8, %v1532_v19, %v1450_v11 }
 0x1e3   : > { %v1452_v23 = vpop.permute.xlu1 %1451  ;;  %4511 = vmatprep.mubr.msk.bf16.mxu0 %vm1580_vm9, %v1565_v2 }
 0x1e4   : > { %v1567_v44 = vsel %vm1539_vm8, %v1534_v37, %v1452_v23  ;;  %3877 = vrot.lane.b32.xlu1 %v3800_v48, %s4797_s5 }
 0x1e5   : > { %4512 = vmatmul.mubr.msk.bf16.gmra.mxu0 %vm1580_vm9, %v1567_v44 }
 0x1ed   : > { %v1262_v53 = vpop.permute.xlu0 %1261 }
 0x1ee   : > { %v1502_v46 = vsel %vm1457_vm6, %v4197_v59, %v1262_v53 }
 0x1f2   : > { %v1264_v6 = vpop.permute.xlu1 %1263  ;;  %v4539_v16 = vpop.f32.mrf.mxu1 }
 0x1f3   : > { %v3669_v56 = vadd.f32 %v4539_v16, %v6282_v15  ;;  %v1374_v51 = vpop.permute.xlu0 %1373  ;;  %v1505_v38 = vsel %vm1457_vm6, %v4198_v41, %v1264_v6 }
 0x1f4   : > { %v3660_v12 = vpop.f32.mrf.mxu1  ;;  %v1536_v55 = vsel %vm1506_vm7, %v1502_v46, %v1374_v51 }
 0x1f5   : > { %vm3741_vm14 = vcmp.ge.f32.partialorder %v3669_v56, 0.0  ;;  %v3773_v4 = vmul.f32 0.2, %v3669_v56  ;;  %v3661_v30 = vadd.f32 %v6282_v15, %v3660_v12 }
 0x1f6   : > { %v1376_v28 = vpop.permute.xlu1 %1375  ;;  %v4540_v47 = vpop.f32.mrf.mxu1 }
 0x1f7   : > { %v3771_v39 = vmul.f32 0.2, %v3661_v30  ;;  %v3672_v60 = vadd.f32 %v4540_v47, %v6282_v15  ;;  %v3805_v9 = vsel %vm3741_vm14, %v3669_v56, %v3773_v4  ;;  %vm3739_vm15 = vcmp.ge.f32.partialorder %v3661_v30, 0.0 }
 0x1f8   : > { %v3663_v45 = vpop.f32.mrf.mxu1  ;;  %3887 = vrot.lane.b32.xlu0 %v3805_v9, %s4797_s5  ;;  %v1538_v59 = vsel %vm1506_vm7, %v1505_v38, %v1376_v28  ;;  %vm3947_vm14 = vcmask 130112  }
 0x1f9   : > { %vm3742_vm0 = vcmp.ge.f32.partialorder %v3672_v60, 0.0  ;;  %v3774_v7 = vmul.f32 0.2, %v3672_v60  ;;  %v3664_v50 = vadd.f32 %v6282_v15, %v3663_v45  ;;  %v3803_v36 = vsel %vm3739_vm15, %v3661_v30, %v3771_v39 }
 0x1fb   : > { %v3772_v14 = vmul.f32 0.2, %v3664_v50  ;;  %v3806_v1 = vsel %vm3742_vm0, %v3672_v60, %v3774_v7  ;;  %vm3740_vm6 = vcmp.ge.f32.partialorder %v3664_v50, 0.0 }
 0x1fc   : > { %3883 = vrot.lane.b32.xlu0 %v3803_v36, %s4797_s5  ;;  %3889 = vrot.lane.b32.xlu1 %v3806_v1, %s4797_s5 }
 0x1fd   : > { %v1454_v27 = vpop.permute.xlu0 %1453  ;;  %v3804_v40 = vsel %vm3740_vm6, %v3664_v50, %v3772_v14 }
 0x1fe   : > { %v1456_v41 = vpop.permute.xlu1 %1455  ;;  %v1569_v31 = vsel %vm1539_vm8, %v1536_v55, %v1454_v27 }
 0x1ff   : > { %v1571_v29 = vsel %vm1539_vm8, %v1538_v59, %v1456_v41  ;;  %4515 = vmatprep.mubr.msk.bf16.mxu0 %vm1580_vm9, %v1569_v31 }
 0x200   : > { %4516 = vmatmul.mubr.msk.bf16.gmra.mxu0 %vm1580_vm9, %v1571_v29  ;;  %3885 = vrot.lane.b32.xlu1 %v3804_v40, %s4797_s5 }
 0x20d   : > { %v4543_v33 = vpop.f32.mrf.mxu1 }
 0x20e   : > { %v3685_v21 = vadd.f32 %v4543_v33, %v6282_v15 }
 0x20f   : > { %v3676_v43 = vpop.f32.mrf.mxu1 }
 0x210   : > { %vm3745_vm1 = vcmp.ge.f32.partialorder %v3685_v21, 0.0  ;;  %v3777_v62 = vmul.f32 0.2, %v3685_v21  ;;  %v3677_v35 = vadd.f32 %v6282_v15, %v3676_v43 }
 0x211   : > { %v4544_v5 = vpop.f32.mrf.mxu1 }
 0x212   : > { %v3775_v54 = vmul.f32 0.2, %v3677_v35  ;;  %v3688_v63 = vadd.f32 %v4544_v5, %v6282_v15  ;;  %v3809_v10 = vsel %vm3745_vm1, %v3685_v21, %v3777_v62  ;;  %vm3743_vm8 = vcmp.ge.f32.partialorder %v3677_v35, 0.0 }
 0x213   : > { %v3679_v22 = vpop.f32.mrf.mxu1  ;;  %3895 = vrot.lane.b32.xlu0 %v3809_v10, %s4797_s5 }
 0x214   : > { %vm3746_vm9 = vcmp.ge.f32.partialorder %v3688_v63, 0.0  ;;  %v3778_v13 = vmul.f32 0.2, %v3688_v63  ;;  %v3680_v8 = vadd.f32 %v6282_v15, %v3679_v22  ;;  %v3807_v49 = vsel %vm3743_vm8, %v3677_v35, %v3775_v54 }
 0x215   : > { %v3856_v18 = vpop.permute.xlu0 %3855 }
 0x216   : > { %v3776_v0 = vmul.f32 0.2, %v3680_v8  ;;  %v3810_v42 = vsel %vm3746_vm9, %v3688_v63, %v3778_v13  ;;  %vm3744_vm2 = vcmp.ge.f32.partialorder %v3680_v8, 0.0 }
 0x217   : > { %3891 = vrot.lane.b32.xlu0 %v3807_v49, %s4797_s5  ;;  %3897 = vrot.lane.b32.xlu1 %v3810_v42, %s4797_s5 }
 0x218   : > { %v3808_v52 = vsel %vm3744_vm2, %v3680_v8, %v3776_v0 }
 0x219   : > { %v3858_v44 = vpop.permute.xlu1 %3857  ;;  %v3852_v48 = vpop.permute.xlu0 %3851 }
 0x21b   : > { %3893 = vrot.lane.b32.xlu1 %v3808_v52, %s4797_s5 }
 0x21d   : > { %v6394_v6 = vpop.permute.xlu1 %3853 }
 0x229   : > { %v4547_v26 = vpop.f32.mrf.mxu1 }
 0x22a   : > { %v3701_v57 = vadd.f32 %v4547_v26, %v6282_v15  ;;  %v6401_v4 = vpop.permute.xlu0 %3863 }
 0x22b   : > { %v3692_v24 = vpop.f32.mrf.mxu1 }
 0x22c   : > { %vm3749_vm3 = vcmp.ge.f32.partialorder %v3701_v57, 0.0  ;;  %v3781_v3 = vmul.f32 0.2, %v3701_v57  ;;  %v3693_v34 = vadd.f32 %v6282_v15, %v3692_v24 }
 0x22d   : > { %v4548_v19 = vpop.f32.mrf.mxu1 }
 0x22e   : > { %v3779_v17 = vmul.f32 0.2, %v3693_v34  ;;  %v3704_v58 = vadd.f32 %v4548_v19, %v6282_v15  ;;  %v3813_v20 = vsel %vm3749_vm3, %v3701_v57, %v3781_v3  ;;  %vm3747_vm4 = vcmp.ge.f32.partialorder %v3693_v34, 0.0  ;;  %v6405_v7 = vpop.permute.xlu1 %3865  ;;  %v3860_v21 = vpop.permute.xlu0 %3859 }
 0x22f   : > { %v3695_v25 = vpop.f32.mrf.mxu1  ;;  %3903 = vrot.lane.b32.xlu0 %v3813_v20, %s4797_s5 }
 0x230   : > { %vm3750_vm5 = vcmp.ge.f32.partialorder %v3704_v58, 0.0  ;;  %v3782_v37 = vmul.f32 0.2, %v3704_v58  ;;  %v3696_v11 = vadd.f32 %v6282_v15, %v3695_v25  ;;  %v3811_v61 = vsel %vm3747_vm4, %v3693_v34, %v3779_v17 }
 0x232   : > { %v3780_v2 = vmul.f32 0.2, %v3696_v11  ;;  %v3814_v32 = vsel %vm3750_vm5, %v3704_v58, %v3782_v37  ;;  %vm3748_vm10 = vcmp.ge.f32.partialorder %v3696_v11, 0.0  ;;  %v3862_v0 = vpop.permute.xlu1 %3861 }
 0x233   : > { %3899 = vrot.lane.b32.xlu0 %v3811_v61, %s4797_s5  ;;  %3905 = vrot.lane.b32.xlu1 %v3814_v32, %s4797_s5  ;;  %v3872_v3 = vpop.permute.xlu0 %3871 }
 0x234   : > { %v3812_v23 = vsel %vm3748_vm10, %v3696_v11, %v3780_v2 }
 0x237   : > { %3901 = vrot.lane.b32.xlu1 %v3812_v23, %s4797_s5  ;;  %v3874_v11 = vpop.permute.xlu1 %3873 }
 0x249   : > { %v4551_v53 = vpop.f32.mrf.mxu1 }
 0x24a   : > { %v4489_v16 = vpop.f32.mrf.mxu0  ;;  %v3717_v56 = vadd.f32 %v4551_v53, %v6282_v15 }
 0x24b   : > { %v1656_v12 = vadd.f32 %v4489_v16, %v6282_v15  ;;  %v3708_v46 = vpop.f32.mrf.mxu1 }
 0x24c   : > { %v1647_v51 = vpop.f32.mrf.mxu0  ;;  %v3709_v28 = vadd.f32 %v6282_v15, %v3708_v46  ;;  %vm3753_vm12 = vcmp.ge.f32.partialorder %v3717_v56, 0.0  ;;  %v3785_v50 = vmul.f32 0.2, %v3717_v56 }
 0x24d   : > { %vm1776_vm11 = vcmp.ge.f32.partialorder %v1656_v12, 0.0  ;;  %v1808_v30 = vmul.f32 0.2, %v1656_v12  ;;  %v1648_v38 = vadd.f32 %v6282_v15, %v1647_v51  ;;  %v4552_v47 = vpop.f32.mrf.mxu1  ;;  %v3870_v51 = vpop.permute.xlu1 %3869 }
 0x24e   : > { %vm3751_vm13 = vcmp.ge.f32.partialorder %v3709_v28, 0.0  ;;  %v3783_v39 = vmul.f32 0.2, %v3709_v28  ;;  %v4490_v60 = vpop.f32.mrf.mxu0  ;;  %v3720_v27 = vadd.f32 %v4552_v47, %v6282_v15  ;;  %v3817_v63 = vsel %vm3753_vm12, %v3717_v56, %v3785_v50 }
 0x24f   : > { %v1840_v9 = vsel %vm1776_vm11, %v1656_v12, %v1808_v30  ;;  %vm1774_vm15 = vcmp.ge.f32.partialorder %v1648_v38, 0.0  ;;  %v1806_v55 = vmul.f32 0.2, %v1648_v38  ;;  %v1659_v45 = vadd.f32 %v4490_v60, %v6282_v15  ;;  %v3711_v59 = vpop.f32.mrf.mxu1 }
 0x250   : > { %1872 = vst.msk [vmem:[%s6407_s18 + $0x10] sm:$0xff] %vm1506_vm7, %v1840_v9  ;;  %v1650_v41 = vpop.f32.mrf.mxu0  ;;  %v3712_v14 = vadd.f32 %v6282_v15, %v3711_v59  ;;  %v3815_v36 = vsel %vm3751_vm13, %v3709_v28, %v3783_v39  ;;  %vm3754_vm8 = vcmp.ge.f32.partialorder %v3720_v27, 0.0  ;;  %v3786_v5 = vmul.f32 0.2, %v3720_v27 }
 0x251   : > { %v1838_v1 = vsel %vm1774_vm15, %v1648_v38, %v1806_v55  ;;  %vm1777_vm0 = vcmp.ge.f32.partialorder %v1659_v45, 0.0  ;;  %v1809_v31 = vmul.f32 0.2, %v1659_v45  ;;  %v1651_v29 = vadd.f32 %v6282_v15, %v1650_v41  ;;  %3907 = vrot.lane.b32.xlu0 %v3815_v36, %s4797_s5  ;;  %3950 = vst.msk [vmem:[%s6407_s18 + $0x10] sm:$0xff] %vm3947_vm14, %v3856_v18 }
 0x252   : > { %1870 = vst.msk [vmem:[%s6407_s18] sm:$0xff] %vm1506_vm7, %v1838_v1  ;;  %vm3752_vm6 = vcmp.ge.f32.partialorder %v3712_v14, 0.0  ;;  %v3784_v40 = vmul.f32 0.2, %v3712_v14  ;;  %v4493_v33 = vpop.f32.mrf.mxu0  ;;  %v3818_v57 = vsel %vm3754_vm8, %v3720_v27, %v3786_v5  ;;  %v3882_v59 = vpop.permute.xlu1 %3881 }
 0x253   : > { %v1841_v43 = vsel %vm1777_vm0, %v1659_v45, %v1809_v31  ;;  %vm1775_vm1 = vcmp.ge.f32.partialorder %v1651_v29, 0.0  ;;  %v1807_v62 = vmul.f32 0.2, %v1651_v29  ;;  %v1672_v35 = vadd.f32 %v4493_v33, %v6282_v15  ;;  %3948 = vst.msk [vmem:[%s6407_s18] sm:$0xff] %vm3947_vm14, %v3852_v48 }
 0x254   : > { %1873 = vst.msk [vmem:[%s6407_s18 + $0x18] sm:$0xff] %vm1506_vm7, %v1841_v43  ;;  %v3816_v54 = vsel %vm3752_vm6, %v3712_v14, %v3784_v40  ;;  %v1663_v10 = vpop.f32.mrf.mxu0 }
 0x255   : > { %v1839_v22 = vsel %vm1775_vm1, %v1651_v29, %v1807_v62  ;;  %3909 = vrot.lane.b32.xlu1 %v3816_v54, %s4797_s5  ;;  %3911 = vrot.lane.b32.xlu0 %v3817_v63, %s4797_s5  ;;  %vm1780_vm9 = vcmp.ge.f32.partialorder %v1672_v35, 0.0  ;;  %v1812_v13 = vmul.f32 0.2, %v1672_v35  ;;  %v1664_v8 = vadd.f32 %v6282_v15, %v1663_v10  ;;  %3951 = vst.msk [vmem:[%s6407_s18 + $0x18] sm:$0xff] %vm3947_vm14, %v3858_v44  ;;  %v3868_v44 = vpop.permute.xlu0 %3867 }
 0x256   : > { %1871 = vst.msk [vmem:[%s6407_s18 + $0x8] sm:$0xff] %vm1506_vm7, %v1839_v22  ;;  %v4494_v49 = vpop.f32.mrf.mxu0  ;;  %v3878_v33 = vpop.permute.xlu1 %3877 }
 0x257   : > { %v1844_v42 = vsel %vm1780_vm9, %v1672_v35, %v1812_v13  ;;  %vm1778_vm2 = vcmp.ge.f32.partialorder %v1664_v8, 0.0  ;;  %v1810_v52 = vmul.f32 0.2, %v1664_v8  ;;  %v1675_v26 = vadd.f32 %v4494_v49, %v6282_v15  ;;  %3949 = vst.msk [vmem:[%s6407_s18 + $0x8] sm:$0xff] %vm3947_vm14, %v6394_v6 }
 0x258   : > { %1876 = vst.msk [vmem:[%s6407_s18 + $0x30] sm:$0xff] %vm1506_vm7, %v1844_v42  ;;  %v1666_v24 = vpop.f32.mrf.mxu0 }
 0x259   : > { %3913 = vrot.lane.b32.xlu1 %v3818_v57, %s4797_s5  ;;  %v1842_v34 = vsel %vm1778_vm2, %v1664_v8, %v1810_v52  ;;  %vm1781_vm3 = vcmp.ge.f32.partialorder %v1675_v26, 0.0  ;;  %v1813_v19 = vmul.f32 0.2, %v1675_v26  ;;  %v1667_v17 = vadd.f32 %v6282_v15, %v1666_v24  ;;  %3954 = vst.msk [vmem:[%s6407_s18 + $0x30] sm:$0xff] %vm3947_vm14, %v6401_v4  ;;  %v3880_v4 = vpop.permute.xlu0 %3879 }
 0x25a   : > { %1874 = vst.msk [vmem:[%s6407_s18 + $0x20] sm:$0xff] %vm1506_vm7, %v1842_v34  ;;  %v4497_v58 = vpop.f32.mrf.mxu0 }
 0x25b   : > { %v1845_v20 = vsel %vm1781_vm3, %v1675_v26, %v1813_v19  ;;  %vm1779_vm4 = vcmp.ge.f32.partialorder %v1667_v17, 0.0  ;;  %v1811_v25 = vmul.f32 0.2, %v1667_v17  ;;  %v1688_v37 = vadd.f32 %v4497_v58, %v6282_v15  ;;  %3952 = vst.msk [vmem:[%s6407_s18 + $0x20] sm:$0xff] %vm3947_vm14, %v3860_v21 }
 0x25c   : > { %1877 = vst.msk [vmem:[%s6407_s18 + $0x38] sm:$0xff] %vm1506_vm7, %v1845_v20  ;;  %v1679_v2 = vpop.f32.mrf.mxu0 }
 0x25d   : > { %v1843_v61 = vsel %vm1779_vm4, %v1667_v17, %v1811_v25  ;;  %vm1784_vm5 = vcmp.ge.f32.partialorder %v1688_v37, 0.0  ;;  %v1816_v32 = vmul.f32 0.2, %v1688_v37  ;;  %v1680_v23 = vadd.f32 %v6282_v15, %v1679_v2  ;;  %3955 = vst.msk [vmem:[%s6407_s18 + $0x38] sm:$0xff] %vm3947_vm14, %v6405_v7  ;;  %v3876_v14 = vpop.permute.xlu0 %3875 }
 0x25e   : > { %1875 = vst.msk [vmem:[%s6407_s18 + $0x28] sm:$0xff] %vm1506_vm7, %v1843_v61  ;;  %v4498_v18 = vpop.f32.mrf.mxu0 }
 0x25f   : > { %v1848_v48 = vsel %vm1784_vm5, %v1688_v37, %v1816_v32  ;;  %vm1782_vm10 = vcmp.ge.f32.partialorder %v1680_v23, 0.0  ;;  %v1814_v53 = vmul.f32 0.2, %v1680_v23  ;;  %v1691_v6 = vadd.f32 %v4498_v18, %v6282_v15  ;;  %3953 = vst.msk [vmem:[%s6407_s18 + $0x28] sm:$0xff] %vm3947_vm14, %v3862_v0 }
 0x260   : > { %1880 = vst.msk [vmem:[%s6407_s18 + $0x50] sm:$0xff] %vm1506_vm7, %v1848_v48  ;;  %v1682_v16 = vpop.f32.mrf.mxu0 }
 0x261   : > { %v1846_v56 = vsel %vm1782_vm10, %v1680_v23, %v1814_v53  ;;  %vm1785_vm11 = vcmp.ge.f32.partialorder %v1691_v6, 0.0  ;;  %v1817_v12 = vmul.f32 0.2, %v1691_v6  ;;  %3958 = vst.msk [vmem:[%s6407_s18 + $0x50] sm:$0xff] %vm3947_vm14, %v3872_v3  ;;  %v1683_v46 = vadd.f32 %v6282_v15, %v1682_v16 }
 0x262   : > { %1878 = vst.msk [vmem:[%s6407_s18 + $0x40] sm:$0xff] %vm1506_vm7, %v1846_v56  ;;  %v4501_v28 = vpop.f32.mrf.mxu0 }
 0x263   : > { %v1849_v30 = vsel %vm1785_vm11, %v1691_v6, %v1817_v12  ;;  %vm1783_vm12 = vcmp.ge.f32.partialorder %v1683_v46, 0.0  ;;  %v1815_v38 = vmul.f32 0.2, %v1683_v46  ;;  %3956 = vst.msk [vmem:[%s6407_s18 + $0x40] sm:$0xff] %vm3947_vm14, %v3868_v44  ;;  %v1704_v47 = vadd.f32 %v4501_v28, %v6282_v15 }
 0x264   : > { %1881 = vst.msk [vmem:[%s6407_s18 + $0x58] sm:$0xff] %vm1506_vm7, %v1849_v30  ;;  %v1695_v39 = vpop.f32.mrf.mxu0 }
 0x265   : > { %v1847_v60 = vsel %vm1783_vm12, %v1683_v46, %v1815_v38  ;;  %3959 = vst.msk [vmem:[%s6407_s18 + $0x58] sm:$0xff] %vm3947_vm14, %v3874_v11  ;;  %vm1788_vm13 = vcmp.ge.f32.partialorder %v1704_v47, 0.0  ;;  %v1820_v9 = vmul.f32 0.2, %v1704_v47  ;;  %v1696_v55 = vadd.f32 %v6282_v15, %v1695_v39 }
 0x266   : > { %1879 = vst.msk [vmem:[%s6407_s18 + $0x48] sm:$0xff] %vm1506_vm7, %v1847_v60  ;;  %v4502_v45 = vpop.f32.mrf.mxu0 }
 0x267   : > { %v1852_v7 = vsel %vm1788_vm13, %v1704_v47, %v1820_v9  ;;  %vm1786_vm15 = vcmp.ge.f32.partialorder %v1696_v55, 0.0  ;;  %v1818_v50 = vmul.f32 0.2, %v1696_v55  ;;  %3957 = vst.msk [vmem:[%s6407_s18 + $0x48] sm:$0xff] %vm3947_vm14, %v3870_v51  ;;  %v1707_v27 = vadd.f32 %v4502_v45, %v6282_v15 }
 0x268   : > { %1884 = vst.msk [vmem:[%s6407_s18 + $0x70] sm:$0xff] %vm1506_vm7, %v1852_v7  ;;  %v1698_v41 = vpop.f32.mrf.mxu0 }
 0x269   : > { %v1850_v36 = vsel %vm1786_vm15, %v1696_v55, %v1818_v50  ;;  %vm1789_vm0 = vcmp.ge.f32.partialorder %v1707_v27, 0.0  ;;  %v1821_v1 = vmul.f32 0.2, %v1707_v27  ;;  %3962 = vst.msk [vmem:[%s6407_s18 + $0x70] sm:$0xff] %vm3947_vm14, %v3880_v4  ;;  %v1699_v31 = vadd.f32 %v6282_v15, %v1698_v41 }
 0x26a   : > { %1882 = vst.msk [vmem:[%s6407_s18 + $0x60] sm:$0xff] %vm1506_vm7, %v1850_v36  ;;  %v3888_v62 = vpop.permute.xlu0 %3887 }
 0x26b   : > { %v1853_v29 = vsel %vm1789_vm0, %v1707_v27, %v1821_v1  ;;  %vm1787_vm6 = vcmp.ge.f32.partialorder %v1699_v31, 0.0  ;;  %v1819_v40 = vmul.f32 0.2, %v1699_v31  ;;  %3960 = vst.msk [vmem:[%s6407_s18 + $0x60] sm:$0xff] %vm3947_vm14, %v3876_v14 }
 0x26c   : > { %1885 = vst.msk [vmem:[%s6407_s18 + $0x78] sm:$0xff] %vm1506_vm7, %v1853_v29 }
 0x26d   : > { %v1851_v21 = vsel %vm1787_vm6, %v1699_v31, %v1819_v40  ;;  %3963 = vst.msk [vmem:[%s6407_s18 + $0x78] sm:$0xff] %vm3947_vm14, %v3882_v59 }
 0x26e   : > { %1883 = vst.msk [vmem:[%s6407_s18 + $0x68] sm:$0xff] %vm1506_vm7, %v1851_v21  ;;  %v4505_v43 = vpop.f32.mrf.mxu0  ;;  %v3890_v22 = vpop.permute.xlu1 %3889 }
 0x26f   : > { %3961 = vst.msk [vmem:[%s6407_s18 + $0x68] sm:$0xff] %vm3947_vm14, %v3878_v33  ;;  %v1720_v35 = vadd.f32 %v4505_v43, %v6282_v15  ;;  %v3884_v42 = vpop.permute.xlu0 %3883 }
 0x270   : > { %v1711_v5 = vpop.f32.mrf.mxu0 }
 0x271   : > { %vm1792_vm1 = vcmp.ge.f32.partialorder %v1720_v35, 0.0  ;;  %v1824_v54 = vmul.f32 0.2, %v1720_v35  ;;  %v1712_v63 = vadd.f32 %v6282_v15, %v1711_v5 }
 0x272   : > { %v4506_v10 = vpop.f32.mrf.mxu0  ;;  %v3886_v34 = vpop.permute.xlu1 %3885 }
 0x273   : > { %v1856_v13 = vsel %vm1792_vm1, %v1720_v35, %v1824_v54  ;;  %vm1790_vm8 = vcmp.ge.f32.partialorder %v1712_v63, 0.0  ;;  %v1822_v8 = vmul.f32 0.2, %v1712_v63  ;;  %v1723_v0 = vadd.f32 %v4506_v10, %v6282_v15 }
 0x274   : > { %1888 = vst.msk [vmem:[%s6407_s18 + $0x90] sm:$0xff] %vm1506_vm7, %v1856_v13  ;;  %v1714_v49 = vpop.f32.mrf.mxu0 }
 0x275   : > { %v1854_v52 = vsel %vm1790_vm8, %v1712_v63, %v1822_v8  ;;  %vm1793_vm9 = vcmp.ge.f32.partialorder %v1723_v0, 0.0  ;;  %v1825_v26 = vmul.f32 0.2, %v1723_v0  ;;  %3966 = vst.msk [vmem:[%s6407_s18 + $0x90] sm:$0xff] %vm3947_vm14, %v3888_v62  ;;  %v1715_v57 = vadd.f32 %v6282_v15, %v1714_v49 }
 0x276   : > { %1886 = vst.msk [vmem:[%s6407_s18 + $0x80] sm:$0xff] %vm1506_vm7, %v1854_v52 }
 0x277   : > { %v1857_v24 = vsel %vm1793_vm9, %v1723_v0, %v1825_v26  ;;  %vm1791_vm2 = vcmp.ge.f32.partialorder %v1715_v57, 0.0  ;;  %v1823_v3 = vmul.f32 0.2, %v1715_v57  ;;  %3964 = vst.msk [vmem:[%s6407_s18 + $0x80] sm:$0xff] %vm3947_vm14, %v3884_v42 }
 0x278   : > { %1889 = vst.msk [vmem:[%s6407_s18 + $0x98] sm:$0xff] %vm1506_vm7, %v1857_v24 }
 0x279   : > { %v1855_v19 = vsel %vm1791_vm2, %v1715_v57, %v1823_v3  ;;  %3967 = vst.msk [vmem:[%s6407_s18 + $0x98] sm:$0xff] %vm3947_vm14, %v3890_v22 }
 0x27a   : > { %1887 = vst.msk [vmem:[%s6407_s18 + $0x88] sm:$0xff] %vm1506_vm7, %v1855_v19 }
 0x27b   : > { %3965 = vst.msk [vmem:[%s6407_s18 + $0x88] sm:$0xff] %vm3947_vm14, %v3886_v34 }
 0x285   : > { %v3896_v58 = vpop.permute.xlu0 %3895 }
 0x289   : > { %v3898_v61 = vpop.permute.xlu1 %3897  ;;  %v3892_v48 = vpop.permute.xlu0 %3891 }
 0x28a   : > { %v4509_v17 = vpop.f32.mrf.mxu0 }
 0x28b   : > { %v1736_v20 = vadd.f32 %v4509_v17, %v6282_v15 }
 0x28c   : > { %v1727_v25 = vpop.f32.mrf.mxu0 }
 0x28d   : > { %vm1796_vm3 = vcmp.ge.f32.partialorder %v1736_v20, 0.0  ;;  %v1828_v37 = vmul.f32 0.2, %v1736_v20  ;;  %v1728_v11 = vadd.f32 %v6282_v15, %v1727_v25  ;;  %v3894_v46 = vpop.permute.xlu1 %3893 }
 0x28e   : > { %v4510_v2 = vpop.f32.mrf.mxu0 }
 0x28f   : > { %v1860_v32 = vsel %vm1796_vm3, %v1736_v20, %v1828_v37  ;;  %vm1794_vm4 = vcmp.ge.f32.partialorder %v1728_v11, 0.0  ;;  %v1826_v23 = vmul.f32 0.2, %v1728_v11  ;;  %v1739_v18 = vadd.f32 %v4510_v2, %v6282_v15 }
 0x290   : > { %1892 = vst.msk [vmem:[%s6407_s18 + $0xb0] sm:$0xff] %vm1506_vm7, %v1860_v32  ;;  %v1730_v44 = vpop.f32.mrf.mxu0 }
 0x291   : > { %v1858_v53 = vsel %vm1794_vm4, %v1728_v11, %v1826_v23  ;;  %vm1797_vm5 = vcmp.ge.f32.partialorder %v1739_v18, 0.0  ;;  %v1829_v6 = vmul.f32 0.2, %v1739_v18  ;;  %3970 = vst.msk [vmem:[%s6407_s18 + $0xb0] sm:$0xff] %vm3947_vm14, %v3896_v58  ;;  %v1731_v16 = vadd.f32 %v6282_v15, %v1730_v44 }
 0x292   : > { %1890 = vst.msk [vmem:[%s6407_s18 + $0xa0] sm:$0xff] %vm1506_vm7, %v1858_v53 }
 0x293   : > { %v1861_v56 = vsel %vm1797_vm5, %v1739_v18, %v1829_v6  ;;  %vm1795_vm10 = vcmp.ge.f32.partialorder %v1731_v16, 0.0  ;;  %v1827_v12 = vmul.f32 0.2, %v1731_v16  ;;  %3968 = vst.msk [vmem:[%s6407_s18 + $0xa0] sm:$0xff] %vm3947_vm14, %v3892_v48 }
 0x294   : > { %1893 = vst.msk [vmem:[%s6407_s18 + $0xb8] sm:$0xff] %vm1506_vm7, %v1861_v56 }
 0x295   : > { %v1859_v51 = vsel %vm1795_vm10, %v1731_v16, %v1827_v12  ;;  %3971 = vst.msk [vmem:[%s6407_s18 + $0xb8] sm:$0xff] %vm3947_vm14, %v3898_v61 }
 0x296   : > { %1891 = vst.msk [vmem:[%s6407_s18 + $0xa8] sm:$0xff] %vm1506_vm7, %v1859_v51 }
 0x297   : > { %3969 = vst.msk [vmem:[%s6407_s18 + $0xa8] sm:$0xff] %vm3947_vm14, %v3894_v46 }
 0x2a1   : > { %v3904_v4 = vpop.permute.xlu0 %3903 }
 0x2a5   : > { %v4513_v28 = vpop.f32.mrf.mxu0  ;;  %v3906_v9 = vpop.permute.xlu1 %3905 }
 0x2a6   : > { %v1752_v30 = vadd.f32 %v4513_v28, %v6282_v15  ;;  %v3900_v50 = vpop.permute.xlu0 %3899 }
 0x2a7   : > { %v1743_v38 = vpop.f32.mrf.mxu0 }
 0x2a8   : > { %vm1800_vm11 = vcmp.ge.f32.partialorder %v1752_v30, 0.0  ;;  %v1832_v47 = vmul.f32 0.2, %v1752_v30  ;;  %v1744_v39 = vadd.f32 %v6282_v15, %v1743_v38 }
 0x2a9   : > { %v4514_v60 = vpop.f32.mrf.mxu0  ;;  %v3902_v31 = vpop.permute.xlu1 %3901 }
 0x2aa   : > { %v1864_v55 = vsel %vm1800_vm11, %v1752_v30, %v1832_v47  ;;  %vm1798_vm12 = vcmp.ge.f32.partialorder %v1744_v39, 0.0  ;;  %v1830_v45 = vmul.f32 0.2, %v1744_v39  ;;  %v1755_v59 = vadd.f32 %v4514_v60, %v6282_v15 }
 0x2ab   : > { %1896 = vst.msk [vmem:[%s6407_s18 + $0xd0] sm:$0xff] %vm1506_vm7, %v1864_v55  ;;  %v1746_v7 = vpop.f32.mrf.mxu0 }
 0x2ac   : > { %v1862_v27 = vsel %vm1798_vm12, %v1744_v39, %v1830_v45  ;;  %vm1801_vm13 = vcmp.ge.f32.partialorder %v1755_v59, 0.0  ;;  %v1833_v41 = vmul.f32 0.2, %v1755_v59  ;;  %3974 = vst.msk [vmem:[%s6407_s18 + $0xd0] sm:$0xff] %vm3947_vm14, %v3904_v4  ;;  %v1747_v14 = vadd.f32 %v6282_v15, %v1746_v7 }
 0x2ad   : > { %1894 = vst.msk [vmem:[%s6407_s18 + $0xc0] sm:$0xff] %vm1506_vm7, %v1862_v27 }
 0x2ae   : > { %v1865_v36 = vsel %vm1801_vm13, %v1755_v59, %v1833_v41  ;;  %vm1799_vm15 = vcmp.ge.f32.partialorder %v1747_v14, 0.0  ;;  %v1831_v1 = vmul.f32 0.2, %v1747_v14  ;;  %3972 = vst.msk [vmem:[%s6407_s18 + $0xc0] sm:$0xff] %vm3947_vm14, %v3900_v50 }
 0x2af   : > { %1897 = vst.msk [vmem:[%s6407_s18 + $0xd8] sm:$0xff] %vm1506_vm7, %v1865_v36 }
 0x2b0   : > { %v1863_v29 = vsel %vm1799_vm15, %v1747_v14, %v1831_v1  ;;  %3975 = vst.msk [vmem:[%s6407_s18 + $0xd8] sm:$0xff] %vm3947_vm14, %v3906_v9 }
 0x2b1   : > { %1895 = vst.msk [vmem:[%s6407_s18 + $0xc8] sm:$0xff] %vm1506_vm7, %v1863_v29 }
 0x2b2   : > { %3973 = vst.msk [vmem:[%s6407_s18 + $0xc8] sm:$0xff] %vm3947_vm14, %v3902_v31 }
 0x2c0   : > { %v4517_v40 = vpop.f32.mrf.mxu0 }
 0x2c1   : > { %v1768_v33 = vadd.f32 %v4517_v40, %v6282_v15 }
 0x2c2   : > { %v1759_v21 = vpop.f32.mrf.mxu0 }
 0x2c3   : > { %vm1804_vm0 = vcmp.ge.f32.partialorder %v1768_v33, 0.0  ;;  %v1836_v43 = vmul.f32 0.2, %v1768_v33  ;;  %v1760_v62 = vadd.f32 %v6282_v15, %v1759_v21  ;;  %v3908_v35 = vpop.permute.xlu0 %3907 }
 0x2c4   : > { %v4518_v5 = vpop.f32.mrf.mxu0 }
 0x2c5   : > { %v1868_v54 = vsel %vm1804_vm0, %v1768_v33, %v1836_v43  ;;  %vm1802_vm6 = vcmp.ge.f32.partialorder %v1760_v62, 0.0  ;;  %v1834_v63 = vmul.f32 0.2, %v1760_v62  ;;  %v1771_v10 = vadd.f32 %v4518_v5, %v6282_v15 }
 0x2c6   : > { %1900 = vst.msk [vmem:[%s6407_s18 + $0xf0] sm:$0xff] %vm1506_vm7, %v1868_v54  ;;  %v1762_v22 = vpop.f32.mrf.mxu0 }
 0x2c7   : > { %v1866_v13 = vsel %vm1802_vm6, %v1760_v62, %v1834_v63  ;;  %vm1805_vm1 = vcmp.ge.f32.partialorder %v1771_v10, 0.0  ;;  %v1837_v8 = vmul.f32 0.2, %v1771_v10  ;;  %v1763_v0 = vadd.f32 %v6282_v15, %v1762_v22  ;;  %v3912_v49 = vpop.permute.xlu0 %3911  ;;  %v3910_v42 = vpop.permute.xlu1 %3909 }
 0x2c8   : > { %1898 = vst.msk [vmem:[%s6407_s18 + $0xe0] sm:$0xff] %vm1506_vm7, %v1866_v13 }
 0x2c9   : > { %3978 = vst.msk [vmem:[%s6407_s18 + $0xf0] sm:$0xff] %vm3947_vm14, %v3912_v49  ;;  %v1869_v52 = vsel %vm1805_vm1, %v1771_v10, %v1837_v8  ;;  %vm1803_vm8 = vcmp.ge.f32.partialorder %v1763_v0, 0.0  ;;  %v1835_v26 = vmul.f32 0.2, %v1763_v0  ;;  %3976 = vst.msk [vmem:[%s6407_s18 + $0xe0] sm:$0xff] %vm3947_vm14, %v3908_v35 }
 0x2ca   : > { %1901 = vst.msk [vmem:[%s6407_s18 + $0xf8] sm:$0xff] %vm1506_vm7, %v1869_v52 }
 0x2cb   : > { %v1867_v57 = vsel %vm1803_vm8, %v1763_v0, %v1835_v26  ;;  %v3914_v24 = vpop.permute.xlu1 %3913 }
 0x2cc   : > { %1899 = vst.msk [vmem:[%s6407_s18 + $0xe8] sm:$0xff] %vm1506_vm7, %v1867_v57 }
 0x2cd   : > { %3979 = vst.msk [vmem:[%s6407_s18 + $0xf8] sm:$0xff] %vm3947_vm14, %v3914_v24  ;;  %3977 = vst.msk [vmem:[%s6407_s18 + $0xe8] sm:$0xff] %vm3947_vm14, %v3910_v42 }
 0x2ce   : > { %s4444_s27 = sshll.u32 %s4776_s22, 1  ;;  %s4445_s28 = sshll.u32 %s4780_s23, 6 }
 0x2cf   : > { %s3996_s5 = sadd.s32 %s4445_s28, %s4444_s27  ;;  %s4009_s8 = sshll.u32 %s6407_s18, 4  ;;  %s4010_s8 = int_to_ptr.vmem [resolvable:$true] %s4009_s8 }
 0x2d0   : > { %s4446_s9 = sshll.u32 %s3996_s5, 7  ;;  %s4798_s14 = smov 256  }
 0x2d1   : > { %s3998_s13 = scalar_lea.hbm %s6632_s4, %s4446_s9  ;;  %4554 = sst [smem:[#allocation7]] (%p4884_p8), %s4798_s14 }
 0x2d2   : > { %s4799_s15 = smov 512   ;;  %s4800_s16 = smov 2  }
 0x2d3   : > { %4555 = sst [smem:[#allocation7 + $0x1]] (%p4884_p8), %s4799_s15  ;;  %s4801_s22 = smov 128  }
 0x2d4   : > { %4556 = sst [smem:[#allocation7 + $0x2]] (%p4884_p8), %s4800_s16  ;;  %s4802_s23 = smov 8  }
 0x2d5   : > { %4557 = sst [smem:[#allocation7 + $0x3]] (%p4884_p8), %s4801_s22  ;;  %s4803_s17 = smov 131072  }
 0x2d6   : > { %4558 = sst [smem:[#allocation7 + $0x4]] (%p4884_p8), %s4801_s22  ;;  %s4804_s18 = smov 0  }
 0x2d7   : > { %4559 = sst [smem:[#allocation7 + $0x5]] (%p4884_p8), %s4802_s23 }
 0x2d8   : > { %4560 = dma.general (%p4884_p8), %s4010_s8, 4096, %s3998_s13, %s3981_s19, %s4803_s17, [#allocation7], %s4804_s18, 0  }
 0x2d9 PF: > { %p4566_p5 = scmp.ge.s32.totalorder %s4792_s26, 2  ;;  %s4037_s27 = sand.u32 1, %s4764_s20  }
 0x2da   : > { %s4038_s28 = scalar_lea.sflag [#allocation5], %s4037_s27 }
 0x2db   : > { %p4563_p6 = pnand %p4566_p5, %p4893_p13 }
 0x2dd   : > { %p4564_p7 = pneg %p4563_p6 }
 0x2df   : > { %4759 = dma.done.wait (%p4564_p7), %s4038_s28, 4096  }
 0x2e0   : > { %4761 = vsyncadd (%p4564_p7), %s4038_s28, 4294963200  ;;  %s23_s26 = sadd.s32 1, %s4792_s26   ;;  %s6681_s20 = smov %s4768_s21 }
 0x2e1   : > { %p20_p9 = scmp.ge.s32.totalorder %s23_s26, 6   ;;  %s6682_s21 = smov %s4772_s0 }
 0x2e2   : > { %s6683_s0 = smov %s4902_s11  ;;  %s6684_s22 = smov %s4784_s24 }
 0x2e3   : > { %s6685_s23 = smov %s4788_s25  ;;  %s6686_s24 = smov %s6689_s29 }
 0x2e4   : > { %s6687_s25 = smov %s6693_s30  ;;  %22 = sbr.rel (!%p20_p9) target bundleno = 20 (0x14), region = 78 }
 0x2e9   :  { %4043 = vsyncpa [#allocation5], 1 }
 0x2ea   :  { %4045 = vsyncpa [#allocation5 + $0x1], 1 }

</bundles_post_ra>
